<compile_context>
chip_gen: v7x
topology: tpu7x:2x2x1
jax: 0.10.0
libtpu: 0.0.40
codegen_flags: <defaults>
</compile_context>

<pallas_src>
from functools import partial

import jax
import jax.numpy as jnp
from jax.experimental import pallas as pl
from jax.experimental.pallas import tpu as pltpu

# ---------------- model hyper-parameters ----------------
NUM_IN_CH = 3
C_HID = 8
LATENT_DIM = 64

_COMPILER_PARAMS = pltpu.CompilerParams(dimension_semantics=("parallel",))


# ================================ kernel helpers =================================
def _gelu(y):
    # TODO(synk): nn.GELU default is erf-based; tanh approximation used for robust
    # Mosaic lowering (kept in f32).
    c = 0.7978845608028654  # sqrt(2/pi)
    return 0.5 * y * (1.0 + jnp.tanh(c * (y + 0.044715 * y * y * y)))


# ================================ Pallas kernels =================================
def _conv_pair_kernel(q_ref, w1_ref, b1_ref, w2_ref, b2_ref, o_ref, pad_ref,
                      *, ho, wo, c_out):
    """One sample: [stride-2 conv expressed as k=2 s=1 conv on s2d input] + GELU,
    then [k=3, pad=1, s=1 conv] + GELU, intermediate kept in VMEM scratch."""
    cin_s2d = q_ref.shape[3]
    m = ho * wo

    # ---- first conv (k=2 taps on the space-to-depth input) ----
    acc = jnp.zeros((m, c_out), jnp.float32)
    for da in range(2):
        for db in range(2):
            patch = q_ref[0, da:da + ho, db:db + wo, :]            # (ho, wo, 4*cin)
            acc += jnp.dot(patch.reshape(m, cin_s2d).astype(jnp.bfloat16),
                           w1_ref[da * 2 + db],
                           preferred_element_type=jnp.float32)
    h = _gelu(acc + b1_ref[...])                                    # (m, c_out) f32

    # ---- padded intermediate in VMEM scratch (never touches HBM) ----
    pad_ref[...] = jnp.zeros(pad_ref.shape, pad_ref.dtype)
    pad_ref[1:ho + 1, 1:wo + 1, :] = h.reshape(ho, wo, c_out)

    # ---- second conv (k=3, pad=1, stride=1) ----
    acc2 = jnp.zeros((m, c_out), jnp.float32)
    for dy in range(3):
        for dx in range(3):
            patch = pad_ref[dy:dy + ho, dx:dx + wo, :]              # (ho, wo, c_out)
            acc2 += jnp.dot(patch.reshape(m, c_out).astype(jnp.bfloat16),
                            w2_ref[dy * 3 + dx],
                            preferred_element_type=jnp.float32)
    h2 = _gelu(acc2 + b2_ref[...])
    o_ref[...] = h2.reshape(1, ho, wo, c_out)


def _final_block_kernel(q_ref, w5_ref, b5_ref, wl_ref, bl_ref, o_ref):
    """One sample: last stride-2 conv (as k=2 conv on s2d input) + GELU, then the
    flatten + Linear folded into the same kernel (per-row accumulation avoids any
    lane-merging reshape)."""
    c5 = 2 * C_HID                                       # conv output channels (16)
    out = jnp.zeros((1, LATENT_DIM), jnp.float32)
    for i in range(4):                                   # output rows (h)
        row_acc = jnp.zeros((4, c5), jnp.float32)
        for da in range(2):
            for db in range(2):
                patch = q_ref[0, i + da, db:db + 4, :]   # (4, 64)
                row_acc += jnp.dot(patch.astype(jnp.bfloat16),
                                   w5_ref[da * 2 + db],
                                   preferred_element_type=jnp.float32)
        row = _gelu(row_acc + b5_ref[...])               # (4, 16) = (w, c)
        # Linear over NHWC-flattened features: feature index = (i*4 + w)*c5 + c.
        for w in range(4):
            s = i * 4 + w
            out += jnp.dot(row[w:w + 1, :].astype(jnp.bfloat16),
                           wl_ref[s * c5:(s + 1) * c5, :],
                           preferred_element_type=jnp.float32)
    o_ref[...] = (out + bl_ref[...]).reshape(1, 1, LATENT_DIM)


# ============================== pallas_call wrappers ==============================
def _conv_pair_call(q, w1s, b1, w2s, b2, *, ho, wo, c_out):
    B = q.shape[0]
    kern = partial(_conv_pair_kernel, ho=ho, wo=wo, c_out=c_out)
    return pl.pallas_call(
        kern,
        out_shape=jax.ShapeDtypeStruct((B, ho, wo, c_out), jnp.float32),
        grid=(B,),
        in_specs=[
            pl.BlockSpec((1,) + q.shape[1:], lambda b: (b, 0, 0, 0)),
            pl.BlockSpec(w1s.shape, lambda b: (0, 0, 0)),
            pl.BlockSpec(b1.shape, lambda b: (0, 0)),
            pl.BlockSpec(w2s.shape, lambda b: (0, 0, 0)),
            pl.BlockSpec(b2.shape, lambda b: (0, 0)),
        ],
        out_specs=pl.BlockSpec((1, ho, wo, c_out), lambda b: (b, 0, 0, 0)),
        scratch_shapes=[pltpu.VMEM((ho + 2, wo + 2, c_out), jnp.float32)],
        compiler_params=_COMPILER_PARAMS,
    )(q, w1s, b1, w2s, b2)


def _final_call(q, w5s, b5, wl, bl):
    B = q.shape[0]
    out = pl.pallas_call(
        _final_block_kernel,
        out_shape=jax.ShapeDtypeStruct((B, 1, LATENT_DIM), jnp.float32),
        grid=(B,),
        in_specs=[
            pl.BlockSpec((1,) + q.shape[1:], lambda b: (b, 0, 0, 0)),
            pl.BlockSpec(w5s.shape, lambda b: (0, 0, 0)),
            pl.BlockSpec(b5.shape, lambda b: (0, 0)),
            pl.BlockSpec(wl.shape, lambda b: (0, 0)),
            pl.BlockSpec(bl.shape, lambda b: (0, 0)),
        ],
        out_specs=pl.BlockSpec((1, 1, LATENT_DIM), lambda b: (b, 0, 0)),
        compiler_params=_COMPILER_PARAMS,
    )(q, w5s, b5, wl, bl)
    return out[:, 0, :]


# ============================ host-side glue (tiny, pure layout) ===================
def _pad_hw(x_nhwc):
    return jnp.pad(x_nhwc, ((0, 0), (1, 1), (1, 1), (0, 0)))


def _space_to_depth2(xp):
    """(B, 2P, 2R, C) -> (B, P, R, 4C) with channel order (a*2 + b)*C + c."""
    B, H2, W2, C = xp.shape
    P, R = H2 // 2, W2 // 2
    x = xp.reshape(B, P, 2, R, 2, C)
    x = jnp.transpose(x, (0, 1, 3, 2, 4, 5))
    return x.reshape(B, P, R, 4 * C)


# ============================ parameter preparation (one-time) =====================
def _s2d_conv_weight(w_hwio):
    """Rearrange a (3,3,Cin,Cout) stride-2 conv weight into the (4, 4*Cin, Cout)
    taps of the equivalent stride-1, kernel-2 conv on the space-to-depth(2) input."""
    kh, kw, cin, cout = w_hwio.shape
    assert kh == 3 and kw == 3
    dec = {0: (0, 0), 1: (0, 1), 2: (1, 0)}           # dy -> (da, a) with dy = 2*da + a
    w6 = jnp.zeros((2, 2, 2, 2, cin, cout), w_hwio.dtype)   # (da, db, a, b, cin, cout)
    for dy in range(3):
        da, a = dec[dy]
        for dx in range(3):
            db, b = dec[dx]
            w6 = w6.at[da, db, a, b].set(w_hwio[dy, dx])
    return w6.reshape(4, 4 * cin, cout)


def init_params(key, scale=0.1):
    def nrm(k, shape):
        return scale * jax.random.normal(k, shape, jnp.float32)

    ks = jax.random.split(key, 12)
    w1, b1 = nrm(ks[0], (3, 3, NUM_IN_CH, C_HID)), nrm(ks[1], (C_HID,))
    w2, b2 = nrm(ks[2], (3, 3, C_HID, C_HID)), nrm(ks[3], (C_HID,))
    w3, b3 = nrm(ks[4], (3, 3, C_HID, 2 * C_HID)), nrm(ks[5], (2 * C_HID,))
    w4, b4 = nrm(ks[6], (3, 3, 2 * C_HID, 2 * C_HID)), nrm(ks[7], (2 * C_HID,))
    w5, b5 = nrm(ks[8], (3, 3, 2 * C_HID, 2 * C_HID)), nrm(ks[9], (2 * C_HID,))
    # NOTE: wl rows are in NHWC (h, w, c) flatten order; a torch checkpoint (NCHW
    # flatten) would get a one-time row permutation here — free/offline.
    wl, bl = nrm(ks[10], (2 * 16 * C_HID, LATENT_DIM)), nrm(ks[11], (LATENT_DIM,))

    bf16 = jnp.bfloat16
    return {
        "w1s": _s2d_conv_weight(w1).astype(bf16), "b1": b1.reshape(1, -1),
        "w2s": w2.reshape(9, C_HID, C_HID).astype(bf16), "b2": b2.reshape(1, -1),
        "w3s": _s2d_conv_weight(w3).astype(bf16), "b3": b3.reshape(1, -1),
        "w4s": w4.reshape(9, 2 * C_HID, 2 * C_HID).astype(bf16), "b4": b4.reshape(1, -1),
        "w5s": _s2d_conv_weight(w5).astype(bf16), "b5": b5.reshape(1, -1),
        "wl": wl.astype(bf16), "bl": bl.reshape(1, -1),
    }


# ================================ Encoder.forward =================================
def encoder_forward(p, img_nchw):
    # Single layout transpose at the public API boundary (pipeline is NHWC).
    x = jnp.transpose(img_nchw, (0, 2, 3, 1)).astype(jnp.float32)     # (B, 32, 32, 3)

    q1 = _space_to_depth2(_pad_hw(x))                                 # (B, 17, 17, 12)
    h2 = _conv_pair_call(q1, p["w1s"], p["b1"], p["w2s"], p["b2"],
                         ho=16, wo=16, c_out=C_HID)                   # (B, 16, 16, 8)

    q2 = _space_to_depth2(_pad_hw(h2))                                # (B, 9, 9, 32)
    h4 = _conv_pair_call(q2, p["w3s"], p["b3"], p["w4s"], p["b4"],
                         ho=8, wo=8, c_out=2 * C_HID)                 # (B, 8, 8, 16)

    q3 = _space_to_depth2(_pad_hw(h4))                                # (B, 5, 5, 64)
    return _final_call(q3, p["w5s"], p["b5"], p["wl"], p["bl"])       # (B, 64)


# ====================================== main ======================================
if __name__ == "__main__":
    root = jax.random.PRNGKey(0)
    k_param, k_img = jax.random.split(root)
    params = init_params(k_param)

    B = 2
    # Linear(2*16*c_hid) in the reference fixes the input spatial size at 32x32.
    img = jax.random.normal(k_img, (B, NUM_IN_CH, 32, 32), jnp.float32)

    fwd = jax.jit(encoder_forward)
    z = jax.block_until_ready(fwd(params, img))

    assert z.shape == (B, LATENT_DIM), z.shape
    assert bool(jnp.all(jnp.isfinite(z))), z
    print("KERNEL_OK")
</pallas_src>

<mosaic_0001>
module attributes {stable_mosaic.version = 11 : i64} {
  func.func @_conv_pair_kernel(%arg0: i32, %arg1: memref<1x17x17x12xf32, #tpu.memory_space<vmem>>, %arg2: memref<4x12x8xbf16, #tpu.memory_space<vmem>>, %arg3: memref<1x8xf32, #tpu.memory_space<vmem>>, %arg4: memref<9x8x8xbf16, #tpu.memory_space<vmem>>, %arg5: memref<1x8xf32, #tpu.memory_space<vmem>>, %arg6: memref<1x16x16x8xf32, #tpu.memory_space<vmem>>, %arg7: memref<18x18x8xf32, #tpu.memory_space<vmem>>) attributes {dimension_semantics = [#tpu.dimension_semantics<parallel>], iteration_bounds = array<i64: 2>, scalar_prefetch = 0 : i64, scratch_operands = 1 : i64, tpu.core_type = #tpu.core_type<tc>, window_params = [{transform_indices = @transform_0, window_bounds = array<i64: 1, 17, 17, 12>}, {pipeline_mode = #tpu.pipeline_mode<synchronous>, transform_indices = @transform_1, window_bounds = array<i64: 4, 12, 8>}, {pipeline_mode = #tpu.pipeline_mode<synchronous>, transform_indices = @transform_2, window_bounds = array<i64: 1, 8>}, {pipeline_mode = #tpu.pipeline_mode<synchronous>, transform_indices = @transform_3, window_bounds = array<i64: 9, 8, 8>}, {pipeline_mode = #tpu.pipeline_mode<synchronous>, transform_indices = @transform_4, window_bounds = array<i64: 1, 8>}, {transform_indices = @transform_5, window_bounds = array<i64: 1, 16, 16, 8>}]} {
    %cst = arith.constant 0.000000e+00 : f32
    %0 = vector.broadcast %cst : f32 to vector<256x8xf32>
    %c0 = arith.constant 0 : index
    %c0_0 = arith.constant 0 : index
    %c0_1 = arith.constant 0 : index
    %c0_2 = arith.constant 0 : index
    %1 = vector.load %arg1[%c0, %c0_0, %c0_1, %c0_2] : memref<1x17x17x12xf32, #tpu.memory_space<vmem>>, vector<1x16x16x12xf32>
    %2 = vector.shape_cast %1 : vector<1x16x16x12xf32> to vector<16x16x12xf32>
    %3 = vector.shape_cast %2 : vector<16x16x12xf32> to vector<256x12xf32>
    %4 = arith.truncf %3 : vector<256x12xf32> to vector<256x12xbf16>
    %c0_3 = arith.constant 0 : index
    %c0_4 = arith.constant 0 : index
    %c0_5 = arith.constant 0 : index
    %5 = vector.load %arg2[%c0_3, %c0_4, %c0_5] : memref<4x12x8xbf16, #tpu.memory_space<vmem>>, vector<1x12x8xbf16>
    %6 = vector.shape_cast %5 : vector<1x12x8xbf16> to vector<12x8xbf16>
    %cst_6 = arith.constant dense<0.000000e+00> : vector<256x8xf32>
    %7 = tpu.matmul %4, %6, %cst_6 {dimension_numbers = #tpu.dot_dimension_numbers<[1], [0], [0], [1], [0, 0, 1, 1], [], []>} : vector<256x12xbf16>, vector<12x8xbf16>, vector<256x8xf32> -> vector<256x8xf32>
    %8 = arith.addf %0, %7 : vector<256x8xf32>
    %c0_7 = arith.constant 0 : index
    %c0_8 = arith.constant 0 : index
    %c1 = arith.constant 1 : index
    %c0_9 = arith.constant 0 : index
    %9 = vector.load %arg1[%c0_7, %c0_8, %c1, %c0_9] : memref<1x17x17x12xf32, #tpu.memory_space<vmem>>, vector<1x16x16x12xf32>
    %10 = vector.shape_cast %9 : vector<1x16x16x12xf32> to vector<16x16x12xf32>
    %11 = vector.shape_cast %10 : vector<16x16x12xf32> to vector<256x12xf32>
    %12 = arith.truncf %11 : vector<256x12xf32> to vector<256x12xbf16>
    %c1_10 = arith.constant 1 : index
    %c0_11 = arith.constant 0 : index
    %c0_12 = arith.constant 0 : index
    %13 = vector.load %arg2[%c1_10, %c0_11, %c0_12] : memref<4x12x8xbf16, #tpu.memory_space<vmem>>, vector<1x12x8xbf16>
    %14 = vector.shape_cast %13 : vector<1x12x8xbf16> to vector<12x8xbf16>
    %cst_13 = arith.constant dense<0.000000e+00> : vector<256x8xf32>
    %15 = tpu.matmul %12, %14, %cst_13 {dimension_numbers = #tpu.dot_dimension_numbers<[1], [0], [0], [1], [0, 0, 1, 1], [], []>} : vector<256x12xbf16>, vector<12x8xbf16>, vector<256x8xf32> -> vector<256x8xf32>
    %16 = arith.addf %8, %15 : vector<256x8xf32>
    %c0_14 = arith.constant 0 : index
    %c1_15 = arith.constant 1 : index
    %c0_16 = arith.constant 0 : index
    %c0_17 = arith.constant 0 : index
    %17 = vector.load %arg1[%c0_14, %c1_15, %c0_16, %c0_17] : memref<1x17x17x12xf32, #tpu.memory_space<vmem>>, vector<1x16x16x12xf32>
    %18 = vector.shape_cast %17 : vector<1x16x16x12xf32> to vector<16x16x12xf32>
    %19 = vector.shape_cast %18 : vector<16x16x12xf32> to vector<256x12xf32>
    %20 = arith.truncf %19 : vector<256x12xf32> to vector<256x12xbf16>
    %c2 = arith.constant 2 : index
    %c0_18 = arith.constant 0 : index
    %c0_19 = arith.constant 0 : index
    %21 = vector.load %arg2[%c2, %c0_18, %c0_19] : memref<4x12x8xbf16, #tpu.memory_space<vmem>>, vector<1x12x8xbf16>
    %22 = vector.shape_cast %21 : vector<1x12x8xbf16> to vector<12x8xbf16>
    %cst_20 = arith.constant dense<0.000000e+00> : vector<256x8xf32>
    %23 = tpu.matmul %20, %22, %cst_20 {dimension_numbers = #tpu.dot_dimension_numbers<[1], [0], [0], [1], [0, 0, 1, 1], [], []>} : vector<256x12xbf16>, vector<12x8xbf16>, vector<256x8xf32> -> vector<256x8xf32>
    %24 = arith.addf %16, %23 : vector<256x8xf32>
    %c0_21 = arith.constant 0 : index
    %c1_22 = arith.constant 1 : index
    %c1_23 = arith.constant 1 : index
    %c0_24 = arith.constant 0 : index
    %25 = vector.load %arg1[%c0_21, %c1_22, %c1_23, %c0_24] : memref<1x17x17x12xf32, #tpu.memory_space<vmem>>, vector<1x16x16x12xf32>
    %26 = vector.shape_cast %25 : vector<1x16x16x12xf32> to vector<16x16x12xf32>
    %27 = vector.shape_cast %26 : vector<16x16x12xf32> to vector<256x12xf32>
    %28 = arith.truncf %27 : vector<256x12xf32> to vector<256x12xbf16>
    %c3 = arith.constant 3 : index
    %c0_25 = arith.constant 0 : index
    %c0_26 = arith.constant 0 : index
    %29 = vector.load %arg2[%c3, %c0_25, %c0_26] : memref<4x12x8xbf16, #tpu.memory_space<vmem>>, vector<1x12x8xbf16>
    %30 = vector.shape_cast %29 : vector<1x12x8xbf16> to vector<12x8xbf16>
    %cst_27 = arith.constant dense<0.000000e+00> : vector<256x8xf32>
    %31 = tpu.matmul %28, %30, %cst_27 {dimension_numbers = #tpu.dot_dimension_numbers<[1], [0], [0], [1], [0, 0, 1, 1], [], []>} : vector<256x12xbf16>, vector<12x8xbf16>, vector<256x8xf32> -> vector<256x8xf32>
    %32 = arith.addf %24, %31 : vector<256x8xf32>
    %c0_28 = arith.constant 0 : index
    %c0_29 = arith.constant 0 : index
    %33 = vector.load %arg3[%c0_28, %c0_29] : memref<1x8xf32, #tpu.memory_space<vmem>>, vector<1x8xf32>
    %34 = vector.broadcast %33 : vector<1x8xf32> to vector<256x8xf32>
    %35 = arith.addf %32, %34 : vector<256x8xf32>
    %cst_30 = arith.constant 5.000000e-01 : f32
    %36 = vector.broadcast %cst_30 : f32 to vector<256x8xf32>
    %37 = arith.mulf %36, %35 : vector<256x8xf32>
    %cst_31 = arith.constant 4.471500e-02 : f32
    %38 = vector.broadcast %cst_31 : f32 to vector<256x8xf32>
    %39 = arith.mulf %38, %35 : vector<256x8xf32>
    %40 = arith.mulf %39, %35 : vector<256x8xf32>
    %41 = arith.mulf %40, %35 : vector<256x8xf32>
    %42 = arith.addf %35, %41 : vector<256x8xf32>
    %cst_32 = arith.constant 0.797884583 : f32
    %43 = vector.broadcast %cst_32 : f32 to vector<256x8xf32>
    %44 = arith.mulf %43, %42 : vector<256x8xf32>
    %45 = math.tanh %44 : vector<256x8xf32>
    %cst_33 = arith.constant 1.000000e+00 : f32
    %46 = vector.broadcast %cst_33 : f32 to vector<256x8xf32>
    %47 = arith.addf %46, %45 : vector<256x8xf32>
    %48 = arith.mulf %37, %47 : vector<256x8xf32>
    %cst_34 = arith.constant 0.000000e+00 : f32
    %49 = vector.broadcast %cst_34 : f32 to vector<18x18x8xf32>
    %c0_35 = arith.constant 0 : index
    %c0_36 = arith.constant 0 : index
    %c0_37 = arith.constant 0 : index
    %50 = vector.load %arg7[%c0_35, %c0_36, %c0_37] : memref<18x18x8xf32, #tpu.memory_space<vmem>>, vector<18x18x8xf32>
    tpu.vector_store %arg7[%c0_35, %c0_36, %c0_37], %49 {strides = array<i32>} : memref<18x18x8xf32, #tpu.memory_space<vmem>>, vector<18x18x8xf32>,
    %51 = vector.shape_cast %48 : vector<256x8xf32> to vector<16x16x8xf32>
    %c1_38 = arith.constant 1 : index
    %c1_39 = arith.constant 1 : index
    %c0_40 = arith.constant 0 : index
    %52 = vector.load %arg7[%c1_38, %c1_39, %c0_40] : memref<18x18x8xf32, #tpu.memory_space<vmem>>, vector<16x16x8xf32>
    tpu.vector_store %arg7[%c1_38, %c1_39, %c0_40], %51 {strides = array<i32>} : memref<18x18x8xf32, #tpu.memory_space<vmem>>, vector<16x16x8xf32>,
    %cst_41 = arith.constant 0.000000e+00 : f32
    %53 = vector.broadcast %cst_41 : f32 to vector<256x8xf32>
    %c0_42 = arith.constant 0 : index
    %c0_43 = arith.constant 0 : index
    %c0_44 = arith.constant 0 : index
    %54 = vector.load %arg7[%c0_42, %c0_43, %c0_44] : memref<18x18x8xf32, #tpu.memory_space<vmem>>, vector<16x16x8xf32>
    %55 = vector.shape_cast %54 : vector<16x16x8xf32> to vector<256x8xf32>
    %56 = arith.truncf %55 : vector<256x8xf32> to vector<256x8xbf16>
    %c0_45 = arith.constant 0 : index
    %c0_46 = arith.constant 0 : index
    %c0_47 = arith.constant 0 : index
    %57 = vector.load %arg4[%c0_45, %c0_46, %c0_47] : memref<9x8x8xbf16, #tpu.memory_space<vmem>>, vector<1x8x8xbf16>
    %58 = vector.shape_cast %57 : vector<1x8x8xbf16> to vector<8x8xbf16>
    %cst_48 = arith.constant dense<0.000000e+00> : vector<256x8xf32>
    %59 = tpu.matmul %56, %58, %cst_48 {dimension_numbers = #tpu.dot_dimension_numbers<[1], [0], [0], [1], [0, 0, 1, 1], [], []>} : vector<256x8xbf16>, vector<8x8xbf16>, vector<256x8xf32> -> vector<256x8xf32>
    %60 = arith.addf %53, %59 : vector<256x8xf32>
    %c0_49 = arith.constant 0 : index
    %c1_50 = arith.constant 1 : index
    %c0_51 = arith.constant 0 : index
    %61 = vector.load %arg7[%c0_49, %c1_50, %c0_51] : memref<18x18x8xf32, #tpu.memory_space<vmem>>, vector<16x16x8xf32>
    %62 = vector.shape_cast %61 : vector<16x16x8xf32> to vector<256x8xf32>
    %63 = arith.truncf %62 : vector<256x8xf32> to vector<256x8xbf16>
    %c1_52 = arith.constant 1 : index
    %c0_53 = arith.constant 0 : index
    %c0_54 = arith.constant 0 : index
    %64 = vector.load %arg4[%c1_52, %c0_53, %c0_54] : memref<9x8x8xbf16, #tpu.memory_space<vmem>>, vector<1x8x8xbf16>
    %65 = vector.shape_cast %64 : vector<1x8x8xbf16> to vector<8x8xbf16>
    %cst_55 = arith.constant dense<0.000000e+00> : vector<256x8xf32>
    %66 = tpu.matmul %63, %65, %cst_55 {dimension_numbers = #tpu.dot_dimension_numbers<[1], [0], [0], [1], [0, 0, 1, 1], [], []>} : vector<256x8xbf16>, vector<8x8xbf16>, vector<256x8xf32> -> vector<256x8xf32>
    %67 = arith.addf %60, %66 : vector<256x8xf32>
    %c0_56 = arith.constant 0 : index
    %c2_57 = arith.constant 2 : index
    %c0_58 = arith.constant 0 : index
    %68 = vector.load %arg7[%c0_56, %c2_57, %c0_58] : memref<18x18x8xf32, #tpu.memory_space<vmem>>, vector<16x16x8xf32>
    %69 = vector.shape_cast %68 : vector<16x16x8xf32> to vector<256x8xf32>
    %70 = arith.truncf %69 : vector<256x8xf32> to vector<256x8xbf16>
    %c2_59 = arith.constant 2 : index
    %c0_60 = arith.constant 0 : index
    %c0_61 = arith.constant 0 : index
    %71 = vector.load %arg4[%c2_59, %c0_60, %c0_61] : memref<9x8x8xbf16, #tpu.memory_space<vmem>>, vector<1x8x8xbf16>
    %72 = vector.shape_cast %71 : vector<1x8x8xbf16> to vector<8x8xbf16>
    %cst_62 = arith.constant dense<0.000000e+00> : vector<256x8xf32>
    %73 = tpu.matmul %70, %72, %cst_62 {dimension_numbers = #tpu.dot_dimension_numbers<[1], [0], [0], [1], [0, 0, 1, 1], [], []>} : vector<256x8xbf16>, vector<8x8xbf16>, vector<256x8xf32> -> vector<256x8xf32>
    %74 = arith.addf %67, %73 : vector<256x8xf32>
    %c1_63 = arith.constant 1 : index
    %c0_64 = arith.constant 0 : index
    %c0_65 = arith.constant 0 : index
    %75 = vector.load %arg7[%c1_63, %c0_64, %c0_65] : memref<18x18x8xf32, #tpu.memory_space<vmem>>, vector<16x16x8xf32>
    %76 = vector.shape_cast %75 : vector<16x16x8xf32> to vector<256x8xf32>
    %77 = arith.truncf %76 : vector<256x8xf32> to vector<256x8xbf16>
    %c3_66 = arith.constant 3 : index
    %c0_67 = arith.constant 0 : index
    %c0_68 = arith.constant 0 : index
    %78 = vector.load %arg4[%c3_66, %c0_67, %c0_68] : memref<9x8x8xbf16, #tpu.memory_space<vmem>>, vector<1x8x8xbf16>
    %79 = vector.shape_cast %78 : vector<1x8x8xbf16> to vector<8x8xbf16>
    %cst_69 = arith.constant dense<0.000000e+00> : vector<256x8xf32>
    %80 = tpu.matmul %77, %79, %cst_69 {dimension_numbers = #tpu.dot_dimension_numbers<[1], [0], [0], [1], [0, 0, 1, 1], [], []>} : vector<256x8xbf16>, vector<8x8xbf16>, vector<256x8xf32> -> vector<256x8xf32>
    %81 = arith.addf %74, %80 : vector<256x8xf32>
    %c1_70 = arith.constant 1 : index
    %c1_71 = arith.constant 1 : index
    %c0_72 = arith.constant 0 : index
    %82 = vector.load %arg7[%c1_70, %c1_71, %c0_72] : memref<18x18x8xf32, #tpu.memory_space<vmem>>, vector<16x16x8xf32>
    %83 = vector.shape_cast %82 : vector<16x16x8xf32> to vector<256x8xf32>
    %84 = arith.truncf %83 : vector<256x8xf32> to vector<256x8xbf16>
    %c4 = arith.constant 4 : index
    %c0_73 = arith.constant 0 : index
    %c0_74 = arith.constant 0 : index
    %85 = vector.load %arg4[%c4, %c0_73, %c0_74] : memref<9x8x8xbf16, #tpu.memory_space<vmem>>, vector<1x8x8xbf16>
    %86 = vector.shape_cast %85 : vector<1x8x8xbf16> to vector<8x8xbf16>
    %cst_75 = arith.constant dense<0.000000e+00> : vector<256x8xf32>
    %87 = tpu.matmul %84, %86, %cst_75 {dimension_numbers = #tpu.dot_dimension_numbers<[1], [0], [0], [1], [0, 0, 1, 1], [], []>} : vector<256x8xbf16>, vector<8x8xbf16>, vector<256x8xf32> -> vector<256x8xf32>
    %88 = arith.addf %81, %87 : vector<256x8xf32>
    %c1_76 = arith.constant 1 : index
    %c2_77 = arith.constant 2 : index
    %c0_78 = arith.constant 0 : index
    %89 = vector.load %arg7[%c1_76, %c2_77, %c0_78] : memref<18x18x8xf32, #tpu.memory_space<vmem>>, vector<16x16x8xf32>
    %90 = vector.shape_cast %89 : vector<16x16x8xf32> to vector<256x8xf32>
    %91 = arith.truncf %90 : vector<256x8xf32> to vector<256x8xbf16>
    %c5 = arith.constant 5 : index
    %c0_79 = arith.constant 0 : index
    %c0_80 = arith.constant 0 : index
    %92 = vector.load %arg4[%c5, %c0_79, %c0_80] : memref<9x8x8xbf16, #tpu.memory_space<vmem>>, vector<1x8x8xbf16>
    %93 = vector.shape_cast %92 : vector<1x8x8xbf16> to vector<8x8xbf16>
    %cst_81 = arith.constant dense<0.000000e+00> : vector<256x8xf32>
    %94 = tpu.matmul %91, %93, %cst_81 {dimension_numbers = #tpu.dot_dimension_numbers<[1], [0], [0], [1], [0, 0, 1, 1], [], []>} : vector<256x8xbf16>, vector<8x8xbf16>, vector<256x8xf32> -> vector<256x8xf32>
    %95 = arith.addf %88, %94 : vector<256x8xf32>
    %c2_82 = arith.constant 2 : index
    %c0_83 = arith.constant 0 : index
    %c0_84 = arith.constant 0 : index
    %96 = vector.load %arg7[%c2_82, %c0_83, %c0_84] : memref<18x18x8xf32, #tpu.memory_space<vmem>>, vector<16x16x8xf32>
    %97 = vector.shape_cast %96 : vector<16x16x8xf32> to vector<256x8xf32>
    %98 = arith.truncf %97 : vector<256x8xf32> to vector<256x8xbf16>
    %c6 = arith.constant 6 : index
    %c0_85 = arith.constant 0 : index
    %c0_86 = arith.constant 0 : index
    %99 = vector.load %arg4[%c6, %c0_85, %c0_86] : memref<9x8x8xbf16, #tpu.memory_space<vmem>>, vector<1x8x8xbf16>
    %100 = vector.shape_cast %99 : vector<1x8x8xbf16> to vector<8x8xbf16>
    %cst_87 = arith.constant dense<0.000000e+00> : vector<256x8xf32>
    %101 = tpu.matmul %98, %100, %cst_87 {dimension_numbers = #tpu.dot_dimension_numbers<[1], [0], [0], [1], [0, 0, 1, 1], [], []>} : vector<256x8xbf16>, vector<8x8xbf16>, vector<256x8xf32> -> vector<256x8xf32>
    %102 = arith.addf %95, %101 : vector<256x8xf32>
    %c2_88 = arith.constant 2 : index
    %c1_89 = arith.constant 1 : index
    %c0_90 = arith.constant 0 : index
    %103 = vector.load %arg7[%c2_88, %c1_89, %c0_90] : memref<18x18x8xf32, #tpu.memory_space<vmem>>, vector<16x16x8xf32>
    %104 = vector.shape_cast %103 : vector<16x16x8xf32> to vector<256x8xf32>
    %105 = arith.truncf %104 : vector<256x8xf32> to vector<256x8xbf16>
    %c7 = arith.constant 7 : index
    %c0_91 = arith.constant 0 : index
    %c0_92 = arith.constant 0 : index
    %106 = vector.load %arg4[%c7, %c0_91, %c0_92] : memref<9x8x8xbf16, #tpu.memory_space<vmem>>, vector<1x8x8xbf16>
    %107 = vector.shape_cast %106 : vector<1x8x8xbf16> to vector<8x8xbf16>
    %cst_93 = arith.constant dense<0.000000e+00> : vector<256x8xf32>
    %108 = tpu.matmul %105, %107, %cst_93 {dimension_numbers = #tpu.dot_dimension_numbers<[1], [0], [0], [1], [0, 0, 1, 1], [], []>} : vector<256x8xbf16>, vector<8x8xbf16>, vector<256x8xf32> -> vector<256x8xf32>
    %109 = arith.addf %102, %108 : vector<256x8xf32>
    %c2_94 = arith.constant 2 : index
    %c2_95 = arith.constant 2 : index
    %c0_96 = arith.constant 0 : index
    %110 = vector.load %arg7[%c2_94, %c2_95, %c0_96] : memref<18x18x8xf32, #tpu.memory_space<vmem>>, vector<16x16x8xf32>
    %111 = vector.shape_cast %110 : vector<16x16x8xf32> to vector<256x8xf32>
    %112 = arith.truncf %111 : vector<256x8xf32> to vector<256x8xbf16>
    %c8 = arith.constant 8 : index
    %c0_97 = arith.constant 0 : index
    %c0_98 = arith.constant 0 : index
    %113 = vector.load %arg4[%c8, %c0_97, %c0_98] : memref<9x8x8xbf16, #tpu.memory_space<vmem>>, vector<1x8x8xbf16>
    %114 = vector.shape_cast %113 : vector<1x8x8xbf16> to vector<8x8xbf16>
    %cst_99 = arith.constant dense<0.000000e+00> : vector<256x8xf32>
    %115 = tpu.matmul %112, %114, %cst_99 {dimension_numbers = #tpu.dot_dimension_numbers<[1], [0], [0], [1], [0, 0, 1, 1], [], []>} : vector<256x8xbf16>, vector<8x8xbf16>, vector<256x8xf32> -> vector<256x8xf32>
    %116 = arith.addf %109, %115 : vector<256x8xf32>
    %c0_100 = arith.constant 0 : index
    %c0_101 = arith.constant 0 : index
    %117 = vector.load %arg5[%c0_100, %c0_101] : memref<1x8xf32, #tpu.memory_space<vmem>>, vector<1x8xf32>
    %118 = vector.broadcast %117 : vector<1x8xf32> to vector<256x8xf32>
    %119 = arith.addf %116, %118 : vector<256x8xf32>
    %cst_102 = arith.constant 5.000000e-01 : f32
    %120 = vector.broadcast %cst_102 : f32 to vector<256x8xf32>
    %121 = arith.mulf %120, %119 : vector<256x8xf32>
    %cst_103 = arith.constant 4.471500e-02 : f32
    %122 = vector.broadcast %cst_103 : f32 to vector<256x8xf32>
    %123 = arith.mulf %122, %119 : vector<256x8xf32>
    %124 = arith.mulf %123, %119 : vector<256x8xf32>
    %125 = arith.mulf %124, %119 : vector<256x8xf32>
    %126 = arith.addf %119, %125 : vector<256x8xf32>
    %cst_104 = arith.constant 0.797884583 : f32
    %127 = vector.broadcast %cst_104 : f32 to vector<256x8xf32>
    %128 = arith.mulf %127, %126 : vector<256x8xf32>
    %129 = math.tanh %128 : vector<256x8xf32>
    %cst_105 = arith.constant 1.000000e+00 : f32
    %130 = vector.broadcast %cst_105 : f32 to vector<256x8xf32>
    %131 = arith.addf %130, %129 : vector<256x8xf32>
    %132 = arith.mulf %121, %131 : vector<256x8xf32>
    %133 = vector.shape_cast %132 : vector<256x8xf32> to vector<1x16x16x8xf32>
    %c0_106 = arith.constant 0 : index
    %c0_107 = arith.constant 0 : index
    %c0_108 = arith.constant 0 : index
    %c0_109 = arith.constant 0 : index
    %134 = vector.load %arg6[%c0_106, %c0_107, %c0_108, %c0_109] : memref<1x16x16x8xf32, #tpu.memory_space<vmem>>, vector<1x16x16x8xf32>
    tpu.vector_store %arg6[%c0_106, %c0_107, %c0_108, %c0_109], %133 {strides = array<i32>} : memref<1x16x16x8xf32, #tpu.memory_space<vmem>>, vector<1x16x16x8xf32>,
    return
  }
  func.func @transform_0(%arg0: i32) -> (i32, i32, i32, i32) {
    %c0_i32 = arith.constant 0 : i32
    %c0_i32_0 = arith.constant 0 : i32
    %c0_i32_1 = arith.constant 0 : i32
    %c0_i32_2 = arith.constant 0 : i32
    return %arg0, %c0_i32, %c0_i32_0, %c0_i32_1 : i32, i32, i32, i32
  }
  func.func @transform_1(%arg0: i32) -> (i32, i32, i32) {
    %c0_i32 = arith.constant 0 : i32
    %c0_i32_0 = arith.constant 0 : i32
    %c0_i32_1 = arith.constant 0 : i32
    %c0_i32_2 = arith.constant 0 : i32
    return %c0_i32, %c0_i32_0, %c0_i32_1 : i32, i32, i32
  }
  func.func @transform_2(%arg0: i32) -> (i32, i32) {
    %c0_i32 = arith.constant 0 : i32
    %c0_i32_0 = arith.constant 0 : i32
    %c0_i32_1 = arith.constant 0 : i32
    return %c0_i32, %c0_i32_0 : i32, i32
  }
  func.func @transform_3(%arg0: i32) -> (i32, i32, i32) {
    %c0_i32 = arith.constant 0 : i32
    %c0_i32_0 = arith.constant 0 : i32
    %c0_i32_1 = arith.constant 0 : i32
    %c0_i32_2 = arith.constant 0 : i32
    return %c0_i32, %c0_i32_0, %c0_i32_1 : i32, i32, i32
  }
  func.func @transform_4(%arg0: i32) -> (i32, i32) {
    %c0_i32 = arith.constant 0 : i32
    %c0_i32_0 = arith.constant 0 : i32
    %c0_i32_1 = arith.constant 0 : i32
    return %c0_i32, %c0_i32_0 : i32, i32
  }
  func.func @transform_5(%arg0: i32) -> (i32, i32, i32, i32) {
    %c0_i32 = arith.constant 0 : i32
    %c0_i32_0 = arith.constant 0 : i32
    %c0_i32_1 = arith.constant 0 : i32
    %c0_i32_2 = arith.constant 0 : i32
    return %arg0, %c0_i32, %c0_i32_0, %c0_i32_1 : i32, i32, i32, i32
  }
}

module attributes {stable_mosaic.version = 11 : i64} {
  func.func @_conv_pair_kernel(%arg0: i32, %arg1: memref<1x9x9x32xf32, #tpu.memory_space<vmem>>, %arg2: memref<4x32x16xbf16, #tpu.memory_space<vmem>>, %arg3: memref<1x16xf32, #tpu.memory_space<vmem>>, %arg4: memref<9x16x16xbf16, #tpu.memory_space<vmem>>, %arg5: memref<1x16xf32, #tpu.memory_space<vmem>>, %arg6: memref<1x8x8x16xf32, #tpu.memory_space<vmem>>, %arg7: memref<10x10x16xf32, #tpu.memory_space<vmem>>) attributes {dimension_semantics = [#tpu.dimension_semantics<parallel>], iteration_bounds = array<i64: 2>, scalar_prefetch = 0 : i64, scratch_operands = 1 : i64, tpu.core_type = #tpu.core_type<tc>, window_params = [{transform_indices = @transform_0, window_bounds = array<i64: 1, 9, 9, 32>}, {pipeline_mode = #tpu.pipeline_mode<synchronous>, transform_indices = @transform_1, window_bounds = array<i64: 4, 32, 16>}, {pipeline_mode = #tpu.pipeline_mode<synchronous>, transform_indices = @transform_2, window_bounds = array<i64: 1, 16>}, {pipeline_mode = #tpu.pipeline_mode<synchronous>, transform_indices = @transform_3, window_bounds = array<i64: 9, 16, 16>}, {pipeline_mode = #tpu.pipeline_mode<synchronous>, transform_indices = @transform_4, window_bounds = array<i64: 1, 16>}, {transform_indices = @transform_5, window_bounds = array<i64: 1, 8, 8, 16>}]} {
    %cst = arith.constant 0.000000e+00 : f32
    %0 = vector.broadcast %cst : f32 to vector<64x16xf32>
    %c0 = arith.constant 0 : index
    %c0_0 = arith.constant 0 : index
    %c0_1 = arith.constant 0 : index
    %c0_2 = arith.constant 0 : index
    %1 = vector.load %arg1[%c0, %c0_0, %c0_1, %c0_2] : memref<1x9x9x32xf32, #tpu.memory_space<vmem>>, vector<1x8x8x32xf32>
    %2 = vector.shape_cast %1 : vector<1x8x8x32xf32> to vector<8x8x32xf32>
    %3 = vector.shape_cast %2 : vector<8x8x32xf32> to vector<64x32xf32>
    %4 = arith.truncf %3 : vector<64x32xf32> to vector<64x32xbf16>
    %c0_3 = arith.constant 0 : index
    %c0_4 = arith.constant 0 : index
    %c0_5 = arith.constant 0 : index
    %5 = vector.load %arg2[%c0_3, %c0_4, %c0_5] : memref<4x32x16xbf16, #tpu.memory_space<vmem>>, vector<1x32x16xbf16>
    %6 = vector.shape_cast %5 : vector<1x32x16xbf16> to vector<32x16xbf16>
    %cst_6 = arith.constant dense<0.000000e+00> : vector<64x16xf32>
    %7 = tpu.matmul %4, %6, %cst_6 {dimension_numbers = #tpu.dot_dimension_numbers<[1], [0], [0], [1], [0, 0, 1, 1], [], []>} : vector<64x32xbf16>, vector<32x16xbf16>, vector<64x16xf32> -> vector<64x16xf32>
    %8 = arith.addf %0, %7 : vector<64x16xf32>
    %c0_7 = arith.constant 0 : index
    %c0_8 = arith.constant 0 : index
    %c1 = arith.constant 1 : index
    %c0_9 = arith.constant 0 : index
    %9 = vector.load %arg1[%c0_7, %c0_8, %c1, %c0_9] : memref<1x9x9x32xf32, #tpu.memory_space<vmem>>, vector<1x8x8x32xf32>
    %10 = vector.shape_cast %9 : vector<1x8x8x32xf32> to vector<8x8x32xf32>
    %11 = vector.shape_cast %10 : vector<8x8x32xf32> to vector<64x32xf32>
    %12 = arith.truncf %11 : vector<64x32xf32> to vector<64x32xbf16>
    %c1_10 = arith.constant 1 : index
    %c0_11 = arith.constant 0 : index
    %c0_12 = arith.constant 0 : index
    %13 = vector.load %arg2[%c1_10, %c0_11, %c0_12] : memref<4x32x16xbf16, #tpu.memory_space<vmem>>, vector<1x32x16xbf16>
    %14 = vector.shape_cast %13 : vector<1x32x16xbf16> to vector<32x16xbf16>
    %cst_13 = arith.constant dense<0.000000e+00> : vector<64x16xf32>
    %15 = tpu.matmul %12, %14, %cst_13 {dimension_numbers = #tpu.dot_dimension_numbers<[1], [0], [0], [1], [0, 0, 1, 1], [], []>} : vector<64x32xbf16>, vector<32x16xbf16>, vector<64x16xf32> -> vector<64x16xf32>
    %16 = arith.addf %8, %15 : vector<64x16xf32>
    %c0_14 = arith.constant 0 : index
    %c1_15 = arith.constant 1 : index
    %c0_16 = arith.constant 0 : index
    %c0_17 = arith.constant 0 : index
    %17 = vector.load %arg1[%c0_14, %c1_15, %c0_16, %c0_17] : memref<1x9x9x32xf32, #tpu.memory_space<vmem>>, vector<1x8x8x32xf32>
    %18 = vector.shape_cast %17 : vector<1x8x8x32xf32> to vector<8x8x32xf32>
    %19 = vector.shape_cast %18 : vector<8x8x32xf32> to vector<64x32xf32>
    %20 = arith.truncf %19 : vector<64x32xf32> to vector<64x32xbf16>
    %c2 = arith.constant 2 : index
    %c0_18 = arith.constant 0 : index
    %c0_19 = arith.constant 0 : index
    %21 = vector.load %arg2[%c2, %c0_18, %c0_19] : memref<4x32x16xbf16, #tpu.memory_space<vmem>>, vector<1x32x16xbf16>
    %22 = vector.shape_cast %21 : vector<1x32x16xbf16> to vector<32x16xbf16>
    %cst_20 = arith.constant dense<0.000000e+00> : vector<64x16xf32>
    %23 = tpu.matmul %20, %22, %cst_20 {dimension_numbers = #tpu.dot_dimension_numbers<[1], [0], [0], [1], [0, 0, 1, 1], [], []>} : vector<64x32xbf16>, vector<32x16xbf16>, vector<64x16xf32> -> vector<64x16xf32>
    %24 = arith.addf %16, %23 : vector<64x16xf32>
    %c0_21 = arith.constant 0 : index
    %c1_22 = arith.constant 1 : index
    %c1_23 = arith.constant 1 : index
    %c0_24 = arith.constant 0 : index
    %25 = vector.load %arg1[%c0_21, %c1_22, %c1_23, %c0_24] : memref<1x9x9x32xf32, #tpu.memory_space<vmem>>, vector<1x8x8x32xf32>
    %26 = vector.shape_cast %25 : vector<1x8x8x32xf32> to vector<8x8x32xf32>
    %27 = vector.shape_cast %26 : vector<8x8x32xf32> to vector<64x32xf32>
    %28 = arith.truncf %27 : vector<64x32xf32> to vector<64x32xbf16>
    %c3 = arith.constant 3 : index
    %c0_25 = arith.constant 0 : index
    %c0_26 = arith.constant 0 : index
    %29 = vector.load %arg2[%c3, %c0_25, %c0_26] : memref<4x32x16xbf16, #tpu.memory_space<vmem>>, vector<1x32x16xbf16>
    %30 = vector.shape_cast %29 : vector<1x32x16xbf16> to vector<32x16xbf16>
    %cst_27 = arith.constant dense<0.000000e+00> : vector<64x16xf32>
    %31 = tpu.matmul %28, %30, %cst_27 {dimension_numbers = #tpu.dot_dimension_numbers<[1], [0], [0], [1], [0, 0, 1, 1], [], []>} : vector<64x32xbf16>, vector<32x16xbf16>, vector<64x16xf32> -> vector<64x16xf32>
    %32 = arith.addf %24, %31 : vector<64x16xf32>
    %c0_28 = arith.constant 0 : index
    %c0_29 = arith.constant 0 : index
    %33 = vector.load %arg3[%c0_28, %c0_29] : memref<1x16xf32, #tpu.memory_space<vmem>>, vector<1x16xf32>
    %34 = vector.broadcast %33 : vector<1x16xf32> to vector<64x16xf32>
    %35 = arith.addf %32, %34 : vector<64x16xf32>
    %cst_30 = arith.constant 5.000000e-01 : f32
    %36 = vector.broadcast %cst_30 : f32 to vector<64x16xf32>
    %37 = arith.mulf %36, %35 : vector<64x16xf32>
    %cst_31 = arith.constant 4.471500e-02 : f32
    %38 = vector.broadcast %cst_31 : f32 to vector<64x16xf32>
    %39 = arith.mulf %38, %35 : vector<64x16xf32>
    %40 = arith.mulf %39, %35 : vector<64x16xf32>
    %41 = arith.mulf %40, %35 : vector<64x16xf32>
    %42 = arith.addf %35, %41 : vector<64x16xf32>
    %cst_32 = arith.constant 0.797884583 : f32
    %43 = vector.broadcast %cst_32 : f32 to vector<64x16xf32>
    %44 = arith.mulf %43, %42 : vector<64x16xf32>
    %45 = math.tanh %44 : vector<64x16xf32>
    %cst_33 = arith.constant 1.000000e+00 : f32
    %46 = vector.broadcast %cst_33 : f32 to vector<64x16xf32>
    %47 = arith.addf %46, %45 : vector<64x16xf32>
    %48 = arith.mulf %37, %47 : vector<64x16xf32>
    %cst_34 = arith.constant 0.000000e+00 : f32
    %49 = vector.broadcast %cst_34 : f32 to vector<10x10x16xf32>
    %c0_35 = arith.constant 0 : index
    %c0_36 = arith.constant 0 : index
    %c0_37 = arith.constant 0 : index
    %50 = vector.load %arg7[%c0_35, %c0_36, %c0_37] : memref<10x10x16xf32, #tpu.memory_space<vmem>>, vector<10x10x16xf32>
    tpu.vector_store %arg7[%c0_35, %c0_36, %c0_37], %49 {strides = array<i32>} : memref<10x10x16xf32, #tpu.memory_space<vmem>>, vector<10x10x16xf32>,
    %51 = vector.shape_cast %48 : vector<64x16xf32> to vector<8x8x16xf32>
    %c1_38 = arith.constant 1 : index
    %c1_39 = arith.constant 1 : index
    %c0_40 = arith.constant 0 : index
    %52 = vector.load %arg7[%c1_38, %c1_39, %c0_40] : memref<10x10x16xf32, #tpu.memory_space<vmem>>, vector<8x8x16xf32>
    tpu.vector_store %arg7[%c1_38, %c1_39, %c0_40], %51 {strides = array<i32>} : memref<10x10x16xf32, #tpu.memory_space<vmem>>, vector<8x8x16xf32>,
    %cst_41 = arith.constant 0.000000e+00 : f32
    %53 = vector.broadcast %cst_41 : f32 to vector<64x16xf32>
    %c0_42 = arith.constant 0 : index
    %c0_43 = arith.constant 0 : index
    %c0_44 = arith.constant 0 : index
    %54 = vector.load %arg7[%c0_42, %c0_43, %c0_44] : memref<10x10x16xf32, #tpu.memory_space<vmem>>, vector<8x8x16xf32>
    %55 = vector.shape_cast %54 : vector<8x8x16xf32> to vector<64x16xf32>
    %56 = arith.truncf %55 : vector<64x16xf32> to vector<64x16xbf16>
    %c0_45 = arith.constant 0 : index
    %c0_46 = arith.constant 0 : index
    %c0_47 = arith.constant 0 : index
    %57 = vector.load %arg4[%c0_45, %c0_46, %c0_47] : memref<9x16x16xbf16, #tpu.memory_space<vmem>>, vector<1x16x16xbf16>
    %58 = vector.shape_cast %57 : vector<1x16x16xbf16> to vector<16x16xbf16>
    %cst_48 = arith.constant dense<0.000000e+00> : vector<64x16xf32>
    %59 = tpu.matmul %56, %58, %cst_48 {dimension_numbers = #tpu.dot_dimension_numbers<[1], [0], [0], [1], [0, 0, 1, 1], [], []>} : vector<64x16xbf16>, vector<16x16xbf16>, vector<64x16xf32> -> vector<64x16xf32>
    %60 = arith.addf %53, %59 : vector<64x16xf32>
    %c0_49 = arith.constant 0 : index
    %c1_50 = arith.constant 1 : index
    %c0_51 = arith.constant 0 : index
    %61 = vector.load %arg7[%c0_49, %c1_50, %c0_51] : memref<10x10x16xf32, #tpu.memory_space<vmem>>, vector<8x8x16xf32>
    %62 = vector.shape_cast %61 : vector<8x8x16xf32> to vector<64x16xf32>
    %63 = arith.truncf %62 : vector<64x16xf32> to vector<64x16xbf16>
    %c1_52 = arith.constant 1 : index
    %c0_53 = arith.constant 0 : index
    %c0_54 = arith.constant 0 : index
    %64 = vector.load %arg4[%c1_52, %c0_53, %c0_54] : memref<9x16x16xbf16, #tpu.memory_space<vmem>>, vector<1x16x16xbf16>
    %65 = vector.shape_cast %64 : vector<1x16x16xbf16> to vector<16x16xbf16>
    %cst_55 = arith.constant dense<0.000000e+00> : vector<64x16xf32>
    %66 = tpu.matmul %63, %65, %cst_55 {dimension_numbers = #tpu.dot_dimension_numbers<[1], [0], [0], [1], [0, 0, 1, 1], [], []>} : vector<64x16xbf16>, vector<16x16xbf16>, vector<64x16xf32> -> vector<64x16xf32>
    %67 = arith.addf %60, %66 : vector<64x16xf32>
    %c0_56 = arith.constant 0 : index
    %c2_57 = arith.constant 2 : index
    %c0_58 = arith.constant 0 : index
    %68 = vector.load %arg7[%c0_56, %c2_57, %c0_58] : memref<10x10x16xf32, #tpu.memory_space<vmem>>, vector<8x8x16xf32>
    %69 = vector.shape_cast %68 : vector<8x8x16xf32> to vector<64x16xf32>
    %70 = arith.truncf %69 : vector<64x16xf32> to vector<64x16xbf16>
    %c2_59 = arith.constant 2 : index
    %c0_60 = arith.constant 0 : index
    %c0_61 = arith.constant 0 : index
    %71 = vector.load %arg4[%c2_59, %c0_60, %c0_61] : memref<9x16x16xbf16, #tpu.memory_space<vmem>>, vector<1x16x16xbf16>
    %72 = vector.shape_cast %71 : vector<1x16x16xbf16> to vector<16x16xbf16>
    %cst_62 = arith.constant dense<0.000000e+00> : vector<64x16xf32>
    %73 = tpu.matmul %70, %72, %cst_62 {dimension_numbers = #tpu.dot_dimension_numbers<[1], [0], [0], [1], [0, 0, 1, 1], [], []>} : vector<64x16xbf16>, vector<16x16xbf16>, vector<64x16xf32> -> vector<64x16xf32>
    %74 = arith.addf %67, %73 : vector<64x16xf32>
    %c1_63 = arith.constant 1 : index
    %c0_64 = arith.constant 0 : index
    %c0_65 = arith.constant 0 : index
    %75 = vector.load %arg7[%c1_63, %c0_64, %c0_65] : memref<10x10x16xf32, #tpu.memory_space<vmem>>, vector<8x8x16xf32>
    %76 = vector.shape_cast %75 : vector<8x8x16xf32> to vector<64x16xf32>
    %77 = arith.truncf %76 : vector<64x16xf32> to vector<64x16xbf16>
    %c3_66 = arith.constant 3 : index
    %c0_67 = arith.constant 0 : index
    %c0_68 = arith.constant 0 : index
    %78 = vector.load %arg4[%c3_66, %c0_67, %c0_68] : memref<9x16x16xbf16, #tpu.memory_space<vmem>>, vector<1x16x16xbf16>
    %79 = vector.shape_cast %78 : vector<1x16x16xbf16> to vector<16x16xbf16>
    %cst_69 = arith.constant dense<0.000000e+00> : vector<64x16xf32>
    %80 = tpu.matmul %77, %79, %cst_69 {dimension_numbers = #tpu.dot_dimension_numbers<[1], [0], [0], [1], [0, 0, 1, 1], [], []>} : vector<64x16xbf16>, vector<16x16xbf16>, vector<64x16xf32> -> vector<64x16xf32>
    %81 = arith.addf %74, %80 : vector<64x16xf32>
    %c1_70 = arith.constant 1 : index
    %c1_71 = arith.constant 1 : index
    %c0_72 = arith.constant 0 : index
    %82 = vector.load %arg7[%c1_70, %c1_71, %c0_72] : memref<10x10x16xf32, #tpu.memory_space<vmem>>, vector<8x8x16xf32>
    %83 = vector.shape_cast %82 : vector<8x8x16xf32> to vector<64x16xf32>
    %84 = arith.truncf %83 : vector<64x16xf32> to vector<64x16xbf16>
    %c4 = arith.constant 4 : index
    %c0_73 = arith.constant 0 : index
    %c0_74 = arith.constant 0 : index
    %85 = vector.load %arg4[%c4, %c0_73, %c0_74] : memref<9x16x16xbf16, #tpu.memory_space<vmem>>, vector<1x16x16xbf16>
    %86 = vector.shape_cast %85 : vector<1x16x16xbf16> to vector<16x16xbf16>
    %cst_75 = arith.constant dense<0.000000e+00> : vector<64x16xf32>
    %87 = tpu.matmul %84, %86, %cst_75 {dimension_numbers = #tpu.dot_dimension_numbers<[1], [0], [0], [1], [0, 0, 1, 1], [], []>} : vector<64x16xbf16>, vector<16x16xbf16>, vector<64x16xf32> -> vector<64x16xf32>
    %88 = arith.addf %81, %87 : vector<64x16xf32>
    %c1_76 = arith.constant 1 : index
    %c2_77 = arith.constant 2 : index
    %c0_78 = arith.constant 0 : index
    %89 = vector.load %arg7[%c1_76, %c2_77, %c0_78] : memref<10x10x16xf32, #tpu.memory_space<vmem>>, vector<8x8x16xf32>
    %90 = vector.shape_cast %89 : vector<8x8x16xf32> to vector<64x16xf32>
    %91 = arith.truncf %90 : vector<64x16xf32> to vector<64x16xbf16>
    %c5 = arith.constant 5 : index
    %c0_79 = arith.constant 0 : index
    %c0_80 = arith.constant 0 : index
    %92 = vector.load %arg4[%c5, %c0_79, %c0_80] : memref<9x16x16xbf16, #tpu.memory_space<vmem>>, vector<1x16x16xbf16>
    %93 = vector.shape_cast %92 : vector<1x16x16xbf16> to vector<16x16xbf16>
    %cst_81 = arith.constant dense<0.000000e+00> : vector<64x16xf32>
    %94 = tpu.matmul %91, %93, %cst_81 {dimension_numbers = #tpu.dot_dimension_numbers<[1], [0], [0], [1], [0, 0, 1, 1], [], []>} : vector<64x16xbf16>, vector<16x16xbf16>, vector<64x16xf32> -> vector<64x16xf32>
    %95 = arith.addf %88, %94 : vector<64x16xf32>
    %c2_82 = arith.constant 2 : index
    %c0_83 = arith.constant 0 : index
    %c0_84 = arith.constant 0 : index
    %96 = vector.load %arg7[%c2_82, %c0_83, %c0_84] : memref<10x10x16xf32, #tpu.memory_space<vmem>>, vector<8x8x16xf32>
    %97 = vector.shape_cast %96 : vector<8x8x16xf32> to vector<64x16xf32>
    %98 = arith.truncf %97 : vector<64x16xf32> to vector<64x16xbf16>
    %c6 = arith.constant 6 : index
    %c0_85 = arith.constant 0 : index
    %c0_86 = arith.constant 0 : index
    %99 = vector.load %arg4[%c6, %c0_85, %c0_86] : memref<9x16x16xbf16, #tpu.memory_space<vmem>>, vector<1x16x16xbf16>
    %100 = vector.shape_cast %99 : vector<1x16x16xbf16> to vector<16x16xbf16>
    %cst_87 = arith.constant dense<0.000000e+00> : vector<64x16xf32>
    %101 = tpu.matmul %98, %100, %cst_87 {dimension_numbers = #tpu.dot_dimension_numbers<[1], [0], [0], [1], [0, 0, 1, 1], [], []>} : vector<64x16xbf16>, vector<16x16xbf16>, vector<64x16xf32> -> vector<64x16xf32>
    %102 = arith.addf %95, %101 : vector<64x16xf32>
    %c2_88 = arith.constant 2 : index
    %c1_89 = arith.constant 1 : index
    %c0_90 = arith.constant 0 : index
    %103 = vector.load %arg7[%c2_88, %c1_89, %c0_90] : memref<10x10x16xf32, #tpu.memory_space<vmem>>, vector<8x8x16xf32>
    %104 = vector.shape_cast %103 : vector<8x8x16xf32> to vector<64x16xf32>
    %105 = arith.truncf %104 : vector<64x16xf32> to vector<64x16xbf16>
    %c7 = arith.constant 7 : index
    %c0_91 = arith.constant 0 : index
    %c0_92 = arith.constant 0 : index
    %106 = vector.load %arg4[%c7, %c0_91, %c0_92] : memref<9x16x16xbf16, #tpu.memory_space<vmem>>, vector<1x16x16xbf16>
    %107 = vector.shape_cast %106 : vector<1x16x16xbf16> to vector<16x16xbf16>
    %cst_93 = arith.constant dense<0.000000e+00> : vector<64x16xf32>
    %108 = tpu.matmul %105, %107, %cst_93 {dimension_numbers = #tpu.dot_dimension_numbers<[1], [0], [0], [1], [0, 0, 1, 1], [], []>} : vector<64x16xbf16>, vector<16x16xbf16>, vector<64x16xf32> -> vector<64x16xf32>
    %109 = arith.addf %102, %108 : vector<64x16xf32>
    %c2_94 = arith.constant 2 : index
    %c2_95 = arith.constant 2 : index
    %c0_96 = arith.constant 0 : index
    %110 = vector.load %arg7[%c2_94, %c2_95, %c0_96] : memref<10x10x16xf32, #tpu.memory_space<vmem>>, vector<8x8x16xf32>
    %111 = vector.shape_cast %110 : vector<8x8x16xf32> to vector<64x16xf32>
    %112 = arith.truncf %111 : vector<64x16xf32> to vector<64x16xbf16>
    %c8 = arith.constant 8 : index
    %c0_97 = arith.constant 0 : index
    %c0_98 = arith.constant 0 : index
    %113 = vector.load %arg4[%c8, %c0_97, %c0_98] : memref<9x16x16xbf16, #tpu.memory_space<vmem>>, vector<1x16x16xbf16>
    %114 = vector.shape_cast %113 : vector<1x16x16xbf16> to vector<16x16xbf16>
    %cst_99 = arith.constant dense<0.000000e+00> : vector<64x16xf32>
    %115 = tpu.matmul %112, %114, %cst_99 {dimension_numbers = #tpu.dot_dimension_numbers<[1], [0], [0], [1], [0, 0, 1, 1], [], []>} : vector<64x16xbf16>, vector<16x16xbf16>, vector<64x16xf32> -> vector<64x16xf32>
    %116 = arith.addf %109, %115 : vector<64x16xf32>
    %c0_100 = arith.constant 0 : index
    %c0_101 = arith.constant 0 : index
    %117 = vector.load %arg5[%c0_100, %c0_101] : memref<1x16xf32, #tpu.memory_space<vmem>>, vector<1x16xf32>
    %118 = vector.broadcast %117 : vector<1x16xf32> to vector<64x16xf32>
    %119 = arith.addf %116, %118 : vector<64x16xf32>
    %cst_102 = arith.constant 5.000000e-01 : f32
    %120 = vector.broadcast %cst_102 : f32 to vector<64x16xf32>
    %121 = arith.mulf %120, %119 : vector<64x16xf32>
    %cst_103 = arith.constant 4.471500e-02 : f32
    %122 = vector.broadcast %cst_103 : f32 to vector<64x16xf32>
    %123 = arith.mulf %122, %119 : vector<64x16xf32>
    %124 = arith.mulf %123, %119 : vector<64x16xf32>
    %125 = arith.mulf %124, %119 : vector<64x16xf32>
    %126 = arith.addf %119, %125 : vector<64x16xf32>
    %cst_104 = arith.constant 0.797884583 : f32
    %127 = vector.broadcast %cst_104 : f32 to vector<64x16xf32>
    %128 = arith.mulf %127, %126 : vector<64x16xf32>
    %129 = math.tanh %128 : vector<64x16xf32>
    %cst_105 = arith.constant 1.000000e+00 : f32
    %130 = vector.broadcast %cst_105 : f32 to vector<64x16xf32>
    %131 = arith.addf %130, %129 : vector<64x16xf32>
    %132 = arith.mulf %121, %131 : vector<64x16xf32>
    %133 = vector.shape_cast %132 : vector<64x16xf32> to vector<1x8x8x16xf32>
    %c0_106 = arith.constant 0 : index
    %c0_107 = arith.constant 0 : index
    %c0_108 = arith.constant 0 : index
    %c0_109 = arith.constant 0 : index
    %134 = vector.load %arg6[%c0_106, %c0_107, %c0_108, %c0_109] : memref<1x8x8x16xf32, #tpu.memory_space<vmem>>, vector<1x8x8x16xf32>
    tpu.vector_store %arg6[%c0_106, %c0_107, %c0_108, %c0_109], %133 {strides = array<i32>} : memref<1x8x8x16xf32, #tpu.memory_space<vmem>>, vector<1x8x8x16xf32>,
    return
  }
  func.func @transform_0(%arg0: i32) -> (i32, i32, i32, i32) {
    %c0_i32 = arith.constant 0 : i32
    %c0_i32_0 = arith.constant 0 : i32
    %c0_i32_1 = arith.constant 0 : i32
    %c0_i32_2 = arith.constant 0 : i32
    return %arg0, %c0_i32, %c0_i32_0, %c0_i32_1 : i32, i32, i32, i32
  }
  func.func @transform_1(%arg0: i32) -> (i32, i32, i32) {
    %c0_i32 = arith.constant 0 : i32
    %c0_i32_0 = arith.constant 0 : i32
    %c0_i32_1 = arith.constant 0 : i32
    %c0_i32_2 = arith.constant 0 : i32
    return %c0_i32, %c0_i32_0, %c0_i32_1 : i32, i32, i32
  }
  func.func @transform_2(%arg0: i32) -> (i32, i32) {
    %c0_i32 = arith.constant 0 : i32
    %c0_i32_0 = arith.constant 0 : i32
    %c0_i32_1 = arith.constant 0 : i32
    return %c0_i32, %c0_i32_0 : i32, i32
  }
  func.func @transform_3(%arg0: i32) -> (i32, i32, i32) {
    %c0_i32 = arith.constant 0 : i32
    %c0_i32_0 = arith.constant 0 : i32
    %c0_i32_1 = arith.constant 0 : i32
    %c0_i32_2 = arith.constant 0 : i32
    return %c0_i32, %c0_i32_0, %c0_i32_1 : i32, i32, i32
  }
  func.func @transform_4(%arg0: i32) -> (i32, i32) {
    %c0_i32 = arith.constant 0 : i32
    %c0_i32_0 = arith.constant 0 : i32
    %c0_i32_1 = arith.constant 0 : i32
    return %c0_i32, %c0_i32_0 : i32, i32
  }
  func.func @transform_5(%arg0: i32) -> (i32, i32, i32, i32) {
    %c0_i32 = arith.constant 0 : i32
    %c0_i32_0 = arith.constant 0 : i32
    %c0_i32_1 = arith.constant 0 : i32
    %c0_i32_2 = arith.constant 0 : i32
    return %arg0, %c0_i32, %c0_i32_0, %c0_i32_1 : i32, i32, i32, i32
  }
}

module attributes {stable_mosaic.version = 11 : i64} {
  func.func @_final_block_kernel(%arg0: i32, %arg1: memref<1x5x5x64xf32, #tpu.memory_space<vmem>>, %arg2: memref<4x64x16xbf16, #tpu.memory_space<vmem>>, %arg3: memref<1x16xf32, #tpu.memory_space<vmem>>, %arg4: memref<256x64xbf16, #tpu.memory_space<vmem>>, %arg5: memref<1x64xf32, #tpu.memory_space<vmem>>, %arg6: memref<1x1x64xf32, #tpu.memory_space<vmem>>) attributes {dimension_semantics = [#tpu.dimension_semantics<parallel>], iteration_bounds = array<i64: 2>, scalar_prefetch = 0 : i64, scratch_operands = 0 : i64, tpu.core_type = #tpu.core_type<tc>, window_params = [{transform_indices = @transform_0, window_bounds = array<i64: 1, 5, 5, 64>}, {pipeline_mode = #tpu.pipeline_mode<synchronous>, transform_indices = @transform_1, window_bounds = array<i64: 4, 64, 16>}, {pipeline_mode = #tpu.pipeline_mode<synchronous>, transform_indices = @transform_2, window_bounds = array<i64: 1, 16>}, {pipeline_mode = #tpu.pipeline_mode<synchronous>, transform_indices = @transform_3, window_bounds = array<i64: 256, 64>}, {pipeline_mode = #tpu.pipeline_mode<synchronous>, transform_indices = @transform_4, window_bounds = array<i64: 1, 64>}, {transform_indices = @transform_5, window_bounds = array<i64: 1, 1, 64>}]} {
    %cst = arith.constant 0.000000e+00 : f32
    %0 = vector.broadcast %cst : f32 to vector<1x64xf32>
    %cst_0 = arith.constant 0.000000e+00 : f32
    %1 = vector.broadcast %cst_0 : f32 to vector<4x16xf32>
    %c0 = arith.constant 0 : index
    %c0_1 = arith.constant 0 : index
    %c0_2 = arith.constant 0 : index
    %c0_3 = arith.constant 0 : index
    %2 = vector.load %arg1[%c0, %c0_1, %c0_2, %c0_3] : memref<1x5x5x64xf32, #tpu.memory_space<vmem>>, vector<1x1x4x64xf32>
    %3 = vector.shape_cast %2 : vector<1x1x4x64xf32> to vector<4x64xf32>
    %4 = arith.truncf %3 : vector<4x64xf32> to vector<4x64xbf16>
    %c0_4 = arith.constant 0 : index
    %c0_5 = arith.constant 0 : index
    %c0_6 = arith.constant 0 : index
    %5 = vector.load %arg2[%c0_4, %c0_5, %c0_6] : memref<4x64x16xbf16, #tpu.memory_space<vmem>>, vector<1x64x16xbf16>
    %6 = vector.shape_cast %5 : vector<1x64x16xbf16> to vector<64x16xbf16>
    %cst_7 = arith.constant dense<0.000000e+00> : vector<4x16xf32>
    %7 = tpu.matmul %4, %6, %cst_7 {dimension_numbers = #tpu.dot_dimension_numbers<[1], [0], [0], [1], [0, 0, 1, 1], [], []>} : vector<4x64xbf16>, vector<64x16xbf16>, vector<4x16xf32> -> vector<4x16xf32>
    %8 = arith.addf %1, %7 : vector<4x16xf32>
    %c0_8 = arith.constant 0 : index
    %c0_9 = arith.constant 0 : index
    %c1 = arith.constant 1 : index
    %c0_10 = arith.constant 0 : index
    %9 = vector.load %arg1[%c0_8, %c0_9, %c1, %c0_10] : memref<1x5x5x64xf32, #tpu.memory_space<vmem>>, vector<1x1x4x64xf32>
    %10 = vector.shape_cast %9 : vector<1x1x4x64xf32> to vector<4x64xf32>
    %11 = arith.truncf %10 : vector<4x64xf32> to vector<4x64xbf16>
    %c1_11 = arith.constant 1 : index
    %c0_12 = arith.constant 0 : index
    %c0_13 = arith.constant 0 : index
    %12 = vector.load %arg2[%c1_11, %c0_12, %c0_13] : memref<4x64x16xbf16, #tpu.memory_space<vmem>>, vector<1x64x16xbf16>
    %13 = vector.shape_cast %12 : vector<1x64x16xbf16> to vector<64x16xbf16>
    %cst_14 = arith.constant dense<0.000000e+00> : vector<4x16xf32>
    %14 = tpu.matmul %11, %13, %cst_14 {dimension_numbers = #tpu.dot_dimension_numbers<[1], [0], [0], [1], [0, 0, 1, 1], [], []>} : vector<4x64xbf16>, vector<64x16xbf16>, vector<4x16xf32> -> vector<4x16xf32>
    %15 = arith.addf %8, %14 : vector<4x16xf32>
    %c0_15 = arith.constant 0 : index
    %c1_16 = arith.constant 1 : index
    %c0_17 = arith.constant 0 : index
    %c0_18 = arith.constant 0 : index
    %16 = vector.load %arg1[%c0_15, %c1_16, %c0_17, %c0_18] : memref<1x5x5x64xf32, #tpu.memory_space<vmem>>, vector<1x1x4x64xf32>
    %17 = vector.shape_cast %16 : vector<1x1x4x64xf32> to vector<4x64xf32>
    %18 = arith.truncf %17 : vector<4x64xf32> to vector<4x64xbf16>
    %c2 = arith.constant 2 : index
    %c0_19 = arith.constant 0 : index
    %c0_20 = arith.constant 0 : index
    %19 = vector.load %arg2[%c2, %c0_19, %c0_20] : memref<4x64x16xbf16, #tpu.memory_space<vmem>>, vector<1x64x16xbf16>
    %20 = vector.shape_cast %19 : vector<1x64x16xbf16> to vector<64x16xbf16>
    %cst_21 = arith.constant dense<0.000000e+00> : vector<4x16xf32>
    %21 = tpu.matmul %18, %20, %cst_21 {dimension_numbers = #tpu.dot_dimension_numbers<[1], [0], [0], [1], [0, 0, 1, 1], [], []>} : vector<4x64xbf16>, vector<64x16xbf16>, vector<4x16xf32> -> vector<4x16xf32>
    %22 = arith.addf %15, %21 : vector<4x16xf32>
    %c0_22 = arith.constant 0 : index
    %c1_23 = arith.constant 1 : index
    %c1_24 = arith.constant 1 : index
    %c0_25 = arith.constant 0 : index
    %23 = vector.load %arg1[%c0_22, %c1_23, %c1_24, %c0_25] : memref<1x5x5x64xf32, #tpu.memory_space<vmem>>, vector<1x1x4x64xf32>
    %24 = vector.shape_cast %23 : vector<1x1x4x64xf32> to vector<4x64xf32>
    %25 = arith.truncf %24 : vector<4x64xf32> to vector<4x64xbf16>
    %c3 = arith.constant 3 : index
    %c0_26 = arith.constant 0 : index
    %c0_27 = arith.constant 0 : index
    %26 = vector.load %arg2[%c3, %c0_26, %c0_27] : memref<4x64x16xbf16, #tpu.memory_space<vmem>>, vector<1x64x16xbf16>
    %27 = vector.shape_cast %26 : vector<1x64x16xbf16> to vector<64x16xbf16>
    %cst_28 = arith.constant dense<0.000000e+00> : vector<4x16xf32>
    %28 = tpu.matmul %25, %27, %cst_28 {dimension_numbers = #tpu.dot_dimension_numbers<[1], [0], [0], [1], [0, 0, 1, 1], [], []>} : vector<4x64xbf16>, vector<64x16xbf16>, vector<4x16xf32> -> vector<4x16xf32>
    %29 = arith.addf %22, %28 : vector<4x16xf32>
    %c0_29 = arith.constant 0 : index
    %c0_30 = arith.constant 0 : index
    %30 = vector.load %arg3[%c0_29, %c0_30] : memref<1x16xf32, #tpu.memory_space<vmem>>, vector<1x16xf32>
    %31 = vector.broadcast %30 : vector<1x16xf32> to vector<4x16xf32>
    %32 = arith.addf %29, %31 : vector<4x16xf32>
    %cst_31 = arith.constant 5.000000e-01 : f32
    %33 = vector.broadcast %cst_31 : f32 to vector<4x16xf32>
    %34 = arith.mulf %33, %32 : vector<4x16xf32>
    %cst_32 = arith.constant 4.471500e-02 : f32
    %35 = vector.broadcast %cst_32 : f32 to vector<4x16xf32>
    %36 = arith.mulf %35, %32 : vector<4x16xf32>
    %37 = arith.mulf %36, %32 : vector<4x16xf32>
    %38 = arith.mulf %37, %32 : vector<4x16xf32>
    %39 = arith.addf %32, %38 : vector<4x16xf32>
    %cst_33 = arith.constant 0.797884583 : f32
    %40 = vector.broadcast %cst_33 : f32 to vector<4x16xf32>
    %41 = arith.mulf %40, %39 : vector<4x16xf32>
    %42 = math.tanh %41 : vector<4x16xf32>
    %cst_34 = arith.constant 1.000000e+00 : f32
    %43 = vector.broadcast %cst_34 : f32 to vector<4x16xf32>
    %44 = arith.addf %43, %42 : vector<4x16xf32>
    %45 = arith.mulf %34, %44 : vector<4x16xf32>
    %46 = vector.extract_strided_slice %45 {offsets = [0, 0], sizes = [1, 16], strides = [1, 1]} : vector<4x16xf32> to vector<1x16xf32>
    %47 = arith.truncf %46 : vector<1x16xf32> to vector<1x16xbf16>
    %c0_35 = arith.constant 0 : index
    %c0_36 = arith.constant 0 : index
    %48 = vector.load %arg4[%c0_35, %c0_36] : memref<256x64xbf16, #tpu.memory_space<vmem>>, vector<16x64xbf16>
    %cst_37 = arith.constant dense<0.000000e+00> : vector<1x64xf32>
    %49 = tpu.matmul %47, %48, %cst_37 {dimension_numbers = #tpu.dot_dimension_numbers<[1], [0], [0], [1], [0, 0, 1, 1], [], []>} : vector<1x16xbf16>, vector<16x64xbf16>, vector<1x64xf32> -> vector<1x64xf32>
    %50 = arith.addf %0, %49 : vector<1x64xf32>
    %51 = vector.extract_strided_slice %45 {offsets = [1, 0], sizes = [1, 16], strides = [1, 1]} : vector<4x16xf32> to vector<1x16xf32>
    %52 = arith.truncf %51 : vector<1x16xf32> to vector<1x16xbf16>
    %c16 = arith.constant 16 : index
    %c0_38 = arith.constant 0 : index
    %53 = vector.load %arg4[%c16, %c0_38] : memref<256x64xbf16, #tpu.memory_space<vmem>>, vector<16x64xbf16>
    %cst_39 = arith.constant dense<0.000000e+00> : vector<1x64xf32>
    %54 = tpu.matmul %52, %53, %cst_39 {dimension_numbers = #tpu.dot_dimension_numbers<[1], [0], [0], [1], [0, 0, 1, 1], [], []>} : vector<1x16xbf16>, vector<16x64xbf16>, vector<1x64xf32> -> vector<1x64xf32>
    %55 = arith.addf %50, %54 : vector<1x64xf32>
    %56 = vector.extract_strided_slice %45 {offsets = [2, 0], sizes = [1, 16], strides = [1, 1]} : vector<4x16xf32> to vector<1x16xf32>
    %57 = arith.truncf %56 : vector<1x16xf32> to vector<1x16xbf16>
    %c32 = arith.constant 32 : index
    %c0_40 = arith.constant 0 : index
    %58 = vector.load %arg4[%c32, %c0_40] : memref<256x64xbf16, #tpu.memory_space<vmem>>, vector<16x64xbf16>
    %cst_41 = arith.constant dense<0.000000e+00> : vector<1x64xf32>
    %59 = tpu.matmul %57, %58, %cst_41 {dimension_numbers = #tpu.dot_dimension_numbers<[1], [0], [0], [1], [0, 0, 1, 1], [], []>} : vector<1x16xbf16>, vector<16x64xbf16>, vector<1x64xf32> -> vector<1x64xf32>
    %60 = arith.addf %55, %59 : vector<1x64xf32>
    %61 = vector.extract_strided_slice %45 {offsets = [3, 0], sizes = [1, 16], strides = [1, 1]} : vector<4x16xf32> to vector<1x16xf32>
    %62 = arith.truncf %61 : vector<1x16xf32> to vector<1x16xbf16>
    %c48 = arith.constant 48 : index
    %c0_42 = arith.constant 0 : index
    %63 = vector.load %arg4[%c48, %c0_42] : memref<256x64xbf16, #tpu.memory_space<vmem>>, vector<16x64xbf16>
    %cst_43 = arith.constant dense<0.000000e+00> : vector<1x64xf32>
    %64 = tpu.matmul %62, %63, %cst_43 {dimension_numbers = #tpu.dot_dimension_numbers<[1], [0], [0], [1], [0, 0, 1, 1], [], []>} : vector<1x16xbf16>, vector<16x64xbf16>, vector<1x64xf32> -> vector<1x64xf32>
    %65 = arith.addf %60, %64 : vector<1x64xf32>
    %cst_44 = arith.constant 0.000000e+00 : f32
    %66 = vector.broadcast %cst_44 : f32 to vector<4x16xf32>
    %c0_45 = arith.constant 0 : index
    %c1_46 = arith.constant 1 : index
    %c0_47 = arith.constant 0 : index
    %c0_48 = arith.constant 0 : index
    %67 = vector.load %arg1[%c0_45, %c1_46, %c0_47, %c0_48] : memref<1x5x5x64xf32, #tpu.memory_space<vmem>>, vector<1x1x4x64xf32>
    %68 = vector.shape_cast %67 : vector<1x1x4x64xf32> to vector<4x64xf32>
    %69 = arith.truncf %68 : vector<4x64xf32> to vector<4x64xbf16>
    %c0_49 = arith.constant 0 : index
    %c0_50 = arith.constant 0 : index
    %c0_51 = arith.constant 0 : index
    %70 = vector.load %arg2[%c0_49, %c0_50, %c0_51] : memref<4x64x16xbf16, #tpu.memory_space<vmem>>, vector<1x64x16xbf16>
    %71 = vector.shape_cast %70 : vector<1x64x16xbf16> to vector<64x16xbf16>
    %cst_52 = arith.constant dense<0.000000e+00> : vector<4x16xf32>
    %72 = tpu.matmul %69, %71, %cst_52 {dimension_numbers = #tpu.dot_dimension_numbers<[1], [0], [0], [1], [0, 0, 1, 1], [], []>} : vector<4x64xbf16>, vector<64x16xbf16>, vector<4x16xf32> -> vector<4x16xf32>
    %73 = arith.addf %66, %72 : vector<4x16xf32>
    %c0_53 = arith.constant 0 : index
    %c1_54 = arith.constant 1 : index
    %c1_55 = arith.constant 1 : index
    %c0_56 = arith.constant 0 : index
    %74 = vector.load %arg1[%c0_53, %c1_54, %c1_55, %c0_56] : memref<1x5x5x64xf32, #tpu.memory_space<vmem>>, vector<1x1x4x64xf32>
    %75 = vector.shape_cast %74 : vector<1x1x4x64xf32> to vector<4x64xf32>
    %76 = arith.truncf %75 : vector<4x64xf32> to vector<4x64xbf16>
    %c1_57 = arith.constant 1 : index
    %c0_58 = arith.constant 0 : index
    %c0_59 = arith.constant 0 : index
    %77 = vector.load %arg2[%c1_57, %c0_58, %c0_59] : memref<4x64x16xbf16, #tpu.memory_space<vmem>>, vector<1x64x16xbf16>
    %78 = vector.shape_cast %77 : vector<1x64x16xbf16> to vector<64x16xbf16>
    %cst_60 = arith.constant dense<0.000000e+00> : vector<4x16xf32>
    %79 = tpu.matmul %76, %78, %cst_60 {dimension_numbers = #tpu.dot_dimension_numbers<[1], [0], [0], [1], [0, 0, 1, 1], [], []>} : vector<4x64xbf16>, vector<64x16xbf16>, vector<4x16xf32> -> vector<4x16xf32>
    %80 = arith.addf %73, %79 : vector<4x16xf32>
    %c0_61 = arith.constant 0 : index
    %c2_62 = arith.constant 2 : index
    %c0_63 = arith.constant 0 : index
    %c0_64 = arith.constant 0 : index
    %81 = vector.load %arg1[%c0_61, %c2_62, %c0_63, %c0_64] : memref<1x5x5x64xf32, #tpu.memory_space<vmem>>, vector<1x1x4x64xf32>
    %82 = vector.shape_cast %81 : vector<1x1x4x64xf32> to vector<4x64xf32>
    %83 = arith.truncf %82 : vector<4x64xf32> to vector<4x64xbf16>
    %c2_65 = arith.constant 2 : index
    %c0_66 = arith.constant 0 : index
    %c0_67 = arith.constant 0 : index
    %84 = vector.load %arg2[%c2_65, %c0_66, %c0_67] : memref<4x64x16xbf16, #tpu.memory_space<vmem>>, vector<1x64x16xbf16>
    %85 = vector.shape_cast %84 : vector<1x64x16xbf16> to vector<64x16xbf16>
    %cst_68 = arith.constant dense<0.000000e+00> : vector<4x16xf32>
    %86 = tpu.matmul %83, %85, %cst_68 {dimension_numbers = #tpu.dot_dimension_numbers<[1], [0], [0], [1], [0, 0, 1, 1], [], []>} : vector<4x64xbf16>, vector<64x16xbf16>, vector<4x16xf32> -> vector<4x16xf32>
    %87 = arith.addf %80, %86 : vector<4x16xf32>
    %c0_69 = arith.constant 0 : index
    %c2_70 = arith.constant 2 : index
    %c1_71 = arith.constant 1 : index
    %c0_72 = arith.constant 0 : index
    %88 = vector.load %arg1[%c0_69, %c2_70, %c1_71, %c0_72] : memref<1x5x5x64xf32, #tpu.memory_space<vmem>>, vector<1x1x4x64xf32>
    %89 = vector.shape_cast %88 : vector<1x1x4x64xf32> to vector<4x64xf32>
    %90 = arith.truncf %89 : vector<4x64xf32> to vector<4x64xbf16>
    %c3_73 = arith.constant 3 : index
    %c0_74 = arith.constant 0 : index
    %c0_75 = arith.constant 0 : index
    %91 = vector.load %arg2[%c3_73, %c0_74, %c0_75] : memref<4x64x16xbf16, #tpu.memory_space<vmem>>, vector<1x64x16xbf16>
    %92 = vector.shape_cast %91 : vector<1x64x16xbf16> to vector<64x16xbf16>
    %cst_76 = arith.constant dense<0.000000e+00> : vector<4x16xf32>
    %93 = tpu.matmul %90, %92, %cst_76 {dimension_numbers = #tpu.dot_dimension_numbers<[1], [0], [0], [1], [0, 0, 1, 1], [], []>} : vector<4x64xbf16>, vector<64x16xbf16>, vector<4x16xf32> -> vector<4x16xf32>
    %94 = arith.addf %87, %93 : vector<4x16xf32>
    %c0_77 = arith.constant 0 : index
    %c0_78 = arith.constant 0 : index
    %95 = vector.load %arg3[%c0_77, %c0_78] : memref<1x16xf32, #tpu.memory_space<vmem>>, vector<1x16xf32>
    %96 = vector.broadcast %95 : vector<1x16xf32> to vector<4x16xf32>
    %97 = arith.addf %94, %96 : vector<4x16xf32>
    %cst_79 = arith.constant 5.000000e-01 : f32
    %98 = vector.broadcast %cst_79 : f32 to vector<4x16xf32>
    %99 = arith.mulf %98, %97 : vector<4x16xf32>
    %cst_80 = arith.constant 4.471500e-02 : f32
    %100 = vector.broadcast %cst_80 : f32 to vector<4x16xf32>
    %101 = arith.mulf %100, %97 : vector<4x16xf32>
    %102 = arith.mulf %101, %97 : vector<4x16xf32>
    %103 = arith.mulf %102, %97 : vector<4x16xf32>
    %104 = arith.addf %97, %103 : vector<4x16xf32>
    %cst_81 = arith.constant 0.797884583 : f32
    %105 = vector.broadcast %cst_81 : f32 to vector<4x16xf32>
    %106 = arith.mulf %105, %104 : vector<4x16xf32>
    %107 = math.tanh %106 : vector<4x16xf32>
    %cst_82 = arith.constant 1.000000e+00 : f32
    %108 = vector.broadcast %cst_82 : f32 to vector<4x16xf32>
    %109 = arith.addf %108, %107 : vector<4x16xf32>
    %110 = arith.mulf %99, %109 : vector<4x16xf32>
    %111 = vector.extract_strided_slice %110 {offsets = [0, 0], sizes = [1, 16], strides = [1, 1]} : vector<4x16xf32> to vector<1x16xf32>
    %112 = arith.truncf %111 : vector<1x16xf32> to vector<1x16xbf16>
    %c64 = arith.constant 64 : index
    %c0_83 = arith.constant 0 : index
    %113 = vector.load %arg4[%c64, %c0_83] : memref<256x64xbf16, #tpu.memory_space<vmem>>, vector<16x64xbf16>
    %cst_84 = arith.constant dense<0.000000e+00> : vector<1x64xf32>
    %114 = tpu.matmul %112, %113, %cst_84 {dimension_numbers = #tpu.dot_dimension_numbers<[1], [0], [0], [1], [0, 0, 1, 1], [], []>} : vector<1x16xbf16>, vector<16x64xbf16>, vector<1x64xf32> -> vector<1x64xf32>
    %115 = arith.addf %65, %114 : vector<1x64xf32>
    %116 = vector.extract_strided_slice %110 {offsets = [1, 0], sizes = [1, 16], strides = [1, 1]} : vector<4x16xf32> to vector<1x16xf32>
    %117 = arith.truncf %116 : vector<1x16xf32> to vector<1x16xbf16>
    %c80 = arith.constant 80 : index
    %c0_85 = arith.constant 0 : index
    %118 = vector.load %arg4[%c80, %c0_85] : memref<256x64xbf16, #tpu.memory_space<vmem>>, vector<16x64xbf16>
    %cst_86 = arith.constant dense<0.000000e+00> : vector<1x64xf32>
    %119 = tpu.matmul %117, %118, %cst_86 {dimension_numbers = #tpu.dot_dimension_numbers<[1], [0], [0], [1], [0, 0, 1, 1], [], []>} : vector<1x16xbf16>, vector<16x64xbf16>, vector<1x64xf32> -> vector<1x64xf32>
    %120 = arith.addf %115, %119 : vector<1x64xf32>
    %121 = vector.extract_strided_slice %110 {offsets = [2, 0], sizes = [1, 16], strides = [1, 1]} : vector<4x16xf32> to vector<1x16xf32>
    %122 = arith.truncf %121 : vector<1x16xf32> to vector<1x16xbf16>
    %c96 = arith.constant 96 : index
    %c0_87 = arith.constant 0 : index
    %123 = vector.load %arg4[%c96, %c0_87] : memref<256x64xbf16, #tpu.memory_space<vmem>>, vector<16x64xbf16>
    %cst_88 = arith.constant dense<0.000000e+00> : vector<1x64xf32>
    %124 = tpu.matmul %122, %123, %cst_88 {dimension_numbers = #tpu.dot_dimension_numbers<[1], [0], [0], [1], [0, 0, 1, 1], [], []>} : vector<1x16xbf16>, vector<16x64xbf16>, vector<1x64xf32> -> vector<1x64xf32>
    %125 = arith.addf %120, %124 : vector<1x64xf32>
    %126 = vector.extract_strided_slice %110 {offsets = [3, 0], sizes = [1, 16], strides = [1, 1]} : vector<4x16xf32> to vector<1x16xf32>
    %127 = arith.truncf %126 : vector<1x16xf32> to vector<1x16xbf16>
    %c112 = arith.constant 112 : index
    %c0_89 = arith.constant 0 : index
    %128 = vector.load %arg4[%c112, %c0_89] : memref<256x64xbf16, #tpu.memory_space<vmem>>, vector<16x64xbf16>
    %cst_90 = arith.constant dense<0.000000e+00> : vector<1x64xf32>
    %129 = tpu.matmul %127, %128, %cst_90 {dimension_numbers = #tpu.dot_dimension_numbers<[1], [0], [0], [1], [0, 0, 1, 1], [], []>} : vector<1x16xbf16>, vector<16x64xbf16>, vector<1x64xf32> -> vector<1x64xf32>
    %130 = arith.addf %125, %129 : vector<1x64xf32>
    %cst_91 = arith.constant 0.000000e+00 : f32
    %131 = vector.broadcast %cst_91 : f32 to vector<4x16xf32>
    %c0_92 = arith.constant 0 : index
    %c2_93 = arith.constant 2 : index
    %c0_94 = arith.constant 0 : index
    %c0_95 = arith.constant 0 : index
    %132 = vector.load %arg1[%c0_92, %c2_93, %c0_94, %c0_95] : memref<1x5x5x64xf32, #tpu.memory_space<vmem>>, vector<1x1x4x64xf32>
    %133 = vector.shape_cast %132 : vector<1x1x4x64xf32> to vector<4x64xf32>
    %134 = arith.truncf %133 : vector<4x64xf32> to vector<4x64xbf16>
    %c0_96 = arith.constant 0 : index
    %c0_97 = arith.constant 0 : index
    %c0_98 = arith.constant 0 : index
    %135 = vector.load %arg2[%c0_96, %c0_97, %c0_98] : memref<4x64x16xbf16, #tpu.memory_space<vmem>>, vector<1x64x16xbf16>
    %136 = vector.shape_cast %135 : vector<1x64x16xbf16> to vector<64x16xbf16>
    %cst_99 = arith.constant dense<0.000000e+00> : vector<4x16xf32>
    %137 = tpu.matmul %134, %136, %cst_99 {dimension_numbers = #tpu.dot_dimension_numbers<[1], [0], [0], [1], [0, 0, 1, 1], [], []>} : vector<4x64xbf16>, vector<64x16xbf16>, vector<4x16xf32> -> vector<4x16xf32>
    %138 = arith.addf %131, %137 : vector<4x16xf32>
    %c0_100 = arith.constant 0 : index
    %c2_101 = arith.constant 2 : index
    %c1_102 = arith.constant 1 : index
    %c0_103 = arith.constant 0 : index
    %139 = vector.load %arg1[%c0_100, %c2_101, %c1_102, %c0_103] : memref<1x5x5x64xf32, #tpu.memory_space<vmem>>, vector<1x1x4x64xf32>
    %140 = vector.shape_cast %139 : vector<1x1x4x64xf32> to vector<4x64xf32>
    %141 = arith.truncf %140 : vector<4x64xf32> to vector<4x64xbf16>
    %c1_104 = arith.constant 1 : index
    %c0_105 = arith.constant 0 : index
    %c0_106 = arith.constant 0 : index
    %142 = vector.load %arg2[%c1_104, %c0_105, %c0_106] : memref<4x64x16xbf16, #tpu.memory_space<vmem>>, vector<1x64x16xbf16>
    %143 = vector.shape_cast %142 : vector<1x64x16xbf16> to vector<64x16xbf16>
    %cst_107 = arith.constant dense<0.000000e+00> : vector<4x16xf32>
    %144 = tpu.matmul %141, %143, %cst_107 {dimension_numbers = #tpu.dot_dimension_numbers<[1], [0], [0], [1], [0, 0, 1, 1], [], []>} : vector<4x64xbf16>, vector<64x16xbf16>, vector<4x16xf32> -> vector<4x16xf32>
    %145 = arith.addf %138, %144 : vector<4x16xf32>
    %c0_108 = arith.constant 0 : index
    %c3_109 = arith.constant 3 : index
    %c0_110 = arith.constant 0 : index
    %c0_111 = arith.constant 0 : index
    %146 = vector.load %arg1[%c0_108, %c3_109, %c0_110, %c0_111] : memref<1x5x5x64xf32, #tpu.memory_space<vmem>>, vector<1x1x4x64xf32>
    %147 = vector.shape_cast %146 : vector<1x1x4x64xf32> to vector<4x64xf32>
    %148 = arith.truncf %147 : vector<4x64xf32> to vector<4x64xbf16>
    %c2_112 = arith.constant 2 : index
    %c0_113 = arith.constant 0 : index
    %c0_114 = arith.constant 0 : index
    %149 = vector.load %arg2[%c2_112, %c0_113, %c0_114] : memref<4x64x16xbf16, #tpu.memory_space<vmem>>, vector<1x64x16xbf16>
    %150 = vector.shape_cast %149 : vector<1x64x16xbf16> to vector<64x16xbf16>
    %cst_115 = arith.constant dense<0.000000e+00> : vector<4x16xf32>
    %151 = tpu.matmul %148, %150, %cst_115 {dimension_numbers = #tpu.dot_dimension_numbers<[1], [0], [0], [1], [0, 0, 1, 1], [], []>} : vector<4x64xbf16>, vector<64x16xbf16>, vector<4x16xf32> -> vector<4x16xf32>
    %152 = arith.addf %145, %151 : vector<4x16xf32>
    %c0_116 = arith.constant 0 : index
    %c3_117 = arith.constant 3 : index
    %c1_118 = arith.constant 1 : index
    %c0_119 = arith.constant 0 : index
    %153 = vector.load %arg1[%c0_116, %c3_117, %c1_118, %c0_119] : memref<1x5x5x64xf32, #tpu.memory_space<vmem>>, vector<1x1x4x64xf32>
    %154 = vector.shape_cast %153 : vector<1x1x4x64xf32> to vector<4x64xf32>
    %155 = arith.truncf %154 : vector<4x64xf32> to vector<4x64xbf16>
    %c3_120 = arith.constant 3 : index
    %c0_121 = arith.constant 0 : index
    %c0_122 = arith.constant 0 : index
    %156 = vector.load %arg2[%c3_120, %c0_121, %c0_122] : memref<4x64x16xbf16, #tpu.memory_space<vmem>>, vector<1x64x16xbf16>
    %157 = vector.shape_cast %156 : vector<1x64x16xbf16> to vector<64x16xbf16>
    %cst_123 = arith.constant dense<0.000000e+00> : vector<4x16xf32>
    %158 = tpu.matmul %155, %157, %cst_123 {dimension_numbers = #tpu.dot_dimension_numbers<[1], [0], [0], [1], [0, 0, 1, 1], [], []>} : vector<4x64xbf16>, vector<64x16xbf16>, vector<4x16xf32> -> vector<4x16xf32>
    %159 = arith.addf %152, %158 : vector<4x16xf32>
    %c0_124 = arith.constant 0 : index
    %c0_125 = arith.constant 0 : index
    %160 = vector.load %arg3[%c0_124, %c0_125] : memref<1x16xf32, #tpu.memory_space<vmem>>, vector<1x16xf32>
    %161 = vector.broadcast %160 : vector<1x16xf32> to vector<4x16xf32>
    %162 = arith.addf %159, %161 : vector<4x16xf32>
    %cst_126 = arith.constant 5.000000e-01 : f32
    %163 = vector.broadcast %cst_126 : f32 to vector<4x16xf32>
    %164 = arith.mulf %163, %162 : vector<4x16xf32>
    %cst_127 = arith.constant 4.471500e-02 : f32
    %165 = vector.broadcast %cst_127 : f32 to vector<4x16xf32>
    %166 = arith.mulf %165, %162 : vector<4x16xf32>
    %167 = arith.mulf %166, %162 : vector<4x16xf32>
    %168 = arith.mulf %167, %162 : vector<4x16xf32>
    %169 = arith.addf %162, %168 : vector<4x16xf32>
    %cst_128 = arith.constant 0.797884583 : f32
    %170 = vector.broadcast %cst_128 : f32 to vector<4x16xf32>
    %171 = arith.mulf %170, %169 : vector<4x16xf32>
    %172 = math.tanh %171 : vector<4x16xf32>
    %cst_129 = arith.constant 1.000000e+00 : f32
    %173 = vector.broadcast %cst_129 : f32 to vector<4x16xf32>
    %174 = arith.addf %173, %172 : vector<4x16xf32>
    %175 = arith.mulf %164, %174 : vector<4x16xf32>
    %176 = vector.extract_strided_slice %175 {offsets = [0, 0], sizes = [1, 16], strides = [1, 1]} : vector<4x16xf32> to vector<1x16xf32>
    %177 = arith.truncf %176 : vector<1x16xf32> to vector<1x16xbf16>
    %c128 = arith.constant 128 : index
    %c0_130 = arith.constant 0 : index
    %178 = vector.load %arg4[%c128, %c0_130] : memref<256x64xbf16, #tpu.memory_space<vmem>>, vector<16x64xbf16>
    %cst_131 = arith.constant dense<0.000000e+00> : vector<1x64xf32>
    %179 = tpu.matmul %177, %178, %cst_131 {dimension_numbers = #tpu.dot_dimension_numbers<[1], [0], [0], [1], [0, 0, 1, 1], [], []>} : vector<1x16xbf16>, vector<16x64xbf16>, vector<1x64xf32> -> vector<1x64xf32>
    %180 = arith.addf %130, %179 : vector<1x64xf32>
    %181 = vector.extract_strided_slice %175 {offsets = [1, 0], sizes = [1, 16], strides = [1, 1]} : vector<4x16xf32> to vector<1x16xf32>
    %182 = arith.truncf %181 : vector<1x16xf32> to vector<1x16xbf16>
    %c144 = arith.constant 144 : index
    %c0_132 = arith.constant 0 : index
    %183 = vector.load %arg4[%c144, %c0_132] : memref<256x64xbf16, #tpu.memory_space<vmem>>, vector<16x64xbf16>
    %cst_133 = arith.constant dense<0.000000e+00> : vector<1x64xf32>
    %184 = tpu.matmul %182, %183, %cst_133 {dimension_numbers = #tpu.dot_dimension_numbers<[1], [0], [0], [1], [0, 0, 1, 1], [], []>} : vector<1x16xbf16>, vector<16x64xbf16>, vector<1x64xf32> -> vector<1x64xf32>
    %185 = arith.addf %180, %184 : vector<1x64xf32>
    %186 = vector.extract_strided_slice %175 {offsets = [2, 0], sizes = [1, 16], strides = [1, 1]} : vector<4x16xf32> to vector<1x16xf32>
    %187 = arith.truncf %186 : vector<1x16xf32> to vector<1x16xbf16>
    %c160 = arith.constant 160 : index
    %c0_134 = arith.constant 0 : index
    %188 = vector.load %arg4[%c160, %c0_134] : memref<256x64xbf16, #tpu.memory_space<vmem>>, vector<16x64xbf16>
    %cst_135 = arith.constant dense<0.000000e+00> : vector<1x64xf32>
    %189 = tpu.matmul %187, %188, %cst_135 {dimension_numbers = #tpu.dot_dimension_numbers<[1], [0], [0], [1], [0, 0, 1, 1], [], []>} : vector<1x16xbf16>, vector<16x64xbf16>, vector<1x64xf32> -> vector<1x64xf32>
    %190 = arith.addf %185, %189 : vector<1x64xf32>
    %191 = vector.extract_strided_slice %175 {offsets = [3, 0], sizes = [1, 16], strides = [1, 1]} : vector<4x16xf32> to vector<1x16xf32>
    %192 = arith.truncf %191 : vector<1x16xf32> to vector<1x16xbf16>
    %c176 = arith.constant 176 : index
    %c0_136 = arith.constant 0 : index
    %193 = vector.load %arg4[%c176, %c0_136] : memref<256x64xbf16, #tpu.memory_space<vmem>>, vector<16x64xbf16>
    %cst_137 = arith.constant dense<0.000000e+00> : vector<1x64xf32>
    %194 = tpu.matmul %192, %193, %cst_137 {dimension_numbers = #tpu.dot_dimension_numbers<[1], [0], [0], [1], [0, 0, 1, 1], [], []>} : vector<1x16xbf16>, vector<16x64xbf16>, vector<1x64xf32> -> vector<1x64xf32>
    %195 = arith.addf %190, %194 : vector<1x64xf32>
    %cst_138 = arith.constant 0.000000e+00 : f32
    %196 = vector.broadcast %cst_138 : f32 to vector<4x16xf32>
    %c0_139 = arith.constant 0 : index
    %c3_140 = arith.constant 3 : index
    %c0_141 = arith.constant 0 : index
    %c0_142 = arith.constant 0 : index
    %197 = vector.load %arg1[%c0_139, %c3_140, %c0_141, %c0_142] : memref<1x5x5x64xf32, #tpu.memory_space<vmem>>, vector<1x1x4x64xf32>
    %198 = vector.shape_cast %197 : vector<1x1x4x64xf32> to vector<4x64xf32>
    %199 = arith.truncf %198 : vector<4x64xf32> to vector<4x64xbf16>
    %c0_143 = arith.constant 0 : index
    %c0_144 = arith.constant 0 : index
    %c0_145 = arith.constant 0 : index
    %200 = vector.load %arg2[%c0_143, %c0_144, %c0_145] : memref<4x64x16xbf16, #tpu.memory_space<vmem>>, vector<1x64x16xbf16>
    %201 = vector.shape_cast %200 : vector<1x64x16xbf16> to vector<64x16xbf16>
    %cst_146 = arith.constant dense<0.000000e+00> : vector<4x16xf32>
    %202 = tpu.matmul %199, %201, %cst_146 {dimension_numbers = #tpu.dot_dimension_numbers<[1], [0], [0], [1], [0, 0, 1, 1], [], []>} : vector<4x64xbf16>, vector<64x16xbf16>, vector<4x16xf32> -> vector<4x16xf32>
    %203 = arith.addf %196, %202 : vector<4x16xf32>
    %c0_147 = arith.constant 0 : index
    %c3_148 = arith.constant 3 : index
    %c1_149 = arith.constant 1 : index
    %c0_150 = arith.constant 0 : index
    %204 = vector.load %arg1[%c0_147, %c3_148, %c1_149, %c0_150] : memref<1x5x5x64xf32, #tpu.memory_space<vmem>>, vector<1x1x4x64xf32>
    %205 = vector.shape_cast %204 : vector<1x1x4x64xf32> to vector<4x64xf32>
    %206 = arith.truncf %205 : vector<4x64xf32> to vector<4x64xbf16>
    %c1_151 = arith.constant 1 : index
    %c0_152 = arith.constant 0 : index
    %c0_153 = arith.constant 0 : index
    %207 = vector.load %arg2[%c1_151, %c0_152, %c0_153] : memref<4x64x16xbf16, #tpu.memory_space<vmem>>, vector<1x64x16xbf16>
    %208 = vector.shape_cast %207 : vector<1x64x16xbf16> to vector<64x16xbf16>
    %cst_154 = arith.constant dense<0.000000e+00> : vector<4x16xf32>
    %209 = tpu.matmul %206, %208, %cst_154 {dimension_numbers = #tpu.dot_dimension_numbers<[1], [0], [0], [1], [0, 0, 1, 1], [], []>} : vector<4x64xbf16>, vector<64x16xbf16>, vector<4x16xf32> -> vector<4x16xf32>
    %210 = arith.addf %203, %209 : vector<4x16xf32>
    %c0_155 = arith.constant 0 : index
    %c4 = arith.constant 4 : index
    %c0_156 = arith.constant 0 : index
    %c0_157 = arith.constant 0 : index
    %211 = vector.load %arg1[%c0_155, %c4, %c0_156, %c0_157] : memref<1x5x5x64xf32, #tpu.memory_space<vmem>>, vector<1x1x4x64xf32>
    %212 = vector.shape_cast %211 : vector<1x1x4x64xf32> to vector<4x64xf32>
    %213 = arith.truncf %212 : vector<4x64xf32> to vector<4x64xbf16>
    %c2_158 = arith.constant 2 : index
    %c0_159 = arith.constant 0 : index
    %c0_160 = arith.constant 0 : index
    %214 = vector.load %arg2[%c2_158, %c0_159, %c0_160] : memref<4x64x16xbf16, #tpu.memory_space<vmem>>, vector<1x64x16xbf16>
    %215 = vector.shape_cast %214 : vector<1x64x16xbf16> to vector<64x16xbf16>
    %cst_161 = arith.constant dense<0.000000e+00> : vector<4x16xf32>
    %216 = tpu.matmul %213, %215, %cst_161 {dimension_numbers = #tpu.dot_dimension_numbers<[1], [0], [0], [1], [0, 0, 1, 1], [], []>} : vector<4x64xbf16>, vector<64x16xbf16>, vector<4x16xf32> -> vector<4x16xf32>
    %217 = arith.addf %210, %216 : vector<4x16xf32>
    %c0_162 = arith.constant 0 : index
    %c4_163 = arith.constant 4 : index
    %c1_164 = arith.constant 1 : index
    %c0_165 = arith.constant 0 : index
    %218 = vector.load %arg1[%c0_162, %c4_163, %c1_164, %c0_165] : memref<1x5x5x64xf32, #tpu.memory_space<vmem>>, vector<1x1x4x64xf32>
    %219 = vector.shape_cast %218 : vector<1x1x4x64xf32> to vector<4x64xf32>
    %220 = arith.truncf %219 : vector<4x64xf32> to vector<4x64xbf16>
    %c3_166 = arith.constant 3 : index
    %c0_167 = arith.constant 0 : index
    %c0_168 = arith.constant 0 : index
    %221 = vector.load %arg2[%c3_166, %c0_167, %c0_168] : memref<4x64x16xbf16, #tpu.memory_space<vmem>>, vector<1x64x16xbf16>
    %222 = vector.shape_cast %221 : vector<1x64x16xbf16> to vector<64x16xbf16>
    %cst_169 = arith.constant dense<0.000000e+00> : vector<4x16xf32>
    %223 = tpu.matmul %220, %222, %cst_169 {dimension_numbers = #tpu.dot_dimension_numbers<[1], [0], [0], [1], [0, 0, 1, 1], [], []>} : vector<4x64xbf16>, vector<64x16xbf16>, vector<4x16xf32> -> vector<4x16xf32>
    %224 = arith.addf %217, %223 : vector<4x16xf32>
    %c0_170 = arith.constant 0 : index
    %c0_171 = arith.constant 0 : index
    %225 = vector.load %arg3[%c0_170, %c0_171] : memref<1x16xf32, #tpu.memory_space<vmem>>, vector<1x16xf32>
    %226 = vector.broadcast %225 : vector<1x16xf32> to vector<4x16xf32>
    %227 = arith.addf %224, %226 : vector<4x16xf32>
    %cst_172 = arith.constant 5.000000e-01 : f32
    %228 = vector.broadcast %cst_172 : f32 to vector<4x16xf32>
    %229 = arith.mulf %228, %227 : vector<4x16xf32>
    %cst_173 = arith.constant 4.471500e-02 : f32
    %230 = vector.broadcast %cst_173 : f32 to vector<4x16xf32>
    %231 = arith.mulf %230, %227 : vector<4x16xf32>
    %232 = arith.mulf %231, %227 : vector<4x16xf32>
    %233 = arith.mulf %232, %227 : vector<4x16xf32>
    %234 = arith.addf %227, %233 : vector<4x16xf32>
    %cst_174 = arith.constant 0.797884583 : f32
    %235 = vector.broadcast %cst_174 : f32 to vector<4x16xf32>
    %236 = arith.mulf %235, %234 : vector<4x16xf32>
    %237 = math.tanh %236 : vector<4x16xf32>
    %cst_175 = arith.constant 1.000000e+00 : f32
    %238 = vector.broadcast %cst_175 : f32 to vector<4x16xf32>
    %239 = arith.addf %238, %237 : vector<4x16xf32>
    %240 = arith.mulf %229, %239 : vector<4x16xf32>
    %241 = vector.extract_strided_slice %240 {offsets = [0, 0], sizes = [1, 16], strides = [1, 1]} : vector<4x16xf32> to vector<1x16xf32>
    %242 = arith.truncf %241 : vector<1x16xf32> to vector<1x16xbf16>
    %c192 = arith.constant 192 : index
    %c0_176 = arith.constant 0 : index
    %243 = vector.load %arg4[%c192, %c0_176] : memref<256x64xbf16, #tpu.memory_space<vmem>>, vector<16x64xbf16>
    %cst_177 = arith.constant dense<0.000000e+00> : vector<1x64xf32>
    %244 = tpu.matmul %242, %243, %cst_177 {dimension_numbers = #tpu.dot_dimension_numbers<[1], [0], [0], [1], [0, 0, 1, 1], [], []>} : vector<1x16xbf16>, vector<16x64xbf16>, vector<1x64xf32> -> vector<1x64xf32>
    %245 = arith.addf %195, %244 : vector<1x64xf32>
    %246 = vector.extract_strided_slice %240 {offsets = [1, 0], sizes = [1, 16], strides = [1, 1]} : vector<4x16xf32> to vector<1x16xf32>
    %247 = arith.truncf %246 : vector<1x16xf32> to vector<1x16xbf16>
    %c208 = arith.constant 208 : index
    %c0_178 = arith.constant 0 : index
    %248 = vector.load %arg4[%c208, %c0_178] : memref<256x64xbf16, #tpu.memory_space<vmem>>, vector<16x64xbf16>
    %cst_179 = arith.constant dense<0.000000e+00> : vector<1x64xf32>
    %249 = tpu.matmul %247, %248, %cst_179 {dimension_numbers = #tpu.dot_dimension_numbers<[1], [0], [0], [1], [0, 0, 1, 1], [], []>} : vector<1x16xbf16>, vector<16x64xbf16>, vector<1x64xf32> -> vector<1x64xf32>
    %250 = arith.addf %245, %249 : vector<1x64xf32>
    %251 = vector.extract_strided_slice %240 {offsets = [2, 0], sizes = [1, 16], strides = [1, 1]} : vector<4x16xf32> to vector<1x16xf32>
    %252 = arith.truncf %251 : vector<1x16xf32> to vector<1x16xbf16>
    %c224 = arith.constant 224 : index
    %c0_180 = arith.constant 0 : index
    %253 = vector.load %arg4[%c224, %c0_180] : memref<256x64xbf16, #tpu.memory_space<vmem>>, vector<16x64xbf16>
    %cst_181 = arith.constant dense<0.000000e+00> : vector<1x64xf32>
    %254 = tpu.matmul %252, %253, %cst_181 {dimension_numbers = #tpu.dot_dimension_numbers<[1], [0], [0], [1], [0, 0, 1, 1], [], []>} : vector<1x16xbf16>, vector<16x64xbf16>, vector<1x64xf32> -> vector<1x64xf32>
    %255 = arith.addf %250, %254 : vector<1x64xf32>
    %256 = vector.extract_strided_slice %240 {offsets = [3, 0], sizes = [1, 16], strides = [1, 1]} : vector<4x16xf32> to vector<1x16xf32>
    %257 = arith.truncf %256 : vector<1x16xf32> to vector<1x16xbf16>
    %c240 = arith.constant 240 : index
    %c0_182 = arith.constant 0 : index
    %258 = vector.load %arg4[%c240, %c0_182] : memref<256x64xbf16, #tpu.memory_space<vmem>>, vector<16x64xbf16>
    %cst_183 = arith.constant dense<0.000000e+00> : vector<1x64xf32>
    %259 = tpu.matmul %257, %258, %cst_183 {dimension_numbers = #tpu.dot_dimension_numbers<[1], [0], [0], [1], [0, 0, 1, 1], [], []>} : vector<1x16xbf16>, vector<16x64xbf16>, vector<1x64xf32> -> vector<1x64xf32>
    %260 = arith.addf %255, %259 : vector<1x64xf32>
    %c0_184 = arith.constant 0 : index
    %c0_185 = arith.constant 0 : index
    %261 = vector.load %arg5[%c0_184, %c0_185] : memref<1x64xf32, #tpu.memory_space<vmem>>, vector<1x64xf32>
    %262 = arith.addf %260, %261 : vector<1x64xf32>
    %263 = vector.shape_cast %262 : vector<1x64xf32> to vector<1x1x64xf32>
    %c0_186 = arith.constant 0 : index
    %c0_187 = arith.constant 0 : index
    %c0_188 = arith.constant 0 : index
    %264 = vector.load %arg6[%c0_186, %c0_187, %c0_188] : memref<1x1x64xf32, #tpu.memory_space<vmem>>, vector<1x1x64xf32>
    tpu.vector_store %arg6[%c0_186, %c0_187, %c0_188], %263 {strides = array<i32>} : memref<1x1x64xf32, #tpu.memory_space<vmem>>, vector<1x1x64xf32>,
    return
  }
  func.func @transform_0(%arg0: i32) -> (i32, i32, i32, i32) {
    %c0_i32 = arith.constant 0 : i32
    %c0_i32_0 = arith.constant 0 : i32
    %c0_i32_1 = arith.constant 0 : i32
    %c0_i32_2 = arith.constant 0 : i32
    return %arg0, %c0_i32, %c0_i32_0, %c0_i32_1 : i32, i32, i32, i32
  }
  func.func @transform_1(%arg0: i32) -> (i32, i32, i32) {
    %c0_i32 = arith.constant 0 : i32
    %c0_i32_0 = arith.constant 0 : i32
    %c0_i32_1 = arith.constant 0 : i32
    %c0_i32_2 = arith.constant 0 : i32
    return %c0_i32, %c0_i32_0, %c0_i32_1 : i32, i32, i32
  }
  func.func @transform_2(%arg0: i32) -> (i32, i32) {
    %c0_i32 = arith.constant 0 : i32
    %c0_i32_0 = arith.constant 0 : i32
    %c0_i32_1 = arith.constant 0 : i32
    return %c0_i32, %c0_i32_0 : i32, i32
  }
  func.func @transform_3(%arg0: i32) -> (i32, i32) {
    %c0_i32 = arith.constant 0 : i32
    %c0_i32_0 = arith.constant 0 : i32
    %c0_i32_1 = arith.constant 0 : i32
    return %c0_i32, %c0_i32_0 : i32, i32
  }
  func.func @transform_4(%arg0: i32) -> (i32, i32) {
    %c0_i32 = arith.constant 0 : i32
    %c0_i32_0 = arith.constant 0 : i32
    %c0_i32_1 = arith.constant 0 : i32
    return %c0_i32, %c0_i32_0 : i32, i32
  }
  func.func @transform_5(%arg0: i32) -> (i32, i32, i32) {
    %c0_i32 = arith.constant 0 : i32
    %c0_i32_0 = arith.constant 0 : i32
    %c0_i32_1 = arith.constant 0 : i32
    return %arg0, %c0_i32, %c0_i32_0 : i32, i32, i32
  }
}

</mosaic_0001>

<bundles_post_ra>
// kernel: encoder_forward.4
= control target key start
LH: loop header
LB: loop body
LE: loop exit
PB: predicated region body
PF: predicated region fallthrough
CT: control target
= control target key end

     0   :  { %s2394_s18 = smov 0   ;;  %s2722_s0 = inlined_call_operand.vmem [shape: f32[2,9,9,32], index: 0, kind: input, shape index: {}]   ;;  %s2723_s1 = inlined_call_operand.vmem [shape: bf16[4,32,16], index: 1, kind: input, shape index: {}]   ;;  %s2724_s2 = inlined_call_operand.vmem [shape: f32[1,16], index: 2, kind: input, shape index: {}]   ;;  %s2725_s3 = inlined_call_operand.vmem [shape: bf16[9,16,16], index: 3, kind: input, shape index: {}]   ;;  %s2726_s4 = inlined_call_operand.vmem [shape: f32[1,16], index: 4, kind: input, shape index: {}]   ;;  %s2727_s5 = inlined_call_operand.vmem [shape: f32[2,8,8,16], index: 5, kind: output, shape index: {}]  }
   0x1 LB: > { %s1873_s19 = sadd.s32 4294967295, %s2361_s18   ;;  %p1877_p0 = scmp.ge.s32.totalorder %s2361_s18, 1  ;;  %s2361_s18 = sphi %s2394_s18, %s15_s18  }
   0x2   : > { %p187_p1 = scmp.lt.s32.totalorder %s2361_s18, 3 }
   0x4   : > { %p188_p2 = pnand %p1877_p0, %p187_p1 }
   0x5   : > { %v2306_v0 = vld [vmem:[%s2723_s1 + $0x10] sm:$0xff] (!%p188_p2)   ;;  %p215_p3 = scmp.lt.s32.totalorder (!%p188_p2), %s1873_s19, 1  ;;  %v2307_v1 = vld [vmem:[%s2723_s1 + $0x18] sm:$0xff] (!%p188_p2)   ;;  %v2308_v2 = vld [vmem:[%s2723_s1] sm:$0xff] (!%p188_p2)   ;;  %vm271_vm0 = vcmask (!%p188_p2), 261120   ;;  %vm754_vm1 = vcmask (!%p188_p2), 130048  }
   0x6   : > { %191 = sbr.rel (%p188_p2) target bundleno = 671 (0x29f), region = 40  ;;  %2068 = vmatprep.subr.bf16.mxu0 (!%p188_p2), %v2306_v0  ;;  %v2309_v12 = vld [vmem:[%s2723_s1 + $0x8] sm:$0xff] (!%p188_p2)   ;;  %v2310_v13 = vld [vmem:[%s2723_s1 + $0x20] sm:$0xff] (!%p188_p2)   ;;  %v2312_v29 = vld [vmem:[%s2723_s1 + $0x30] sm:$0xff] (!%p188_p2)   ;;  %vm756_vm2 = vcmask (!%p188_p2), 123904   ;;  %v2363_v42 = vmov (!%p188_p2), 0.0  }
   0x7   : > { %2069 = vmatpush3.bf16.msra.mxu0 (!%p188_p2), %v2306_v0  ;;  %v2311_v26 = vld [vmem:[%s2723_s1 + $0x28] sm:$0xff] (!%p188_p2)   ;;  %v2313_v34 = vld [vmem:[%s2723_s1 + $0x38] sm:$0xff] (!%p188_p2)   ;;  %762 = vst.msk [vmem:[#allocation2 + $0x30] sm:$0xff] (!%p188_p2), %vm754_vm1, %v2363_v42  ;;  %755 = vst.msk [vmem:[#allocation2] sm:$0xff] (!%p188_p2), %vm754_vm1, %v2363_v42 }
   0x8   : > { %2070 = vmatprep.subr.bf16.mxu0 (!%p188_p2), %v2307_v1  ;;  %763 = vst.msk [vmem:[#allocation2 + $0x38] sm:$0x3] (!%p188_p2), %vm756_vm2, %v2363_v42  ;;  %757 = vst.msk [vmem:[#allocation2 + $0x8] sm:$0x3] (!%p188_p2), %vm756_vm2, %v2363_v42  ;;  %v2314_v43 = vld [vmem:[%s2725_s3 + $0x8] sm:$0xff] (!%p188_p2)   ;;  %v2494_v44 = vld [vmem:[%s2725_s3 + $0x10] sm:$0xff] (!%p188_p2)  }
   0x9   : > { %758 = vst.msk [vmem:[#allocation2 + $0x10] sm:$0xff] (!%p188_p2), %vm754_vm1, %v2363_v42  ;;  %760 = vst.msk [vmem:[#allocation2 + $0x20] sm:$0xff] (!%p188_p2), %vm754_vm1, %v2363_v42  ;;  %2206 = vmatprep.subr.bf16.mxu1 (!%p188_p2), %v2494_v44  ;;  %v2501_v45 = vld [vmem:[%s2725_s3 + $0x18] sm:$0xff] (!%p188_p2)   ;;  %v2507_v46 = vld [vmem:[%s2725_s3] sm:$0xff] (!%p188_p2)  }
   0xa   : > { %759 = vst.msk [vmem:[#allocation2 + $0x18] sm:$0x3] (!%p188_p2), %vm756_vm2, %v2363_v42  ;;  %761 = vst.msk [vmem:[#allocation2 + $0x28] sm:$0x3] (!%p188_p2), %vm756_vm2, %v2363_v42  ;;  %2207 = vmatpush3.bf16.msra.mxu1 (!%p188_p2), %v2494_v44  ;;  %v1933_v47 = vld [vmem:[%s2724_s2] ss:$0 sm:$0xff] (!%p188_p2) }
   0xb   : > { %2071 = vmatpush3.bf16.msra.mxu0 (!%p188_p2), %v2307_v1  ;;  %764 = vst.msk [vmem:[#allocation2 + $0x40] sm:$0xff] (!%p188_p2), %vm754_vm1, %v2363_v42  ;;  %766 = vst.msk [vmem:[#allocation2 + $0x50] sm:$0xff] (!%p188_p2), %vm754_vm1, %v2363_v42  ;;  %2146 = vmatprep.subr.bf16.mxu1 (!%p188_p2), %v2501_v45 }
   0xc   : > { %2080 = vmatprep.subr.bf16.mxu0 (!%p188_p2), %v2308_v2  ;;  %765 = vst.msk [vmem:[#allocation2 + $0x48] sm:$0x3] (!%p188_p2), %vm756_vm2, %v2363_v42  ;;  %767 = vst.msk [vmem:[#allocation2 + $0x58] sm:$0x3] (!%p188_p2), %vm756_vm2, %v2363_v42 }
   0xd   : > { %s2729_s19 = smov (!%p215_p3, %s1873_s19), 1  ;;  %768 = vst.msk [vmem:[#allocation2 + $0x60] sm:$0xff] %vm754_vm1, %v2363_v42  ;;  %770 = vst.msk [vmem:[#allocation2 + $0x70] sm:$0xff] %vm754_vm1, %v2363_v42 }
   0xe   : > { %s2296_s24 = smul.u32 144, %s2729_s19  ;;  %769 = vst.msk [vmem:[#allocation2 + $0x68] sm:$0x3] %vm756_vm2, %v2363_v42  ;;  %771 = vst.msk [vmem:[#allocation2 + $0x78] sm:$0x3] %vm756_vm2, %v2363_v42  ;;  %s1998_s14 = sshll.u32 %s2729_s19, 6 }
   0xf   : > { %772 = vst.msk [vmem:[#allocation2 + $0x80] sm:$0xff] %vm754_vm1, %v2363_v42  ;;  %774 = vst.msk [vmem:[#allocation2 + $0x90] sm:$0xff] %vm754_vm1, %v2363_v42  ;;  %s2696_s17 = scalar_lea.vmem %s2727_s5, %s1998_s14 }
  0x10   : > { %s2417_s29 = scalar_lea.vmem %s2722_s0, %s2296_s24  ;;  %773 = vst.msk [vmem:[#allocation2 + $0x88] sm:$0x3] %vm756_vm2, %v2363_v42  ;;  %775 = vst.msk [vmem:[#allocation2 + $0x98] sm:$0x3] %vm756_vm2, %v2363_v42 }
  0x11   : > { %v242_v3 = vld [vmem:[%s2417_s29 + $0x1] sm:$0xff]  ;;  %v243_v4 = vld [vmem:[%s2417_s29 + $0x11] sm:$0xff] }
  0x12   : > { %v244_v5 = vld [vmem:[%s2417_s29 + $0x21] sm:$0xff]  ;;  %v250_v6 = vpack.c.bf16 %v243_v4, %v242_v3  ;;  %v245_v7 = vld [vmem:[%s2417_s29 + $0x31] sm:$0xff] }
  0x13   : > { %v246_v8 = vld [vmem:[%s2417_s29 + $0x41] sm:$0xff]  ;;  %v247_v9 = vld [vmem:[%s2417_s29 + $0x51] sm:$0xff]  ;;  %v251_v10 = vpack.c.bf16 %v245_v7, %v244_v5  ;;  %v561_v37 = vpack.c.bf16 %v244_v5, %v243_v4 }
  0x14   : > { %v252_v11 = vpack.c.bf16 %v247_v9, %v246_v8  ;;  %2072 = vmatprep.mubr.msk.bf16.mxu0 %vm271_vm0, %v250_v6  ;;  %v248_v14 = vld [vmem:[%s2417_s29 + $0x61] sm:$0xff]  ;;  %v249_v15 = vld [vmem:[%s2417_s29 + $0x71] sm:$0xff]  ;;  %v562_v38 = vpack.c.bf16 %v246_v8, %v245_v7 }
  0x15   : > { %2073 = vmatmul.mubr.msk.bf16.vlgmr.msra.gmra.mrb[0].mxu0 %vm271_vm0, %v251_v10  ;;  %v226_v16 = vld [vmem:[%s2417_s29] sm:$0xff]  ;;  %v227_v17 = vld [vmem:[%s2417_s29 + $0x10] sm:$0xff]  ;;  %v253_v18 = vpack.c.bf16 %v249_v15, %v248_v14  ;;  %v563_v39 = vpack.c.bf16 %v248_v14, %v247_v9 }
  0x16   : > { %2081 = vmatpush3.bf16.msra.mxu0 %v2308_v2  ;;  %2076 = vmatprep.mubr.msk.bf16.mxu0 %vm271_vm0, %v252_v11  ;;  %v234_v19 = vpack.c.bf16 %v227_v17, %v226_v16  ;;  %v228_v20 = vld [vmem:[%s2417_s29 + $0x20] sm:$0xff]  ;;  %v229_v21 = vld [vmem:[%s2417_s29 + $0x30] sm:$0xff] }
  0x17   : > { %2082 = vmatprep.subr.bf16.mxu0 %v2309_v12  ;;  %v230_v22 = vld [vmem:[%s2417_s29 + $0x40] sm:$0xff]  ;;  %v231_v23 = vld [vmem:[%s2417_s29 + $0x50] sm:$0xff]  ;;  %v235_v24 = vpack.c.bf16 %v229_v21, %v228_v20  ;;  %v447_v31 = vpack.c.bf16 %v228_v20, %v227_v17 }
  0x18   : > { %v236_v25 = vpack.c.bf16 %v231_v23, %v230_v22  ;;  %v232_v27 = vld [vmem:[%s2417_s29 + $0x60] sm:$0xff]  ;;  %v233_v28 = vld [vmem:[%s2417_s29 + $0x70] sm:$0xff]  ;;  %v448_v32 = vpack.c.bf16 %v230_v22, %v229_v21 }
  0x19   : > { %v237_v30 = vpack.c.bf16 %v233_v28, %v232_v27  ;;  %v449_v33 = vpack.c.bf16 %v232_v27, %v231_v23  ;;  %v1904_v35 = vld [vmem:[%s2417_s29 + $0x80] sm:$0xff] }
  0x1a   : > { %2083 = vmatpush3.bf16.msra.mxu0 %v2309_v12  ;;  %v450_v36 = vpack.c.bf16 %v1904_v35, %v233_v28  ;;  %v1922_v40 = vld [vmem:[%s2417_s29 + $0x81] sm:$0xff] }
  0x1b   : > { %2092 = vmatprep.subr.bf16.mxu0 %v2310_v13  ;;  %v564_v41 = vpack.c.bf16 %v1922_v40, %v249_v15 }
  0x1d   : > { %2077 = vmatmul.mubr.msk.bf16.gmra.mrb[4].mxu0 %vm271_vm0, %v253_v18 }
  0x1e   : > { %2084 = vmatprep.mubr.msk.bf16.mxu0 %vm271_vm0, %v234_v19 }
  0x25   : > { %2085 = vmatmul.mubr.msk.bf16.vlgmr.msra.gmra.mrb[0].mxu0 %vm271_vm0, %v235_v24 }
  0x26   : > { %2093 = vmatpush3.bf16.msra.mxu0 %v2310_v13  ;;  %2088 = vmatprep.mubr.msk.bf16.mxu0 %vm271_vm0, %v236_v25 }
  0x27   : > { %2094 = vmatprep.subr.bf16.mxu0 %v2311_v26 }
  0x2a   : > { %2095 = vmatpush3.bf16.msra.mxu0 %v2311_v26 }
  0x2b   : > { %2104 = vmatprep.subr.bf16.mxu0 %v2312_v29 }
  0x2d   : > { %2089 = vmatmul.mubr.msk.bf16.gmra.mrb[4].mxu0 %vm271_vm0, %v237_v30 }
  0x2e   : > { %2096 = vmatprep.mubr.msk.bf16.mxu0 %vm271_vm0, %v447_v31 }
  0x35   : > { %2097 = vmatmul.mubr.msk.bf16.vlgmr.msra.gmra.mrb[0].mxu0 %vm271_vm0, %v448_v32 }
  0x36   : > { %2105 = vmatpush3.bf16.msra.mxu0 %v2312_v29  ;;  %2100 = vmatprep.mubr.msk.bf16.mxu0 %vm271_vm0, %v449_v33 }
  0x37   : > { %2106 = vmatprep.subr.bf16.mxu0 %v2313_v34 }
  0x3a   : > { %2107 = vmatpush3.bf16.msra.mxu0 %v2313_v34 }
  0x3b   : > { %2116 = vmatprep.subr.bf16.mxu0 %v2314_v43 }
  0x3d   : > { %2101 = vmatmul.mubr.msk.bf16.gmra.mrb[4].mxu0 %vm271_vm0, %v450_v36 }
  0x3e   : > { %2108 = vmatprep.mubr.msk.bf16.mxu0 %vm271_vm0, %v561_v37 }
  0x45   : > { %2109 = vmatmul.mubr.msk.bf16.vlgmr.msra.gmra.mrb[0].mxu0 %vm271_vm0, %v562_v38 }
  0x46   : > { %2112 = vmatprep.mubr.msk.bf16.mxu0 %vm271_vm0, %v563_v39  ;;  %2117 = vmatpush3.bf16.msra.mxu0 %v2314_v43 }
  0x47   : > { %2126 = vmatprep.subr.bf16.mxu0 %v2507_v46 }
  0x4d   : > { %2113 = vmatmul.mubr.msk.bf16.gmra.mrb[4].mxu0 %vm271_vm0, %v564_v41 }
 0x118   : > { %v2110_v48 = vpop.f32.mrb[0].mxu0 }
 0x119   : > { %v676_v49 = vadd.f32 %v2110_v48, %v1933_v47  ;;  %v628_v50 = vpop.f32.mrb[1].mxu0 }
 0x11a   : > { %v2513_v51 = vadd.f32 %v1933_v47, %v628_v50  ;;  %v2111_v52 = vpop.f32.mrb[2].mxu0 }
 0x11b   : > { %v692_v53 = vmul.f32 0.044715, %v676_v49  ;;  %v2515_v54 = vadd.f32 %v2111_v52, %v1933_v47  ;;  %v631_v55 = vpop.f32.mrb[3].mxu0  ;;  %v684_v41 = vmul.f32 0.5, %v676_v49 }
 0x11c   : > { %v690_v56 = vmul.f32 0.044715, %v2513_v51  ;;  %v2518_v57 = vadd.f32 %v1933_v47, %v631_v55  ;;  %v682_v48 = vmul.f32 0.5, %v2513_v51 }
 0x11d   : > { %v700_v58 = vmul.f32 %v692_v53, %v676_v49  ;;  %v693_v59 = vmul.f32 0.044715, %v2515_v54  ;;  %v685_v55 = vmul.f32 0.5, %v2515_v54 }
 0x11e   : > { %v698_v60 = vmul.f32 %v690_v56, %v2513_v51  ;;  %v691_v61 = vmul.f32 0.044715, %v2518_v57 }
 0x11f   : > { %v708_v62 = vmul.f32 %v700_v58, %v676_v49  ;;  %v701_v63 = vmul.f32 %v693_v59, %v2515_v54  ;;  %v683_v59 = vmul.f32 0.5, %v2518_v57 }
 0x120   : > { %v706_v0 = vmul.f32 %v698_v60, %v2513_v51  ;;  %v699_v1 = vmul.f32 %v691_v61, %v2518_v57  ;;  %v2114_v2 = vpop.f32.mrb[4].mxu0 }
 0x121   : > { %v716_v3 = vadd.f32 %v708_v62, %v676_v49  ;;  %v709_v4 = vmul.f32 %v701_v63, %v2515_v54  ;;  %v2527_v5 = vadd.f32 %v2114_v2, %v1933_v47  ;;  %v644_v6 = vpop.f32.mrb[5].mxu0 }
 0x122   : > { %v714_v7 = vadd.f32 %v706_v0, %v2513_v51  ;;  %v707_v8 = vmul.f32 %v699_v1, %v2518_v57  ;;  %v678_v9 = vadd.f32 %v1933_v47, %v644_v6  ;;  %v2115_v10 = vpop.f32.mrb[6].mxu0 }
 0x123   : > { %v724_v11 = vmul.f32 0.7978846, %v716_v3  ;;  %v717_v12 = vadd.f32 %v709_v4, %v2515_v54  ;;  %v696_v13 = vmul.f32 0.044715, %v2527_v5  ;;  %v647_v14 = vpop.f32.mrb[7].mxu0  ;;  %v681_v20 = vadd.f32 %v2115_v10, %v1933_v47 }
 0x124   : > { %v722_v15 = vmul.f32 0.7978846, %v714_v7  ;;  %v715_v16 = vadd.f32 %v707_v8, %v2518_v57  ;;  %v694_v17 = vmul.f32 0.044715, %v678_v9  ;;  %v679_v23 = vadd.f32 %v1933_v47, %v647_v14  ;;  %v799_v57 = vld [vmem:[#allocation2 + $0x1] sm:$0xff] }
 0x125   : > { %2323 = vtanh.f32 %v724_v11  ;;  %v725_v18 = vmul.f32 0.7978846, %v717_v12  ;;  %v704_v19 = vmul.f32 %v696_v13, %v2527_v5  ;;  %v697_v25 = vmul.f32 0.044715, %v681_v20 }
 0x126   : > { %2325 = vtanh.f32 %v722_v15  ;;  %v723_v21 = vmul.f32 0.7978846, %v715_v16  ;;  %v702_v22 = vmul.f32 %v694_v17, %v678_v9  ;;  %v695_v27 = vmul.f32 0.044715, %v679_v23 }
 0x127   : > { %2327 = vtanh.f32 %v725_v18  ;;  %v712_v24 = vmul.f32 %v704_v19, %v2527_v5  ;;  %v705_v29 = vmul.f32 %v697_v25, %v681_v20  ;;  %v688_v54 = vmul.f32 0.5, %v2527_v5 }
 0x128   : > { %2329 = vtanh.f32 %v723_v21  ;;  %v710_v26 = vmul.f32 %v702_v22, %v678_v9  ;;  %v703_v31 = vmul.f32 %v695_v27, %v679_v23  ;;  %v686_v0 = vmul.f32 0.5, %v678_v9 }
 0x129   : > { %v720_v28 = vadd.f32 %v712_v24, %v2527_v5  ;;  %v713_v33 = vmul.f32 %v705_v29, %v681_v20  ;;  %v689_v7 = vmul.f32 0.5, %v681_v20  ;;  %v687_v11 = vmul.f32 0.5, %v679_v23 }
 0x12a   : > { %v718_v30 = vadd.f32 %v710_v26, %v678_v9  ;;  %v711_v35 = vmul.f32 %v703_v31, %v679_v23  ;;  %v2318_v31 = vld [vmem:[%s2725_s3 + $0x20] sm:$0xff]  }
 0x12b   : > { %v728_v32 = vmul.f32 0.7978846, %v720_v28  ;;  %v721_v36 = vadd.f32 %v713_v33, %v681_v20 }
 0x12c   : > { %v726_v34 = vmul.f32 0.7978846, %v718_v30  ;;  %v719_v37 = vadd.f32 %v711_v35, %v679_v23  ;;  %v785_v23 = vld [vmem:[#allocation2] sm:$0xff] }
 0x12d   : > { %2331 = vtanh.f32 %v728_v32  ;;  %v729_v39 = vmul.f32 0.7978846, %v721_v36 }
 0x12e   : > { %2333 = vtanh.f32 %v726_v34  ;;  %v727_v43 = vmul.f32 0.7978846, %v719_v37 }
 0x12f   : > { %v2324_v38 = vpop.eup %2323  ;;  %2335 = vtanh.f32 %v729_v39 }
 0x130   : > { %v2326_v40 = vpop.eup %2325  ;;  %v740_v42 = vadd.f32 1.0, %v2324_v38  ;;  %2337 = vtanh.f32 %v727_v43  ;;  %v980_v43 = vld [vmem:[#allocation2 + $0x2] sm:$0xff] }
 0x131   : > { %v2328_v47 = vpop.eup %2327  ;;  %v738_v50 = vadd.f32 1.0, %v2326_v40 }
 0x132   : > { %v2330_v52 = vpop.eup %2329  ;;  %v748_v53 = vmul.f32 %v740_v42, %v684_v41  ;;  %v741_v56 = vadd.f32 1.0, %v2328_v47  ;;  %v2319_v42 = vld [vmem:[%s2725_s3 + $0x28] sm:$0xff]  }
 0x133   : > { %v746_v58 = vmul.f32 %v738_v50, %v682_v48  ;;  %v739_v60 = vadd.f32 1.0, %v2330_v52 }
 0x134   : > { %779 = vst.msk [vmem:[#allocation2 + $0x31] sm:$0xff] %vm754_vm1, %v748_v53  ;;  %v749_v49 = vmul.f32 %v741_v56, %v685_v55 }
 0x135   : > { %777 = vst.msk [vmem:[#allocation2 + $0x11] sm:$0xff] %vm754_vm1, %v746_v58  ;;  %v747_v61 = vmul.f32 %v739_v60, %v683_v59  ;;  %v2320_v60 = vld [vmem:[%s2725_s3 + $0x30] sm:$0xff]  }
 0x136   : > { %780 = vst.msk [vmem:[#allocation2 + $0x41] sm:$0xff] %vm754_vm1, %v749_v49 }
 0x137   : > { %v2332_v51 = vpop.eup %2331  ;;  %778 = vst.msk [vmem:[#allocation2 + $0x21] sm:$0xff] %vm754_vm1, %v747_v61 }
 0x138   : > { %v2334_v62 = vpop.eup %2333  ;;  %v744_v63 = vadd.f32 1.0, %v2332_v51 }
 0x139   : > { %v742_v1 = vadd.f32 1.0, %v2334_v62  ;;  %v2336_v3 = vpop.eup %2335 }
 0x13a   : > { %v752_v2 = vmul.f32 %v744_v63, %v688_v54  ;;  %v2338_v6 = vpop.eup %2337  ;;  %v745_v8 = vadd.f32 1.0, %v2336_v3  ;;  %v2321_v63 = vld [vmem:[%s2725_s3 + $0x38] sm:$0xff]   ;;  %v1412_v3 = vld [vmem:[#allocation2 + $0x90] sm:$0xff] }
 0x13b   : > { %v750_v4 = vmul.f32 %v742_v1, %v686_v0  ;;  %v743_v12 = vadd.f32 1.0, %v2338_v6  ;;  %v2552_v14 = vld [vmem:[#allocation2 + $0x31] sm:$0xff] }
 0x13c   : > { %783 = vst.msk [vmem:[#allocation2 + $0x71] sm:$0xff] %vm754_vm1, %v752_v2  ;;  %v2546_v10 = vld [vmem:[#allocation2 + $0x11] sm:$0xff]  ;;  %v753_v13 = vmul.f32 %v745_v8, %v689_v7 }
 0x13d   : > { %781 = vst.msk [vmem:[#allocation2 + $0x51] sm:$0xff] %vm754_vm1, %v750_v4  ;;  %v807_v5 = vpack.c.bf16 %v2546_v10, %v799_v57  ;;  %v751_v15 = vmul.f32 %v743_v12, %v687_v11  ;;  %v2564_v17 = vld [vmem:[#allocation2 + $0x41] sm:$0xff]  ;;  %v786_v24 = vld [vmem:[#allocation2 + $0x10] sm:$0xff] }
 0x13e   : > { %v2550_v9 = vld [vmem:[#allocation2 + $0x21] sm:$0xff]  ;;  %784 = vst.msk [vmem:[#allocation2 + $0x81] sm:$0xff] %vm754_vm1, %v753_v13  ;;  %v793_v32 = vpack.c.bf16 %v786_v24, %v785_v23  ;;  %v788_v37 = vld [vmem:[#allocation2 + $0x30] sm:$0xff]  ;;  %v1201_v59 = vpack.c.bf16 %v2564_v17, %v2552_v14 }
 0x13f   : > { %2118 = vmatprep.mubr.msk.bf16.mxu0 %vm754_vm1, %v807_v5  ;;  %v2557_v16 = vpack.c.bf16 %v2552_v14, %v2550_v9  ;;  %782 = vst.msk [vmem:[#allocation2 + $0x61] sm:$0xff] %vm754_vm1, %v751_v15  ;;  %v2567_v19 = vld [vmem:[#allocation2 + $0x42] sm:$0xff]  ;;  %v981_v47 = vld [vmem:[#allocation2 + $0x12] sm:$0xff]  ;;  %v1200_v55 = vpack.c.bf16 %v2550_v9, %v2546_v10 }
 0x140   : > { %v1087_v25 = vld [vmem:[#allocation2 + $0x20] sm:$0xff]  ;;  %v988_v53 = vpack.c.bf16 %v981_v47, %v980_v43  ;;  %v983_v56 = vld [vmem:[#allocation2 + $0x32] sm:$0xff] }
 0x141   : > { %2119 = vmatmul.mubr.msk.bf16.vlgmr.msra.gmra.mrb[8].mxu0 %vm754_vm1, %v2557_v16  ;;  %v1094_v33 = vpack.c.bf16 %v1087_v25, %v786_v24  ;;  %v1089_v34 = vld [vmem:[#allocation2 + $0x40] sm:$0xff]  ;;  %v794_v38 = vpack.c.bf16 %v788_v37, %v1087_v25  ;;  %v1307_v54 = vpack.c.bf16 %v2567_v19, %v983_v56  ;;  %v1518_v6 = vld [vmem:[#allocation2 + $0x91] sm:$0xff] }
 0x142   : > { %2127 = vmatpush3.bf16.msra.mxu0 %v2507_v46  ;;  %v1095_v39 = vpack.c.bf16 %v1089_v34, %v788_v37  ;;  %v2322_v57 = vld [vmem:[%s2725_s3 + $0x40] sm:$0xff]   ;;  %v1624_v8 = vld [vmem:[#allocation2 + $0x92] sm:$0xff] }
 0x143   : > { %2136 = vmatprep.subr.bf16.mxu0 %v2494_v44  ;;  %v806_v46 = vld [vmem:[#allocation2 + $0x71] sm:$0xff] }
 0x144   : > { %v804_v18 = vld [vmem:[#allocation2 + $0x51] sm:$0xff] }
 0x145   : > { %v2569_v20 = vld [vmem:[#allocation2 + $0x52] sm:$0xff]  ;;  %v2572_v21 = vpack.c.bf16 %v804_v18, %v2564_v17  ;;  %v1199_v61 = vld [vmem:[#allocation2 + $0x81] sm:$0xff] }
 0x146   : > { %v2576_v22 = vpack.c.bf16 %v2569_v20, %v2567_v19  ;;  %v805_v26 = vld [vmem:[#allocation2 + $0x61] sm:$0xff]  ;;  %v2582_v28 = vld [vmem:[#allocation2 + $0x72] sm:$0xff]  ;;  %v1203_v51 = vpack.c.bf16 %v1199_v61, %v806_v46  ;;  %v1522_v7 = vpack.c.bf16 %v1518_v6, %v1199_v61 }
 0x147   : > { %2122 = vmatprep.mubr.msk.bf16.mxu0 %vm754_vm1, %v2572_v21  ;;  %v986_v27 = vld [vmem:[#allocation2 + $0x62] sm:$0xff]  ;;  %v2584_v29 = vpack.c.bf16 %v806_v46, %v805_v26  ;;  %v790_v35 = vld [vmem:[#allocation2 + $0x50] sm:$0xff]  ;;  %v1202_v49 = vpack.c.bf16 %v805_v26, %v804_v18  ;;  %v1995_v18 = vld [vmem:[%s2726_s4] ss:$0 sm:$0xff] }
 0x148   : > { %2142 = vmatprep.mubr.msk.bf16.mxu1 %vm754_vm1, %v2576_v22  ;;  %v2587_v30 = vpack.c.bf16 %v2582_v28, %v986_v27  ;;  %v1091_v36 = vld [vmem:[#allocation2 + $0x60] sm:$0xff]  ;;  %v795_v40 = vpack.c.bf16 %v790_v35, %v1089_v34  ;;  %v792_v48 = vld [vmem:[#allocation2 + $0x70] sm:$0xff]  ;;  %v1308_v0 = vpack.c.bf16 %v986_v27, %v2569_v20 }
 0x149   : > { %2123 = vmatmul.mubr.msk.bf16.gmra.mrb[12].mxu0 %vm754_vm1, %v2584_v29  ;;  %v1096_v41 = vpack.c.bf16 %v1091_v36, %v790_v35  ;;  %v796_v50 = vpack.c.bf16 %v792_v48, %v1091_v36  ;;  %v1305_v1 = vld [vmem:[#allocation2 + $0x82] sm:$0xff] }
 0x14a   : > { %2143 = vmatmul.mubr.msk.bf16.vlgmr.msra.gmra.mrb[0].mxu1 %vm754_vm1, %v2587_v30  ;;  %2128 = vmatprep.mubr.msk.bf16.mxu0 %vm754_vm1, %v793_v32  ;;  %v1309_v2 = vpack.c.bf16 %v1305_v1, %v2582_v28  ;;  %v1628_v10 = vpack.c.bf16 %v1624_v8, %v1305_v1 }
 0x14b   : > { %2147 = vmatpush3.bf16.msra.mxu1 %v2501_v45  ;;  %2148 = vmatprep.mubr.msk.bf16.mxu1 %vm754_vm1, %v1094_v33  ;;  %v1093_v45 = vld [vmem:[#allocation2 + $0x80] sm:$0xff] }
 0x14c   : > { %2156 = vmatprep.subr.bf16.mxu1 %v2318_v31  ;;  %v1097_v52 = vpack.c.bf16 %v1093_v45, %v792_v48  ;;  %v1416_v4 = vpack.c.bf16 %v1412_v3, %v1093_v45 }
 0x151   : > { %2129 = vmatmul.mubr.msk.bf16.vlgmr.msra.gmra.mrb[8].mxu0 %vm754_vm1, %v794_v38 }
 0x152   : > { %2149 = vmatmul.mubr.msk.bf16.vlgmr.msra.gmra.mrb[4].mxu1 %vm754_vm1, %v1095_v39  ;;  %2132 = vmatprep.mubr.msk.bf16.mxu0 %vm754_vm1, %v795_v40 }
 0x153   : > { %2152 = vmatprep.mubr.msk.bf16.mxu1 %vm754_vm1, %v1096_v41  ;;  %2157 = vmatpush3.bf16.msra.mxu1 %v2318_v31 }
 0x154   : > { %2137 = vmatpush3.bf16.msra.mxu0 %v2494_v44  ;;  %2166 = vmatprep.subr.bf16.mxu1 %v2319_v42  ;;  %v982_v44 = vld [vmem:[#allocation2 + $0x22] sm:$0xff] }
 0x155   : > { %v989_v58 = vpack.c.bf16 %v983_v56, %v982_v44  ;;  %v1306_v62 = vpack.c.bf16 %v982_v44, %v981_v47 }
 0x159   : > { %2133 = vmatmul.mubr.msk.bf16.gmra.mrb[12].mxu0 %vm754_vm1, %v796_v50 }
 0x15a   : > { %2153 = vmatmul.mubr.msk.bf16.gmra.mrb[0].mxu1 %vm754_vm1, %v1097_v52  ;;  %2138 = vmatprep.mubr.msk.bf16.mxu0 %vm754_vm1, %v988_v53 }
 0x15b   : > { %2158 = vmatprep.mubr.msk.bf16.mxu1 %vm754_vm1, %v1200_v55 }
 0x161   : > { %2139 = vmatmul.mubr.msk.bf16.vlgmr.msra.gmra.mrb[8].mxu0 %vm754_vm1, %v989_v58 }
 0x162   : > { %2159 = vmatmul.mubr.msk.bf16.vlgmr.msra.gmra.mrb[4].mxu1 %vm754_vm1, %v1201_v59 }
 0x163   : > { %2162 = vmatprep.mubr.msk.bf16.mxu1 %vm754_vm1, %v1202_v49  ;;  %2167 = vmatpush3.bf16.msra.mxu1 %v2319_v42 }
 0x164   : > { %2176 = vmatprep.subr.bf16.mxu1 %v2320_v60 }
 0x16a   : > { %2163 = vmatmul.mubr.msk.bf16.gmra.mrb[0].mxu1 %vm754_vm1, %v1203_v51 }
 0x16b   : > { %2168 = vmatprep.mubr.msk.bf16.mxu1 %vm754_vm1, %v1306_v62 }
 0x172   : > { %2169 = vmatmul.mubr.msk.bf16.vlgmr.msra.gmra.mrb[4].mxu1 %vm754_vm1, %v1307_v54 }
 0x173   : > { %2172 = vmatprep.mubr.msk.bf16.mxu1 %vm754_vm1, %v1308_v0  ;;  %2177 = vmatpush3.bf16.msra.mxu1 %v2320_v60 }
 0x174   : > { %2186 = vmatprep.subr.bf16.mxu1 %v2321_v63 }
 0x17a   : > { %2173 = vmatmul.mubr.msk.bf16.gmra.mrb[0].mxu1 %vm754_vm1, %v1309_v2 }
 0x17b   : > { %2178 = vmatprep.mubr.msk.bf16.mxu1 %vm754_vm1, %v794_v38 }
 0x182   : > { %2179 = vmatmul.mubr.msk.bf16.vlgmr.msra.gmra.mrb[4].mxu1 %vm754_vm1, %v795_v40 }
 0x183   : > { %2182 = vmatprep.mubr.msk.bf16.mxu1 %vm754_vm1, %v796_v50  ;;  %2187 = vmatpush3.bf16.msra.mxu1 %v2321_v63 }
 0x184   : > { %2196 = vmatprep.subr.bf16.mxu1 %v2322_v57 }
 0x18a   : > { %2183 = vmatmul.mubr.msk.bf16.gmra.mrb[0].mxu1 %vm754_vm1, %v1416_v4 }
 0x18b   : > { %2188 = vmatprep.mubr.msk.bf16.mxu1 %vm754_vm1, %v2557_v16 }
 0x192   : > { %2189 = vmatmul.mubr.msk.bf16.vlgmr.msra.gmra.mrb[4].mxu1 %vm754_vm1, %v2572_v21 }
 0x193   : > { %2192 = vmatprep.mubr.msk.bf16.mxu1 %vm754_vm1, %v2584_v29  ;;  %2197 = vmatpush3.bf16.msra.mxu1 %v2322_v57 }
 0x19a   : > { %2193 = vmatmul.mubr.msk.bf16.gmra.mrb[0].mxu1 %vm754_vm1, %v1522_v7 }
 0x19b   : > { %2198 = vmatprep.mubr.msk.bf16.mxu1 %vm754_vm1, %v989_v58 }
 0x1a2   : > { %2199 = vmatmul.mubr.msk.bf16.vlgmr.msra.gmra.mrb[4].mxu1 %vm754_vm1, %v2576_v22 }
 0x1a3   : > { %2202 = vmatprep.mubr.msk.bf16.mxu1 %vm754_vm1, %v2587_v30 }
 0x1aa   : > { %2203 = vmatmul.mubr.msk.bf16.gmra.mrb[0].mxu1 %vm754_vm1, %v1628_v10 }
 0x22c   : > { %v2134_v11 = vpop.f32.mrb[12].mxu0 }
 0x22d   : > { %v965_v12 = vpop.f32.mrb[13].mxu0 }
 0x22e   : > { %v2135_v5 = vpop.f32.mrb[14].mxu0 }
 0x22f   : > { %v968_v13 = vpop.f32.mrb[15].mxu0 }
 0x234   : > { %v2140_v9 = vpop.f32.mrb[8].mxu0 }
 0x235   : > { %v1047_v14 = vpop.f32.mrb[9].mxu0 }
 0x236   : > { %v2141_v15 = vpop.f32.mrb[10].mxu0 }
 0x237   : > { %v1050_v16 = vpop.f32.mrb[11].mxu0 }
 0x275   : > { %v2200_v17 = vpop.f32.mrb[4].mxu1 }
 0x276   : > { %v2208_v19 = vadd.f32 %v2200_v17, %v2140_v9  ;;  %v1684_v20 = vpop.f32.mrb[5].mxu1 }
 0x277   : > { %v2209_v21 = vadd.f32 %v1684_v20, %v1047_v14  ;;  %v2201_v22 = vpop.f32.mrb[6].mxu1 }
 0x278   : > { %v2655_v23 = vadd.f32 %v2208_v19, %v1995_v18  ;;  %v2210_v46 = vadd.f32 %v2201_v22, %v2141_v15  ;;  %v1687_v24 = vpop.f32.mrb[7].mxu1 }
 0x279   : > { %v2657_v25 = vadd.f32 %v2209_v21, %v1995_v18  ;;  %v2211_v26 = vadd.f32 %v1687_v24, %v1050_v16 }
 0x27a   : > { %v1748_v27 = vmul.f32 0.044715, %v2655_v23  ;;  %v2660_v28 = vadd.f32 %v2210_v46, %v1995_v18  ;;  %v1740_v19 = vmul.f32 0.5, %v2655_v23 }
 0x27b   : > { %v1746_v29 = vmul.f32 0.044715, %v2657_v25  ;;  %v2663_v30 = vadd.f32 %v2211_v26, %v1995_v18  ;;  %v1738_v46 = vmul.f32 0.5, %v2657_v25 }
 0x27c   : > { %v1756_v31 = vmul.f32 %v1748_v27, %v2655_v23  ;;  %v1749_v32 = vmul.f32 0.044715, %v2660_v28 }
 0x27d   : > { %v1754_v33 = vmul.f32 %v1746_v29, %v2657_v25  ;;  %v1747_v34 = vmul.f32 0.044715, %v2663_v30  ;;  %v2204_v35 = vpop.f32.mrb[0].mxu1 }
 0x27e   : > { %v1764_v36 = vmul.f32 %v1756_v31, %v2655_v23  ;;  %v1757_v37 = vmul.f32 %v1749_v32, %v2660_v28  ;;  %v2212_v38 = vadd.f32 %v2204_v35, %v2134_v11  ;;  %v1700_v39 = vpop.f32.mrb[1].mxu1  ;;  %v1739_v32 = vmul.f32 0.5, %v2663_v30 }
 0x27f   : > { %v1762_v40 = vmul.f32 %v1754_v33, %v2657_v25  ;;  %v1755_v41 = vmul.f32 %v1747_v34, %v2663_v30  ;;  %v2213_v42 = vadd.f32 %v1700_v39, %v965_v12  ;;  %v2205_v45 = vpop.f32.mrb[2].mxu1 }
 0x280   : > { %v1772_v43 = vadd.f32 %v1764_v36, %v2655_v23  ;;  %v1765_v47 = vmul.f32 %v1757_v37, %v2660_v28  ;;  %v2675_v48 = vadd.f32 %v2212_v38, %v1995_v18  ;;  %v2214_v50 = vadd.f32 %v2205_v45, %v2135_v5  ;;  %v1703_v52 = vpop.f32.mrb[3].mxu1 }
 0x281   : > { %v1770_v53 = vadd.f32 %v1762_v40, %v2657_v25  ;;  %v1763_v55 = vmul.f32 %v1755_v41, %v2663_v30  ;;  %v2679_v44 = vadd.f32 %v2213_v42, %v1995_v18  ;;  %v2215_v56 = vadd.f32 %v1703_v52, %v968_v13 }
 0x282   : > { %v1780_v58 = vmul.f32 0.7978846, %v1772_v43  ;;  %v1773_v59 = vadd.f32 %v1765_v47, %v2660_v28  ;;  %v1752_v60 = vmul.f32 0.044715, %v2675_v48  ;;  %v1737_v63 = vadd.f32 %v2214_v50, %v1995_v18 }
 0x283   : > { %v1778_v49 = vmul.f32 0.7978846, %v1770_v53  ;;  %v1771_v61 = vadd.f32 %v1763_v55, %v2663_v30  ;;  %v1750_v51 = vmul.f32 0.044715, %v2679_v44  ;;  %v1735_v2 = vadd.f32 %v2215_v56, %v1995_v18 }
 0x284   : > { %2339 = vtanh.f32 %v1780_v58  ;;  %v1781_v62 = vmul.f32 0.7978846, %v1773_v59  ;;  %v1760_v54 = vmul.f32 %v1752_v60, %v2675_v48  ;;  %v1753_v3 = vmul.f32 0.044715, %v1737_v63 }
 0x285   : > { %2341 = vtanh.f32 %v1778_v49  ;;  %v1779_v0 = vmul.f32 0.7978846, %v1771_v61  ;;  %v1758_v1 = vmul.f32 %v1750_v51, %v2679_v44  ;;  %v1751_v6 = vmul.f32 0.044715, %v1735_v2 }
 0x286   : > { %2343 = vtanh.f32 %v1781_v62  ;;  %v1768_v57 = vmul.f32 %v1760_v54, %v2675_v48  ;;  %v1761_v8 = vmul.f32 %v1753_v3, %v1737_v63  ;;  %v1741_v23 = vmul.f32 0.5, %v2660_v28 }
 0x287   : > { %2345 = vtanh.f32 %v1779_v0  ;;  %v1766_v4 = vmul.f32 %v1758_v1, %v2679_v44  ;;  %v1759_v11 = vmul.f32 %v1751_v6, %v1735_v2  ;;  %v1744_v36 = vmul.f32 0.5, %v2675_v48 }
 0x288   : > { %v1776_v7 = vadd.f32 %v1768_v57, %v2675_v48  ;;  %v1769_v5 = vmul.f32 %v1761_v8, %v1737_v63  ;;  %v1742_v30 = vmul.f32 0.5, %v2679_v44  ;;  %v1745_v45 = vmul.f32 0.5, %v1737_v63 }
 0x289   : > { %v1774_v10 = vadd.f32 %v1766_v4, %v2679_v44  ;;  %v1767_v9 = vmul.f32 %v1759_v11, %v1735_v2  ;;  %v1743_v47 = vmul.f32 0.5, %v1735_v2 }
 0x28a   : > { %v1784_v12 = vmul.f32 0.7978846, %v1776_v7  ;;  %v1777_v14 = vadd.f32 %v1769_v5, %v1737_v63 }
 0x28b   : > { %v1782_v13 = vmul.f32 0.7978846, %v1774_v10  ;;  %v1775_v15 = vadd.f32 %v1767_v9, %v1735_v2 }
 0x28c   : > { %2347 = vtanh.f32 %v1784_v12  ;;  %v1785_v17 = vmul.f32 0.7978846, %v1777_v14 }
 0x28d   : > { %2349 = vtanh.f32 %v1782_v13  ;;  %v1783_v21 = vmul.f32 0.7978846, %v1775_v15 }
 0x28e   : > { %v2340_v16 = vpop.eup %2339  ;;  %2351 = vtanh.f32 %v1785_v17 }
 0x28f   : > { %v2342_v18 = vpop.eup %2341  ;;  %v1796_v20 = vadd.f32 1.0, %v2340_v16  ;;  %2353 = vtanh.f32 %v1783_v21 }
 0x290   : > { %v2344_v22 = vpop.eup %2343  ;;  %v1794_v24 = vadd.f32 1.0, %v2342_v18 }
 0x291   : > { %v2346_v26 = vpop.eup %2345  ;;  %v1804_v27 = vmul.f32 %v1796_v20, %v1740_v19  ;;  %v1797_v29 = vadd.f32 1.0, %v2344_v22 }
 0x292   : > { %v1802_v31 = vmul.f32 %v1794_v24, %v1738_v46  ;;  %v1795_v33 = vadd.f32 1.0, %v2346_v26 }
 0x293   : > { %1812 = vst.msk [vmem:[%s2696_s17 + $0x10] sm:$0xff] %vm754_vm1, %v1804_v27  ;;  %v1805_v34 = vmul.f32 %v1797_v29, %v1741_v23 }
 0x294   : > { %1810 = vst.msk [vmem:[%s2696_s17] sm:$0xff] %vm754_vm1, %v1802_v31  ;;  %v1803_v25 = vmul.f32 %v1795_v33, %v1739_v32 }
 0x295   : > { %1813 = vst.msk [vmem:[%s2696_s17 + $0x18] sm:$0xff] %vm754_vm1, %v1805_v34 }
 0x296   : > { %v2348_v35 = vpop.eup %2347  ;;  %1811 = vst.msk [vmem:[%s2696_s17 + $0x8] sm:$0xff] %vm754_vm1, %v1803_v25 }
 0x297   : > { %v2350_v28 = vpop.eup %2349  ;;  %v1800_v37 = vadd.f32 1.0, %v2348_v35 }
 0x298   : > { %v1798_v38 = vadd.f32 1.0, %v2350_v28  ;;  %v2352_v40 = vpop.eup %2351 }
 0x299   : > { %v1808_v39 = vmul.f32 %v1800_v37, %v1744_v36  ;;  %v2354_v42 = vpop.eup %2353  ;;  %v1801_v43 = vadd.f32 1.0, %v2352_v40 }
 0x29a   : > { %v1806_v41 = vmul.f32 %v1798_v38, %v1742_v30  ;;  %v1799_v50 = vadd.f32 1.0, %v2354_v42 }
 0x29b   : > { %1816 = vst.msk [vmem:[%s2696_s17 + $0x30] sm:$0xff] %vm754_vm1, %v1808_v39  ;;  %v1809_v52 = vmul.f32 %v1801_v43, %v1745_v45 }
 0x29c   : > { %1814 = vst.msk [vmem:[%s2696_s17 + $0x20] sm:$0xff] %vm754_vm1, %v1806_v41  ;;  %v1807_v48 = vmul.f32 %v1799_v50, %v1743_v47 }
 0x29d   : > { %1817 = vst.msk [vmem:[%s2696_s17 + $0x38] sm:$0xff] %vm754_vm1, %v1809_v52 }
 0x29e   : > { %1815 = vst.msk [vmem:[%s2696_s17 + $0x28] sm:$0xff] %vm754_vm1, %v1807_v48 }
 0x29f PF: > { %s15_s18 = sadd.s32 1, %s2361_s18  }
 0x2a0   : > { %p12_p4 = scmp.ge.s32.totalorder %s15_s18, 4  }
 0x2a2   :  { %14 = sbr.rel (!%p12_p4) target bundleno = 1 (0x1), region = 84 }

// kernel: encoder_forward.3
= control target key start
LH: loop header
LB: loop body
LE: loop exit
PB: predicated region body
PF: predicated region fallthrough
CT: control target
= control target key end

     0   :  { %s6292_s18 = smov 0   ;;  %s7720_s0 = inlined_call_operand.vmem [shape: f32[2,17,17,12], index: 0, kind: input, shape index: {}]   ;;  %s7721_s1 = inlined_call_operand.vmem [shape: bf16[4,12,8], index: 1, kind: input, shape index: {}]   ;;  %s7722_s2 = inlined_call_operand.vmem [shape: f32[1,8], index: 2, kind: input, shape index: {}]   ;;  %s7723_s3 = inlined_call_operand.vmem [shape: bf16[9,8,8], index: 3, kind: input, shape index: {}]   ;;  %s7724_s4 = inlined_call_operand.vmem [shape: f32[1,8], index: 4, kind: input, shape index: {}]   ;;  %s7725_s5 = inlined_call_operand.vmem [shape: f32[2,16,16,8], index: 5, kind: output, shape index: {}]  }
   0x1 LB: > { %s4777_s19 = sadd.s32 4294967295, %s6259_s18   ;;  %p4781_p0 = scmp.ge.s32.totalorder %s6259_s18, 1  ;;  %s6259_s18 = sphi %s6292_s18, %s15_s18  }
   0x2   : > { %p187_p1 = scmp.lt.s32.totalorder %s6259_s18, 3 }
   0x4   : > { %p188_p2 = pnand %p4781_p0, %p187_p1 }
   0x5   : > { %v6121_v0 = vld [vmem:[%s7721_s1 + $0x8] sm:$0x3f] (!%p188_p2)   ;;  %vm381_vm0 = vcmask (!%p188_p2), 1045504   ;;  %p215_p3 = scmp.lt.s32.totalorder (!%p188_p2), %s4777_s19, 1  ;;  %v6122_v2 = vld [vmem:[%s7721_s1] sm:$0x3f] (!%p188_p2)  }
   0x6   : > { %191 = sbr.rel (%p188_p2) target bundleno = 1184 (0x4a0), region = 40  ;;  %6097 = vmatprep.subr.msk.bf16.mxu0 (!%p188_p2), %vm381_vm0, %v6121_v0  ;;  %v383_v1 = vsel (!%p188_p2), %vm381_vm0, %v6121_v0, 0  ;;  %vm332_vm1 = vcmask (!%p188_p2), 97280   ;;  %v600_v11 = vsel (!%p188_p2), %vm381_vm0, %v6122_v2, 0  ;;  %v6331_v13 = vld [vmem:[%s7721_s1 + $0x10] sm:$0x3f] (!%p188_p2)  }
   0x7   : > { %5302 = vmatpush3.bf16.msra.mxu0 (!%p188_p2), %v383_v1  ;;  %v869_v62 = vsel (!%p188_p2), %vm381_vm0, %v6331_v13, 0  ;;  %v6124_v63 = vld [vmem:[%s7721_s1 + $0x18] sm:$0x3f] (!%p188_p2)   ;;  %vm1691_vm2 = vcmask (!%p188_p2), 64512   ;;  %vm1694_vm3 = vcmask (!%p188_p2), 58368   ;;  %vm1927_vm4 = vcmask (!%p188_p2), 1043456  }
   0x8   : > { %6098 = vmatprep.subr.msk.bf16.mxu0 (!%p188_p2), %vm381_vm0, %v6122_v2 }
   0xd   : > { %s7727_s19 = smov (!%p215_p3, %s4777_s19), 1 }
   0xe   : > { %s6111_s24 = smul.u32 408, %s7727_s19  ;;  %s5079_s6 = sshll.u32 %s7727_s19, 8 }
   0xf   : > { %s7432_s8 = scalar_lea.vmem %s7725_s5, %s5079_s6 }
  0x10   : > { %s6315_s27 = scalar_lea.vmem %s7720_s0, %s6111_s24 }
  0x11   : > { %v276_v3 = vld [vmem:[%s6315_s27 + $0x1] sm:$0xff]  ;;  %v277_v4 = vld [vmem:[%s6315_s27 + $0x9] sm:$0xff]  ;;  %v278_v5 = vld [vmem:[%s6315_s27 + $0x19] sm:$0xff] }
  0x12   : > { %v308_v6 = vpack.c.bf16 %v277_v4, %v276_v3  ;;  %v279_v7 = vld [vmem:[%s6315_s27 + $0x21] sm:$0xff]  ;;  %v280_v8 = vld [vmem:[%s6315_s27 + $0x31] sm:$0xff]  ;;  %v281_v9 = vld [vmem:[%s6315_s27 + $0x39] sm:$0xff] }
  0x13   : > { %v6323_v10 = vpack.c.bf16 %v279_v7, %v278_v5  ;;  %v6326_v12 = vpack.c.bf16 %v281_v9, %v280_v8  ;;  %v282_v14 = vld [vmem:[%s6315_s27 + $0x49] sm:$0xff]  ;;  %v283_v15 = vld [vmem:[%s6315_s27 + $0x51] sm:$0xff]  ;;  %v284_v16 = vld [vmem:[%s6315_s27 + $0x61] sm:$0xff] }
  0x14   : > { %5303 = vmatprep.mubr.msk.bf16.mxu0 %vm332_vm1, %v308_v6  ;;  %v285_v17 = vld [vmem:[%s6315_s27 + $0x69] sm:$0xff]  ;;  %v6344_v18 = vpack.c.bf16 %v283_v15, %v282_v14  ;;  %v286_v20 = vld [vmem:[%s6315_s27 + $0x79] sm:$0xff]  ;;  %v287_v21 = vld [vmem:[%s6315_s27 + $0x81] sm:$0xff] }
  0x15   : > { %5304 = vmatmul.mubr.msk.bf16.vlgmr.msra.gmra.mrb[0].mxu0 %vm332_vm1, %v6323_v10  ;;  %v6346_v19 = vpack.c.bf16 %v285_v17, %v284_v16  ;;  %v288_v22 = vld [vmem:[%s6315_s27 + $0x91] sm:$0xff]  ;;  %v289_v23 = vld [vmem:[%s6315_s27 + $0x99] sm:$0xff]  ;;  %v6356_v24 = vpack.c.bf16 %v287_v21, %v286_v20  ;;  %v290_v26 = vld [vmem:[%s6315_s27 + $0xa9] sm:$0xff] }
  0x16   : > { %5336 = vmatpush3.bf16.msra.mxu0 %v600_v11  ;;  %5307 = vmatprep.mubr.msk.bf16.mxu0 %vm332_vm1, %v6326_v12  ;;  %v6358_v25 = vpack.c.bf16 %v289_v23, %v288_v22  ;;  %v291_v27 = vld [vmem:[%s6315_s27 + $0xb1] sm:$0xff]  ;;  %v292_v28 = vld [vmem:[%s6315_s27 + $0xc1] sm:$0xff]  ;;  %v293_v29 = vld [vmem:[%s6315_s27 + $0xc9] sm:$0xff] }
  0x17   : > { %6099 = vmatprep.subr.msk.bf16.mxu0 %vm381_vm0, %v6331_v13  ;;  %v6368_v30 = vpack.c.bf16 %v291_v27, %v290_v26  ;;  %v6370_v31 = vpack.c.bf16 %v293_v29, %v292_v28  ;;  %v294_v32 = vld [vmem:[%s6315_s27 + $0xd9] sm:$0xff]  ;;  %v295_v33 = vld [vmem:[%s6315_s27 + $0xe1] sm:$0xff]  ;;  %v296_v34 = vld [vmem:[%s6315_s27 + $0xf1] sm:$0xff] }
  0x18   : > { %v297_v35 = vld [vmem:[%s6315_s27 + $0xf9] sm:$0xff]  ;;  %v6380_v36 = vpack.c.bf16 %v295_v33, %v294_v32  ;;  %v298_v38 = vld [vmem:[%s6315_s27 + $0x109] sm:$0xff]  ;;  %v299_v39 = vld [vmem:[%s6315_s27 + $0x111] sm:$0xff] }
  0x19   : > { %v6382_v37 = vpack.c.bf16 %v297_v35, %v296_v34  ;;  %v300_v40 = vld [vmem:[%s6315_s27 + $0x121] sm:$0xff]  ;;  %v301_v41 = vld [vmem:[%s6315_s27 + $0x129] sm:$0xff]  ;;  %v6392_v42 = vpack.c.bf16 %v299_v39, %v298_v38  ;;  %v302_v44 = vld [vmem:[%s6315_s27 + $0x139] sm:$0xff] }
  0x1a   : > { %v6394_v43 = vpack.c.bf16 %v301_v41, %v300_v40  ;;  %v303_v45 = vld [vmem:[%s6315_s27 + $0x141] sm:$0xff]  ;;  %v304_v46 = vld [vmem:[%s6315_s27 + $0x151] sm:$0xff]  ;;  %v305_v47 = vld [vmem:[%s6315_s27 + $0x159] sm:$0xff] }
  0x1b   : > { %v6404_v48 = vpack.c.bf16 %v303_v45, %v302_v44  ;;  %v6406_v49 = vpack.c.bf16 %v305_v47, %v304_v46  ;;  %v306_v50 = vld [vmem:[%s6315_s27 + $0x169] sm:$0xff]  ;;  %v307_v51 = vld [vmem:[%s6315_s27 + $0x171] sm:$0xff]  ;;  %v226_v52 = vld [vmem:[%s6315_s27] sm:$0xff] }
  0x1c   : > { %v227_v53 = vld [vmem:[%s6315_s27 + $0x8] sm:$0xff]  ;;  %v6416_v54 = vpack.c.bf16 %v307_v51, %v306_v50  ;;  %v228_v56 = vld [vmem:[%s6315_s27 + $0x18] sm:$0xff]  ;;  %v229_v57 = vld [vmem:[%s6315_s27 + $0x20] sm:$0xff] }
  0x1d   : > { %5308 = vmatmul.mubr.msk.bf16.gmra.mrb[4].mxu0 %vm332_vm1, %v6344_v18  ;;  %v258_v55 = vpack.c.bf16 %v227_v53, %v226_v52  ;;  %v230_v58 = vld [vmem:[%s6315_s27 + $0x30] sm:$0xff]  ;;  %v231_v59 = vld [vmem:[%s6315_s27 + $0x38] sm:$0xff]  ;;  %v259_v60 = vpack.c.bf16 %v229_v57, %v228_v56  ;;  %v232_v0 = vld [vmem:[%s6315_s27 + $0x48] sm:$0xff]  ;;  %v1169_v53 = vsel %vm381_vm0, %v6124_v63, 0 }
  0x1e   : > { %5311 = vmatprep.mubr.msk.bf16.mxu0 %vm332_vm1, %v6346_v19  ;;  %v260_v61 = vpack.c.bf16 %v231_v59, %v230_v58  ;;  %v233_v1 = vld [vmem:[%s6315_s27 + $0x50] sm:$0xff]  ;;  %v234_v2 = vld [vmem:[%s6315_s27 + $0x60] sm:$0xff]  ;;  %v235_v3 = vld [vmem:[%s6315_s27 + $0x68] sm:$0xff] }
  0x1f   : > { %v261_v4 = vpack.c.bf16 %v233_v1, %v232_v0  ;;  %v262_v5 = vpack.c.bf16 %v235_v3, %v234_v2  ;;  %v236_v6 = vld [vmem:[%s6315_s27 + $0x78] sm:$0xff]  ;;  %v237_v7 = vld [vmem:[%s6315_s27 + $0x80] sm:$0xff]  ;;  %v238_v8 = vld [vmem:[%s6315_s27 + $0x90] sm:$0xff] }
  0x20   : > { %v239_v9 = vld [vmem:[%s6315_s27 + $0x98] sm:$0xff]  ;;  %v263_v11 = vpack.c.bf16 %v237_v7, %v236_v6  ;;  %v240_v14 = vld [vmem:[%s6315_s27 + $0xa8] sm:$0xff]  ;;  %v241_v15 = vld [vmem:[%s6315_s27 + $0xb0] sm:$0xff] }
  0x21   : > { %v264_v13 = vpack.c.bf16 %v239_v9, %v238_v8  ;;  %v242_v16 = vld [vmem:[%s6315_s27 + $0xc0] sm:$0xff]  ;;  %v243_v17 = vld [vmem:[%s6315_s27 + $0xc8] sm:$0xff]  ;;  %v265_v20 = vpack.c.bf16 %v241_v15, %v240_v14  ;;  %v244_v22 = vld [vmem:[%s6315_s27 + $0xd8] sm:$0xff] }
  0x22   : > { %v266_v21 = vpack.c.bf16 %v243_v17, %v242_v16  ;;  %v245_v23 = vld [vmem:[%s6315_s27 + $0xe0] sm:$0xff]  ;;  %v246_v26 = vld [vmem:[%s6315_s27 + $0xf0] sm:$0xff]  ;;  %v247_v27 = vld [vmem:[%s6315_s27 + $0xf8] sm:$0xff] }
  0x23   : > { %v267_v28 = vpack.c.bf16 %v245_v23, %v244_v22  ;;  %v268_v29 = vpack.c.bf16 %v247_v27, %v246_v26  ;;  %v248_v32 = vld [vmem:[%s6315_s27 + $0x108] sm:$0xff]  ;;  %v249_v33 = vld [vmem:[%s6315_s27 + $0x110] sm:$0xff]  ;;  %v250_v34 = vld [vmem:[%s6315_s27 + $0x120] sm:$0xff] }
  0x24   : > { %v251_v35 = vld [vmem:[%s6315_s27 + $0x128] sm:$0xff]  ;;  %v269_v38 = vpack.c.bf16 %v249_v33, %v248_v32  ;;  %v252_v40 = vld [vmem:[%s6315_s27 + $0x138] sm:$0xff]  ;;  %v253_v41 = vld [vmem:[%s6315_s27 + $0x140] sm:$0xff] }
  0x25   : > { %5312 = vmatmul.mubr.msk.bf16.gmra.mrb[8].mxu0 %vm332_vm1, %v6356_v24  ;;  %v270_v39 = vpack.c.bf16 %v251_v35, %v250_v34  ;;  %v254_v44 = vld [vmem:[%s6315_s27 + $0x150] sm:$0xff]  ;;  %v255_v45 = vld [vmem:[%s6315_s27 + $0x158] sm:$0xff]  ;;  %v271_v46 = vpack.c.bf16 %v253_v41, %v252_v40  ;;  %v256_v50 = vld [vmem:[%s6315_s27 + $0x168] sm:$0xff] }
  0x26   : > { %5315 = vmatprep.mubr.msk.bf16.mxu0 %vm332_vm1, %v6358_v25  ;;  %v272_v47 = vpack.c.bf16 %v255_v45, %v254_v44  ;;  %v257_v51 = vld [vmem:[%s6315_s27 + $0x170] sm:$0xff]  ;;  %v4852_v56 = vld [vmem:[%s6315_s27 + $0x188] sm:$0xff] }
  0x27   : > { %v273_v52 = vpack.c.bf16 %v257_v51, %v256_v50 }
  0x2d   : > { %5316 = vmatmul.mubr.msk.bf16.gmra.mrb[12].mxu0 %vm332_vm1, %v6368_v30 }
  0x2e   : > { %5319 = vmatprep.mubr.msk.bf16.mxu0 %vm332_vm1, %v6370_v31 }
  0x35   : > { %5320 = vmatmul.mubr.msk.bf16.gmra.mrb[16].mxu0 %vm332_vm1, %v6380_v36 }
  0x36   : > { %5323 = vmatprep.mubr.msk.bf16.mxu0 %vm332_vm1, %v6382_v37 }
  0x3d   : > { %5324 = vmatmul.mubr.msk.bf16.gmra.mrb[20].mxu0 %vm332_vm1, %v6392_v42 }
  0x3e   : > { %5327 = vmatprep.mubr.msk.bf16.mxu0 %vm332_vm1, %v6394_v43 }
  0x45   : > { %5328 = vmatmul.mubr.msk.bf16.gmra.mrb[24].mxu0 %vm332_vm1, %v6404_v48 }
  0x46   : > { %5331 = vmatprep.mubr.msk.bf16.mxu0 %vm332_vm1, %v6406_v49 }
  0x4d   : > { %5332 = vmatmul.mubr.msk.bf16.gmra.mrb[28].mxu0 %vm332_vm1, %v6416_v54 }
  0x4e   : > { %5337 = vmatprep.mubr.msk.bf16.mxu0 %vm332_vm1, %v258_v55  ;;  %v4851_v55 = vld [vmem:[%s6315_s27 + $0x180] sm:$0xff] }
  0x4f   : > { %v811_v57 = vpack.c.bf16 %v4852_v56, %v4851_v55 }
  0x55   : > { %5338 = vmatmul.mubr.msk.bf16.vlgmr.msra.gmra.mrb[0].mxu0 %vm332_vm1, %v259_v60 }
  0x56   : > { %5370 = vmatpush3.bf16.msra.mxu0 %v869_v62  ;;  %5341 = vmatprep.mubr.msk.bf16.mxu0 %vm332_vm1, %v260_v61 }
  0x57   : > { %6100 = vmatprep.subr.msk.bf16.mxu0 %vm381_vm0, %v6124_v63 }
  0x5d   : > { %5342 = vmatmul.mubr.msk.bf16.gmra.mrb[4].mxu0 %vm332_vm1, %v261_v4 }
  0x5e   : > { %5345 = vmatprep.mubr.msk.bf16.mxu0 %vm332_vm1, %v262_v5 }
  0x65   : > { %5346 = vmatmul.mubr.msk.bf16.gmra.mrb[8].mxu0 %vm332_vm1, %v263_v11 }
  0x66   : > { %5349 = vmatprep.mubr.msk.bf16.mxu0 %vm332_vm1, %v264_v13 }
  0x6d   : > { %5350 = vmatmul.mubr.msk.bf16.gmra.mrb[12].mxu0 %vm332_vm1, %v265_v20 }
  0x6e   : > { %5353 = vmatprep.mubr.msk.bf16.mxu0 %vm332_vm1, %v266_v21 }
  0x75   : > { %5354 = vmatmul.mubr.msk.bf16.gmra.mrb[16].mxu0 %vm332_vm1, %v267_v28 }
  0x76   : > { %5357 = vmatprep.mubr.msk.bf16.mxu0 %vm332_vm1, %v268_v29 }
  0x7d   : > { %5358 = vmatmul.mubr.msk.bf16.gmra.mrb[20].mxu0 %vm332_vm1, %v269_v38 }
  0x7e   : > { %5361 = vmatprep.mubr.msk.bf16.mxu0 %vm332_vm1, %v270_v39 }
  0x85   : > { %5362 = vmatmul.mubr.msk.bf16.gmra.mrb[24].mxu0 %vm332_vm1, %v271_v46 }
  0x86   : > { %5365 = vmatprep.mubr.msk.bf16.mxu0 %vm332_vm1, %v272_v47 }
  0x8d   : > { %5366 = vmatmul.mubr.msk.bf16.gmra.mrb[28].mxu0 %vm332_vm1, %v273_v52 }
  0x8e   : > { %5371 = vmatprep.mubr.msk.bf16.mxu0 %vm332_vm1, %v259_v60 }
  0x95   : > { %5372 = vmatmul.mubr.msk.bf16.vlgmr.msra.gmra.mrb[0].mxu0 %vm332_vm1, %v260_v61 }
  0x96   : > { %5404 = vmatpush3.bf16.msra.mxu0 %v1169_v53  ;;  %5375 = vmatprep.mubr.msk.bf16.mxu0 %vm332_vm1, %v261_v4 }
  0x9d   : > { %5376 = vmatmul.mubr.msk.bf16.gmra.mrb[4].mxu0 %vm332_vm1, %v262_v5 }
  0x9e   : > { %5379 = vmatprep.mubr.msk.bf16.mxu0 %vm332_vm1, %v263_v11 }
  0xa5   : > { %5380 = vmatmul.mubr.msk.bf16.gmra.mrb[8].mxu0 %vm332_vm1, %v264_v13 }
  0xa6   : > { %5383 = vmatprep.mubr.msk.bf16.mxu0 %vm332_vm1, %v265_v20 }
  0xad   : > { %5384 = vmatmul.mubr.msk.bf16.gmra.mrb[12].mxu0 %vm332_vm1, %v266_v21 }
  0xae   : > { %5387 = vmatprep.mubr.msk.bf16.mxu0 %vm332_vm1, %v267_v28 }
  0xb5   : > { %5388 = vmatmul.mubr.msk.bf16.gmra.mrb[16].mxu0 %vm332_vm1, %v268_v29 }
  0xb6   : > { %5391 = vmatprep.mubr.msk.bf16.mxu0 %vm332_vm1, %v269_v38 }
  0xbd   : > { %5392 = vmatmul.mubr.msk.bf16.gmra.mrb[20].mxu0 %vm332_vm1, %v270_v39 }
  0xbe   : > { %5395 = vmatprep.mubr.msk.bf16.mxu0 %vm332_vm1, %v271_v46 }
  0xc5   : > { %5396 = vmatmul.mubr.msk.bf16.gmra.mrb[24].mxu0 %vm332_vm1, %v272_v47 }
  0xc6   : > { %5399 = vmatprep.mubr.msk.bf16.mxu0 %vm332_vm1, %v273_v52 }
  0xcd   : > { %5400 = vmatmul.mubr.msk.bf16.gmra.mrb[28].mxu0 %vm332_vm1, %v811_v57 }
  0xce   : > { %5405 = vmatprep.mubr.msk.bf16.mxu0 %vm332_vm1, %v6323_v10  ;;  %v4902_v10 = vld [vmem:[%s6315_s27 + $0x181] sm:$0xff] }
  0xd5   : > { %5406 = vmatmul.mubr.msk.bf16.vlgmr.msra.gmra.mrb[0].mxu0 %vm332_vm1, %v6326_v12  ;;  %v4903_v12 = vld [vmem:[%s6315_s27 + $0x189] sm:$0xff] }
  0xd6   : > { %5409 = vmatprep.mubr.msk.bf16.mxu0 %vm332_vm1, %v6344_v18  ;;  %v1111_v18 = vpack.c.bf16 %v4903_v12, %v4902_v10 }
  0xdd   : > { %5410 = vmatmul.mubr.msk.bf16.gmra.mrb[4].mxu0 %vm332_vm1, %v6346_v19  ;;  %v6261_v19 = vmov 0.0  }
  0xde   : > { %5413 = vmatprep.mubr.msk.bf16.mxu0 %vm332_vm1, %v6356_v24  ;;  %1699 = vst.msk [vmem:[#allocation2 + $0x30] sm:$0xff] %vm1691_vm2, %v6261_v19  ;;  %1700 = vst.msk [vmem:[#allocation2 + $0x38] sm:$0xff] %vm1691_vm2, %v6261_v19  ;;  %v4924_v24 = vld [vmem:[%s7723_s3 + $0x4] sm:$0xf] }
  0xdf   : > { %1692 = vst.msk [vmem:[#allocation2] sm:$0xff] %vm1691_vm2, %v6261_v19  ;;  %1693 = vst.msk [vmem:[#allocation2 + $0x8] sm:$0xff] %vm1691_vm2, %v6261_v19  ;;  %6101 = vmatprep.subr.msk.bf16.mxu0 %vm1927_vm4, %v4924_v24 }
  0xe0   : > { %1696 = vst.msk [vmem:[#allocation2 + $0x18] sm:$0xff] %vm1691_vm2, %v6261_v19  ;;  %1697 = vst.msk [vmem:[#allocation2 + $0x20] sm:$0xff] %vm1691_vm2, %v6261_v19 }
  0xe1   : > { %1702 = vst.msk [vmem:[#allocation2 + $0x48] sm:$0xff] %vm1691_vm2, %v6261_v19  ;;  %1703 = vst.msk [vmem:[#allocation2 + $0x50] sm:$0xff] %vm1691_vm2, %v6261_v19 }
  0xe2   : > { %1705 = vst.msk [vmem:[#allocation2 + $0x60] sm:$0xff] %vm1691_vm2, %v6261_v19  ;;  %1706 = vst.msk [vmem:[#allocation2 + $0x68] sm:$0xff] %vm1691_vm2, %v6261_v19 }
  0xe3   : > { %1708 = vst.msk [vmem:[#allocation2 + $0x78] sm:$0xff] %vm1691_vm2, %v6261_v19  ;;  %1709 = vst.msk [vmem:[#allocation2 + $0x80] sm:$0xff] %vm1691_vm2, %v6261_v19 }
  0xe4   : > { %1711 = vst.msk [vmem:[#allocation2 + $0x90] sm:$0xff] %vm1691_vm2, %v6261_v19  ;;  %1712 = vst.msk [vmem:[#allocation2 + $0x98] sm:$0xff] %vm1691_vm2, %v6261_v19 }
  0xe5   : > { %5414 = vmatmul.mubr.msk.bf16.gmra.mrb[8].mxu0 %vm332_vm1, %v6358_v25  ;;  %1714 = vst.msk [vmem:[#allocation2 + $0xa8] sm:$0xff] %vm1691_vm2, %v6261_v19  ;;  %1715 = vst.msk [vmem:[#allocation2 + $0xb0] sm:$0xff] %vm1691_vm2, %v6261_v19  ;;  %v1929_v25 = vsel %vm1927_vm4, %v4924_v24, 0 }
  0xe6   : > { %5417 = vmatprep.mubr.msk.bf16.mxu0 %vm332_vm1, %v6368_v30  ;;  %1717 = vst.msk [vmem:[#allocation2 + $0xc0] sm:$0xff] %vm1691_vm2, %v6261_v19  ;;  %1718 = vst.msk [vmem:[#allocation2 + $0xc8] sm:$0xff] %vm1691_vm2, %v6261_v19  ;;  %v1829_v30 = vld [vmem:[#allocation2 + $0x1] sm:$0xff]  ;;  %5438 = vmatpush3.bf16.msra.mxu0 %v1929_v25 }
  0xe7   : > { %1720 = vst.msk [vmem:[#allocation2 + $0xd8] sm:$0xff] %vm1691_vm2, %v6261_v19  ;;  %1721 = vst.msk [vmem:[#allocation2 + $0xe0] sm:$0xff] %vm1691_vm2, %v6261_v19 }
  0xe8   : > { %1723 = vst.msk [vmem:[#allocation2 + $0xf0] sm:$0xff] %vm1691_vm2, %v6261_v19  ;;  %1724 = vst.msk [vmem:[#allocation2 + $0xf8] sm:$0xff] %vm1691_vm2, %v6261_v19 }
  0xe9   : > { %1726 = vst.msk [vmem:[#allocation2 + $0x108] sm:$0xff] %vm1691_vm2, %v6261_v19  ;;  %1727 = vst.msk [vmem:[#allocation2 + $0x110] sm:$0xff] %vm1691_vm2, %v6261_v19 }
  0xea   : > { %1729 = vst.msk [vmem:[#allocation2 + $0x120] sm:$0xff] %vm1691_vm2, %v6261_v19  ;;  %1730 = vst.msk [vmem:[#allocation2 + $0x128] sm:$0xff] %vm1691_vm2, %v6261_v19 }
  0xeb   : > { %1732 = vst.msk [vmem:[#allocation2 + $0x138] sm:$0xff] %vm1691_vm2, %v6261_v19  ;;  %1733 = vst.msk [vmem:[#allocation2 + $0x140] sm:$0xff] %vm1691_vm2, %v6261_v19 }
  0xec   : > { %1735 = vst.msk [vmem:[#allocation2 + $0x150] sm:$0xff] %vm1691_vm2, %v6261_v19  ;;  %1736 = vst.msk [vmem:[#allocation2 + $0x158] sm:$0xff] %vm1691_vm2, %v6261_v19 }
  0xed   : > { %5418 = vmatmul.mubr.msk.bf16.gmra.mrb[12].mxu0 %vm332_vm1, %v6370_v31  ;;  %1738 = vst.msk [vmem:[#allocation2 + $0x168] sm:$0xff] %vm1691_vm2, %v6261_v19  ;;  %1739 = vst.msk [vmem:[#allocation2 + $0x170] sm:$0xff] %vm1691_vm2, %v6261_v19 }
  0xee   : > { %5421 = vmatprep.mubr.msk.bf16.mxu0 %vm332_vm1, %v6380_v36  ;;  %1741 = vst.msk [vmem:[#allocation2 + $0x180] sm:$0xff] %vm1691_vm2, %v6261_v19  ;;  %1742 = vst.msk [vmem:[#allocation2 + $0x188] sm:$0xff] %vm1691_vm2, %v6261_v19 }
  0xef   : > { %1744 = vst.msk [vmem:[#allocation2 + $0x198] sm:$0xff] %vm1691_vm2, %v6261_v19  ;;  %1745 = vst.msk [vmem:[#allocation2 + $0x1a0] sm:$0xff] %vm1691_vm2, %v6261_v19 }
  0xf0   : > { %1701 = vst.msk [vmem:[#allocation2 + $0x40] sm:$0x3] %vm1694_vm3, %v6261_v19  ;;  %1695 = vst.msk [vmem:[#allocation2 + $0x10] sm:$0x3] %vm1694_vm3, %v6261_v19 }
  0xf1   : > { %1698 = vst.msk [vmem:[#allocation2 + $0x28] sm:$0x3] %vm1694_vm3, %v6261_v19  ;;  %1704 = vst.msk [vmem:[#allocation2 + $0x58] sm:$0x3] %vm1694_vm3, %v6261_v19 }
  0xf2   : > { %1707 = vst.msk [vmem:[#allocation2 + $0x70] sm:$0x3] %vm1694_vm3, %v6261_v19  ;;  %1710 = vst.msk [vmem:[#allocation2 + $0x88] sm:$0x3] %vm1694_vm3, %v6261_v19 }
  0xf3   : > { %1713 = vst.msk [vmem:[#allocation2 + $0xa0] sm:$0x3] %vm1694_vm3, %v6261_v19  ;;  %1716 = vst.msk [vmem:[#allocation2 + $0xb8] sm:$0x3] %vm1694_vm3, %v6261_v19 }
  0xf4   : > { %1719 = vst.msk [vmem:[#allocation2 + $0xd0] sm:$0x3] %vm1694_vm3, %v6261_v19  ;;  %1722 = vst.msk [vmem:[#allocation2 + $0xe8] sm:$0x3] %vm1694_vm3, %v6261_v19 }
  0xf5   : > { %5422 = vmatmul.mubr.msk.bf16.gmra.mrb[16].mxu0 %vm332_vm1, %v6382_v37  ;;  %1725 = vst.msk [vmem:[#allocation2 + $0x100] sm:$0x3] %vm1694_vm3, %v6261_v19  ;;  %1728 = vst.msk [vmem:[#allocation2 + $0x118] sm:$0x3] %vm1694_vm3, %v6261_v19  ;;  %v6587_v37 = vld [vmem:[%s7723_s3 + $0x8] sm:$0xf] }
  0xf6   : > { %5425 = vmatprep.mubr.msk.bf16.mxu0 %vm332_vm1, %v6392_v42  ;;  %1731 = vst.msk [vmem:[#allocation2 + $0x130] sm:$0x3] %vm1694_vm3, %v6261_v19  ;;  %1734 = vst.msk [vmem:[#allocation2 + $0x148] sm:$0x3] %vm1694_vm3, %v6261_v19  ;;  %6104 = vmatprep.subr.msk.bf16.mxu1 %vm1927_vm4, %v6587_v37  ;;  %v6593_v42 = vsel %vm1927_vm4, %v6587_v37, 0 }
  0xf7   : > { %1737 = vst.msk [vmem:[#allocation2 + $0x160] sm:$0x3] %vm1694_vm3, %v6261_v19  ;;  %1740 = vst.msk [vmem:[#allocation2 + $0x178] sm:$0x3] %vm1694_vm3, %v6261_v19  ;;  %v1830_v31 = vld [vmem:[#allocation2 + $0x9] sm:$0xff]  ;;  %5744 = vmatpush3.bf16.msra.mxu1 %v6593_v42 }
  0xf8   : > { %1743 = vst.msk [vmem:[#allocation2 + $0x190] sm:$0x3] %vm1694_vm3, %v6261_v19  ;;  %1746 = vst.msk [vmem:[#allocation2 + $0x1a8] sm:$0x3] %vm1694_vm3, %v6261_v19  ;;  %v1861_v36 = vpack.c.bf16 %v1830_v31, %v1829_v30 }
  0xfd   : > { %5426 = vmatmul.mubr.msk.bf16.gmra.mrb[20].mxu0 %vm332_vm1, %v6394_v43  ;;  %v4974_v43 = vld [vmem:[%s7723_s3 + $0xc] sm:$0xf] }
  0xfe   : > { %5429 = vmatprep.mubr.msk.bf16.mxu0 %vm332_vm1, %v6404_v48  ;;  %6105 = vmatprep.subr.msk.bf16.mxu1 %vm1927_vm4, %v4974_v43  ;;  %v1828_v48 = vld [vmem:[%s7723_s3] sm:$0xf]  ;;  %v6635_v52 = vsel %vm1927_vm4, %v4974_v43, 0 }
  0xff   : > { %6102 = vmatprep.subr.msk.bf16.mxu0 %vm1927_vm4, %v1828_v48  ;;  %v6642_v10 = vsel %vm1927_vm4, %v1828_v48, 0 }
 0x105   : > { %5430 = vmatmul.mubr.msk.bf16.gmra.mrb[24].mxu0 %vm332_vm1, %v6406_v49  ;;  %v6607_v49 = vld [vmem:[%s7722_s2] ss:$0 sm:$0xff] }
 0x106   : > { %5433 = vmatprep.mubr.msk.bf16.mxu0 %vm332_vm1, %v6416_v54 }
 0x10d   : > { %5434 = vmatmul.mubr.msk.bf16.gmra.mrb[28].mxu0 %vm332_vm1, %v1111_v18 }
 0x10e   : > { %5439 = vmatprep.mubr.msk.bf16.mxu0 %vm1691_vm2, %v1861_v36 }
 0x1a8   : > { %v5407_v54 = vpop.f32.mrb[0].mxu0 }
 0x1a9   : > { %v1373_v58 = vadd.f32 %v5407_v54, %v6607_v49  ;;  %v1205_v59 = vpop.f32.mrb[1].mxu0 }
 0x1aa   : > { %v1371_v60 = vadd.f32 %v6607_v49, %v1205_v59  ;;  %v5408_v61 = vpop.f32.mrb[2].mxu0 }
 0x1ab   : > { %v1437_v62 = vmul.f32 0.044715, %v1373_v58  ;;  %v1374_v63 = vadd.f32 %v5408_v61, %v6607_v49  ;;  %v1208_v0 = vpop.f32.mrb[3].mxu0  ;;  %v1405_v12 = vmul.f32 0.5, %v1373_v58 }
 0x1ac   : > { %v1435_v1 = vmul.f32 0.044715, %v1371_v60  ;;  %v6613_v2 = vadd.f32 %v6607_v49, %v1208_v0  ;;  %v1403_v30 = vmul.f32 0.5, %v1371_v60 }
 0x1ad   : > { %v1469_v3 = vmul.f32 %v1437_v62, %v1373_v58  ;;  %v1438_v4 = vmul.f32 0.044715, %v1374_v63  ;;  %v1406_v59 = vmul.f32 0.5, %v1374_v63 }
 0x1ae   : > { %v1467_v5 = vmul.f32 %v1435_v1, %v1371_v60  ;;  %v1436_v6 = vmul.f32 0.044715, %v6613_v2 }
 0x1af   : > { %v1501_v7 = vmul.f32 %v1469_v3, %v1373_v58  ;;  %v1470_v8 = vmul.f32 %v1438_v4, %v1374_v63 }
 0x1b0   : > { %v1499_v9 = vmul.f32 %v1467_v5, %v1371_v60  ;;  %v1468_v11 = vmul.f32 %v1436_v6, %v6613_v2  ;;  %v5411_v13 = vpop.f32.mrb[4].mxu0 }
 0x1b1   : > { %v1533_v14 = vadd.f32 %v1501_v7, %v1373_v58  ;;  %v1502_v15 = vmul.f32 %v1470_v8, %v1374_v63  ;;  %v1377_v16 = vadd.f32 %v5411_v13, %v6607_v49  ;;  %v1221_v17 = vpop.f32.mrb[5].mxu0 }
 0x1b2   : > { %v1531_v20 = vadd.f32 %v1499_v9, %v1371_v60  ;;  %v1500_v21 = vmul.f32 %v1468_v11, %v6613_v2  ;;  %v6620_v22 = vadd.f32 %v6607_v49, %v1221_v17  ;;  %v5412_v23 = vpop.f32.mrb[6].mxu0  ;;  %v1404_v60 = vmul.f32 0.5, %v6613_v2 }
 0x1b3   : > { %v1565_v26 = vmul.f32 0.7978846, %v1533_v14  ;;  %v1534_v27 = vadd.f32 %v1502_v15, %v1374_v63  ;;  %v1441_v28 = vmul.f32 0.044715, %v1377_v16  ;;  %v1224_v29 = vpop.f32.mrb[7].mxu0  ;;  %v6625_v39 = vadd.f32 %v5412_v23, %v6607_v49 }
 0x1b4   : > { %v1563_v32 = vmul.f32 0.7978846, %v1531_v20  ;;  %v1532_v33 = vadd.f32 %v1500_v21, %v6613_v2  ;;  %v1439_v34 = vmul.f32 0.044715, %v6620_v22  ;;  %v6629_v44 = vadd.f32 %v6607_v49, %v1224_v29 }
 0x1b5   : > { %6125 = vtanh.f32 %v1565_v26  ;;  %v1566_v35 = vmul.f32 0.7978846, %v1534_v27  ;;  %v1473_v38 = vmul.f32 %v1441_v28, %v1377_v16  ;;  %v1442_v46 = vmul.f32 0.044715, %v6625_v39 }
 0x1b6   : > { %6127 = vtanh.f32 %v1563_v32  ;;  %v1564_v40 = vmul.f32 0.7978846, %v1532_v33  ;;  %v1471_v41 = vmul.f32 %v1439_v34, %v6620_v22  ;;  %v1440_v50 = vmul.f32 0.044715, %v6629_v44 }
 0x1b7   : > { %6129 = vtanh.f32 %v1566_v35  ;;  %v1505_v45 = vmul.f32 %v1473_v38, %v1377_v16  ;;  %v1474_v55 = vmul.f32 %v1442_v46, %v6625_v39  ;;  %v1409_v5 = vmul.f32 0.5, %v1377_v16 }
 0x1b8   : > { %6131 = vtanh.f32 %v1564_v40  ;;  %v1503_v47 = vmul.f32 %v1471_v41, %v6620_v22  ;;  %v5415_v51 = vpop.f32.mrb[8].mxu0  ;;  %v1472_v19 = vmul.f32 %v1440_v50, %v6629_v44 }
 0x1b9   : > { %v1537_v53 = vadd.f32 %v1505_v45, %v1377_v16  ;;  %v6639_v56 = vadd.f32 %v5415_v51, %v6607_v49  ;;  %v1237_v57 = vpop.f32.mrb[9].mxu0  ;;  %v1506_v36 = vmul.f32 %v1474_v55, %v6625_v39  ;;  %v1407_v55 = vmul.f32 0.5, %v6620_v22 }
 0x1ba   : > { %v1535_v18 = vadd.f32 %v1503_v47, %v6620_v22  ;;  %v6647_v24 = vadd.f32 %v6607_v49, %v1237_v57  ;;  %v5416_v25 = vpop.f32.mrb[10].mxu0  ;;  %v1504_v48 = vmul.f32 %v1472_v19, %v6629_v44  ;;  %v1410_v19 = vmul.f32 0.5, %v6625_v39 }
 0x1bb   : > { %v1569_v31 = vmul.f32 0.7978846, %v1537_v53  ;;  %v1445_v43 = vmul.f32 0.044715, %v6639_v56  ;;  %v1240_v54 = vpop.f32.mrb[11].mxu0  ;;  %v1538_v62 = vadd.f32 %v1506_v36, %v6625_v39  ;;  %v6656_v1 = vadd.f32 %v5416_v25, %v6607_v49 }
 0x1bc   : > { %v1567_v61 = vmul.f32 0.7978846, %v1535_v18  ;;  %v1443_v58 = vmul.f32 0.044715, %v6647_v24  ;;  %v1536_v3 = vadd.f32 %v1504_v48, %v6629_v44  ;;  %v6665_v15 = vadd.f32 %v6607_v49, %v1240_v54 }
 0x1bd   : > { %6133 = vtanh.f32 %v1569_v31  ;;  %v1477_v0 = vmul.f32 %v1445_v43, %v6639_v56  ;;  %v1570_v6 = vmul.f32 0.7978846, %v1538_v62  ;;  %v1446_v8 = vmul.f32 0.044715, %v6656_v1 }
 0x1be   : > { %6135 = vtanh.f32 %v1567_v61  ;;  %v1475_v63 = vmul.f32 %v1443_v58, %v6647_v24  ;;  %v1568_v13 = vmul.f32 0.7978846, %v1536_v3  ;;  %v1444_v46 = vmul.f32 0.044715, %v6665_v15 }
 0x1bf   : > { %v6126_v4 = vpop.eup %6125  ;;  %v1509_v7 = vmul.f32 %v1477_v0, %v6639_v56  ;;  %6137 = vtanh.f32 %v1570_v6  ;;  %v1478_v16 = vmul.f32 %v1446_v8, %v6656_v1  ;;  %v1408_v58 = vmul.f32 0.5, %v6629_v44 }
 0x1c0   : > { %v6128_v9 = vpop.eup %6127  ;;  %v1629_v11 = vadd.f32 1.0, %v6126_v4  ;;  %v1507_v14 = vmul.f32 %v1475_v63, %v6647_v24  ;;  %v5419_v2 = vpop.f32.mrb[12].mxu0  ;;  %6139 = vtanh.f32 %v1568_v13  ;;  %v1476_v57 = vmul.f32 %v1444_v46, %v6665_v15 }
 0x1c1   : > { %v6130_v17 = vpop.eup %6129  ;;  %v1627_v20 = vadd.f32 1.0, %v6128_v9  ;;  %v1541_v21 = vadd.f32 %v1509_v7, %v6639_v56  ;;  %v1253_v23 = vpop.f32.mrb[13].mxu0  ;;  %v1510_v38 = vmul.f32 %v1478_v16, %v6656_v1  ;;  %v6674_v47 = vadd.f32 %v5419_v2, %v6607_v49 }
 0x1c2   : > { %v6132_v26 = vpop.eup %6131  ;;  %v1661_v27 = vmul.f32 %v1629_v11, %v1405_v12  ;;  %v1630_v28 = vadd.f32 1.0, %v6130_v17  ;;  %v1539_v29 = vadd.f32 %v1507_v14, %v6647_v24  ;;  %v5420_v32 = vpop.f32.mrb[14].mxu0  ;;  %v6679_v53 = vadd.f32 %v6607_v49, %v1253_v23 }
 0x1c3   : > { %v1659_v33 = vmul.f32 %v1627_v20, %v1403_v30  ;;  %v1628_v34 = vadd.f32 1.0, %v6132_v26  ;;  %v1573_v35 = vmul.f32 0.7978846, %v1541_v21  ;;  %v1256_v40 = vpop.f32.mrb[15].mxu0  ;;  %v1542_v51 = vadd.f32 %v1510_v38, %v6656_v1 }
 0x1c4   : > { %1750 = vst.msk [vmem:[#allocation2 + $0x31] sm:$0xff] %vm1691_vm2, %v1661_v27  ;;  %v1662_v41 = vmul.f32 %v1630_v28, %v1406_v59  ;;  %v1571_v45 = vmul.f32 0.7978846, %v1539_v29  ;;  %v1449_v12 = vmul.f32 0.044715, %v6674_v47  ;;  %v6689_v31 = vadd.f32 %v5420_v32, %v6607_v49 }
 0x1c5   : > { %1748 = vst.msk [vmem:[#allocation2 + $0x19] sm:$0xff] %vm1691_vm2, %v1659_v33  ;;  %v1660_v50 = vmul.f32 %v1628_v34, %v1404_v60  ;;  %6141 = vtanh.f32 %v1573_v35  ;;  %v1574_v25 = vmul.f32 0.7978846, %v1542_v51  ;;  %v1447_v30 = vmul.f32 0.044715, %v6679_v53 }
 0x1c6   : > { %1751 = vst.msk [vmem:[#allocation2 + $0x39] sm:$0xff] %vm1691_vm2, %v1662_v41  ;;  %6143 = vtanh.f32 %v1571_v45  ;;  %v1508_v22 = vmul.f32 %v1476_v57, %v6665_v15  ;;  %v1481_v54 = vmul.f32 %v1449_v12, %v6674_v47  ;;  %v6694_v59 = vadd.f32 %v6607_v49, %v1256_v40 }
 0x1c7   : > { %v6134_v18 = vpop.eup %6133  ;;  %1749 = vst.msk [vmem:[#allocation2 + $0x21] sm:$0xff] %vm1691_vm2, %v1660_v50  ;;  %6145 = vtanh.f32 %v1574_v25  ;;  %v1479_v39 = vmul.f32 %v1447_v30, %v6679_v53  ;;  %v1450_v63 = vmul.f32 0.044715, %v6689_v31  ;;  %v1413_v8 = vmul.f32 0.5, %v6639_v56 }
 0x1c8   : > { %v6136_v36 = vpop.eup %6135  ;;  %v1633_v43 = vadd.f32 1.0, %v6134_v18  ;;  %v5423_v61 = vpop.f32.mrb[16].mxu0  ;;  %v1540_v60 = vadd.f32 %v1508_v22, %v6665_v15  ;;  %v1513_v3 = vmul.f32 %v1481_v54, %v6674_v47  ;;  %v1448_v44 = vmul.f32 0.044715, %v6694_v59 }
 0x1c9   : > { %v1631_v48 = vadd.f32 1.0, %v6136_v36  ;;  %v1269_v62 = vpop.f32.mrb[17].mxu0  ;;  %v6138_v6 = vpop.eup %6137  ;;  %v1511_v9 = vmul.f32 %v1479_v39, %v6679_v53  ;;  %v1482_v17 = vmul.f32 %v1450_v63, %v6689_v31  ;;  %v6711_v16 = vadd.f32 %v5423_v61, %v6607_v49 }
 0x1ca   : > { %v1665_v0 = vmul.f32 %v1633_v43, %v1409_v5  ;;  %v5424_v4 = vpop.f32.mrb[18].mxu0  ;;  %v6140_v13 = vpop.eup %6139  ;;  %v1634_v5 = vadd.f32 1.0, %v6138_v6  ;;  %v1572_v14 = vmul.f32 0.7978846, %v1540_v60  ;;  %v1545_v2 = vadd.f32 %v1513_v3, %v6674_v47 }
 0x1cb   : > { %v1663_v7 = vmul.f32 %v1631_v48, %v1407_v55  ;;  %v1272_v11 = vpop.f32.mrb[19].mxu0  ;;  %v1632_v20 = vadd.f32 1.0, %v6140_v13  ;;  %v1543_v21 = vadd.f32 %v1511_v9, %v6679_v53  ;;  %v1480_v56 = vmul.f32 %v1448_v44, %v6694_v59 }
 0x1cc   : > { %1754 = vst.msk [vmem:[#allocation2 + $0x61] sm:$0xff] %vm1691_vm2, %v1665_v0  ;;  %v1666_v23 = vmul.f32 %v1634_v5, %v1410_v19  ;;  %6147 = vtanh.f32 %v1572_v14  ;;  %v1577_v26 = vmul.f32 0.7978846, %v1545_v2  ;;  %v1514_v27 = vmul.f32 %v1482_v17, %v6689_v31 }
 0x1cd   : > { %1752 = vst.msk [vmem:[#allocation2 + $0x49] sm:$0xff] %vm1691_vm2, %v1663_v7  ;;  %v1664_v29 = vmul.f32 %v1632_v20, %v1408_v58  ;;  %v1411_v32 = vmul.f32 0.5, %v6647_v24  ;;  %v1575_v33 = vmul.f32 0.7978846, %v1543_v21  ;;  %v1512_v34 = vmul.f32 %v1480_v56, %v6694_v59  ;;  %v1831_v20 = vld [vmem:[#allocation2 + $0x19] sm:$0xff] }
 0x1ce   : > { %1755 = vst.msk [vmem:[#allocation2 + $0x69] sm:$0xff] %vm1691_vm2, %v1666_v23  ;;  %6149 = vtanh.f32 %v1577_v26  ;;  %v1546_v40 = vadd.f32 %v1514_v27, %v6689_v31  ;;  %v1453_v41 = vmul.f32 0.044715, %v6711_v16  ;;  %v6722_v24 = vadd.f32 %v6607_v49, %v1269_v62 }
 0x1cf   : > { %v6142_v28 = vpop.eup %6141  ;;  %1753 = vst.msk [vmem:[#allocation2 + $0x51] sm:$0xff] %vm1691_vm2, %v1664_v29  ;;  %6151 = vtanh.f32 %v1575_v33  ;;  %v1544_v50 = vadd.f32 %v1512_v34, %v6694_v59  ;;  %v6726_v18 = vadd.f32 %v5424_v4, %v6607_v49  ;;  %v1414_v36 = vmul.f32 0.5, %v6656_v1 }
 0x1d0   : > { %v6144_v35 = vpop.eup %6143  ;;  %v1637_v38 = vadd.f32 1.0, %v6142_v28  ;;  %v5427_v45 = vpop.f32.mrb[20].mxu0  ;;  %v1578_v57 = vmul.f32 0.7978846, %v1546_v40  ;;  %v1485_v12 = vmul.f32 %v1453_v41, %v6711_v16  ;;  %v1451_v22 = vmul.f32 0.044715, %v6722_v24 }
 0x1d1   : > { %v1635_v46 = vadd.f32 1.0, %v6144_v35  ;;  %v1285_v51 = vpop.f32.mrb[21].mxu0  ;;  %v6146_v25 = vpop.eup %6145  ;;  %v1576_v43 = vmul.f32 0.7978846, %v1544_v50  ;;  %v1412_v48 = vmul.f32 0.5, %v6665_v15  ;;  %v6739_v62 = vadd.f32 %v6607_v49, %v1272_v11 }
 0x1d2   : > { %v1669_v55 = vmul.f32 %v1637_v38, %v1413_v8  ;;  %v5428_v19 = vpop.f32.mrb[22].mxu0  ;;  %v1638_v61 = vadd.f32 1.0, %v6146_v25  ;;  %6153 = vtanh.f32 %v1578_v57  ;;  %v1517_v58 = vmul.f32 %v1485_v12, %v6711_v16  ;;  %v1832_v8 = vld [vmem:[#allocation2 + $0x21] sm:$0xff] }
 0x1d3   : > { %v1667_v30 = vmul.f32 %v1635_v46, %v1411_v32  ;;  %v6730_v54 = vpop.f32.mrb[23].mxu0  ;;  %6155 = vtanh.f32 %v1576_v43  ;;  %v1483_v39 = vmul.f32 %v1451_v22, %v6722_v24  ;;  %v1454_v1 = vmul.f32 0.044715, %v6726_v18 }
 0x1d4   : > { %1758 = vst.msk [vmem:[#allocation2 + $0x91] sm:$0xff] %vm1691_vm2, %v1669_v55  ;;  %v1670_v0 = vmul.f32 %v1638_v61, %v1414_v36  ;;  %v1549_v60 = vadd.f32 %v1517_v58, %v6711_v16  ;;  %v6743_v3 = vadd.f32 %v5427_v45, %v6607_v49  ;;  %v6746_v15 = vadd.f32 %v6607_v49, %v1285_v51  ;;  %v1834_v36 = vld [vmem:[#allocation2 + $0x39] sm:$0xff]  ;;  %v1833_v61 = vld [vmem:[#allocation2 + $0x31] sm:$0xff] }
 0x1d5   : > { %1756 = vst.msk [vmem:[#allocation2 + $0x79] sm:$0xff] %vm1691_vm2, %v1667_v30  ;;  %v1417_v63 = vmul.f32 0.5, %v6674_v47  ;;  %v1515_v4 = vmul.f32 %v1483_v39, %v6722_v24  ;;  %v1486_v6 = vmul.f32 %v1454_v1, %v6726_v18  ;;  %v1452_v7 = vmul.f32 0.044715, %v6739_v62 }
 0x1d6   : > { %v6148_v9 = vpop.eup %6147  ;;  %1759 = vst.msk [vmem:[#allocation2 + $0x99] sm:$0xff] %vm1691_vm2, %v1670_v0  ;;  %v1415_v44 = vmul.f32 0.5, %v6679_v53  ;;  %v1418_v11 = vmul.f32 0.5, %v6689_v31  ;;  %v1581_v13 = vmul.f32 0.7978846, %v1549_v60  ;;  %v6761_v26 = vpack.c.bf16 %v1832_v8, %v1831_v20  ;;  %v1838_v20 = vld [vmem:[#allocation2 + $0x69] sm:$0xff] }
 0x1d7   : > { %v1457_v5 = vmul.f32 0.044715, %v6743_v3  ;;  %v1636_v14 = vadd.f32 1.0, %v6148_v9  ;;  %v1547_v47 = vadd.f32 %v1515_v4, %v6722_v24  ;;  %v1518_v2 = vmul.f32 %v1486_v6, %v6726_v18  ;;  %v1836_v9 = vld [vmem:[#allocation2 + $0x51] sm:$0xff] }
 0x1d8   : > { %v1484_v17 = vmul.f32 %v1452_v7, %v6739_v62  ;;  %v5431_v21 = vpop.f32.mrb[24].mxu0  ;;  %v6150_v56 = vpop.eup %6149  ;;  %6157 = vtanh.f32 %v1581_v13  ;;  %v1455_v53 = vmul.f32 0.044715, %v6746_v15  ;;  %5440 = vmatmul.mubr.msk.bf16.vlgmr.msra.gmra.mrb[32].mxu0 %vm1691_vm2, %v6761_v26  ;;  %v6775_v51 = vadd.f32 %v5428_v19, %v6607_v49 }
 0x1d9   : > { %v1489_v23 = vmul.f32 %v1457_v5, %v6743_v3  ;;  %v1301_v31 = vpop.f32.mrb[25].mxu0  ;;  %v6152_v27 = vpop.eup %6151  ;;  %v1668_v28 = vmul.f32 %v1636_v14, %v1412_v48  ;;  %v1641_v29 = vadd.f32 1.0, %v6150_v56  ;;  %v1579_v32 = vmul.f32 0.7978846, %v1547_v47  ;;  %5472 = vmatpush3.bf16.msra.mxu0 %v6642_v10 }
 0x1da   : > { %v1550_v33 = vadd.f32 %v1518_v2, %v6726_v18  ;;  %v6764_v34 = vpop.f32.mrb[26].mxu0  ;;  %v1639_v35 = vadd.f32 1.0, %v6152_v27  ;;  %v1516_v38 = vmul.f32 %v1484_v17, %v6739_v62  ;;  %v1487_v41 = vmul.f32 %v1455_v53, %v6746_v15  ;;  %6103 = vmatprep.subr.msk.bf16.mxu0 %vm1927_vm4, %v6587_v37  ;;  %v1835_v17 = vld [vmem:[#allocation2 + $0x49] sm:$0xff] }
 0x1db   : > { %v1521_v40 = vmul.f32 %v1489_v23, %v6743_v3  ;;  %v6771_v45 = vpop.f32.mrb[27].mxu0  ;;  %1757 = vst.msk [vmem:[#allocation2 + $0x81] sm:$0xff] %vm1691_vm2, %v1668_v28  ;;  %v1673_v46 = vmul.f32 %v1641_v29, %v1417_v63  ;;  %6159 = vtanh.f32 %v1579_v32  ;;  %v1416_v19 = vmul.f32 0.5, %v6694_v59 }
 0x1dc   : > { %v1582_v50 = vmul.f32 0.7978846, %v1550_v33  ;;  %v6154_v55 = vpop.eup %6153  ;;  %v1671_v57 = vmul.f32 %v1639_v35, %v1415_v44  ;;  %v1548_v12 = vadd.f32 %v1516_v38, %v6739_v62  ;;  %v1519_v30 = vmul.f32 %v1487_v41, %v6746_v15 }
 0x1dd   : > { %v1553_v25 = vadd.f32 %v1521_v40, %v6743_v3  ;;  %v6156_v43 = vpop.eup %6155  ;;  %1762 = vst.msk [vmem:[#allocation2 + $0xc1] sm:$0xff] %vm1691_vm2, %v1673_v46  ;;  %v1642_v22 = vadd.f32 1.0, %v6154_v55  ;;  %v1458_v10 = vmul.f32 0.044715, %v6775_v51  ;;  %v6791_v63 = vpack.c.bf16 %v1834_v36, %v1833_v61 }
 0x1de   : > { %6161 = vtanh.f32 %v1582_v50  ;;  %1760 = vst.msk [vmem:[#allocation2 + $0xa9] sm:$0xff] %vm1691_vm2, %v1671_v57  ;;  %v1640_v48 = vadd.f32 1.0, %v6156_v43  ;;  %v1580_v58 = vmul.f32 0.7978846, %v1548_v12  ;;  %v1551_v1 = vadd.f32 %v1519_v30, %v6746_v15 }
 0x1df   : > { %v1585_v39 = vmul.f32 0.7978846, %v1553_v25  ;;  %v1674_v37 = vmul.f32 %v1642_v22, %v1418_v11  ;;  %v1490_v60 = vmul.f32 %v1458_v10, %v6775_v51  ;;  %v6795_v59 = vadd.f32 %v6607_v49, %v6730_v54  ;;  %5443 = vmatprep.mubr.msk.bf16.mxu0 %vm1691_vm2, %v6791_v63 }
 0x1e0   : > { %v6788_v0 = vpop.f32.mrb[28].mxu0  ;;  %v1672_v6 = vmul.f32 %v1640_v48, %v1416_v19  ;;  %6163 = vtanh.f32 %v1580_v58  ;;  %v1583_v7 = vmul.f32 0.7978846, %v1551_v1  ;;  %v6800_v8 = vadd.f32 %v5431_v21, %v6607_v49 }
 0x1e1   : > { %v6797_v4 = vpop.f32.mrb[29].mxu0  ;;  %1763 = vst.msk [vmem:[#allocation2 + $0xc9] sm:$0xff] %vm1691_vm2, %v1674_v37  ;;  %v1421_v11 = vmul.f32 0.5, %v6711_v16  ;;  %6165 = vtanh.f32 %v1585_v39  ;;  %v1522_v13 = vmul.f32 %v1490_v60, %v6775_v51  ;;  %v1456_v54 = vmul.f32 0.044715, %v6795_v59 }
 0x1e2   : > { %v6802_v44 = vpop.f32.mrb[30].mxu0  ;;  %v6158_v14 = vpop.eup %6157  ;;  %1761 = vst.msk [vmem:[#allocation2 + $0xb1] sm:$0xff] %vm1691_vm2, %v1672_v6  ;;  %v1419_v47 = vmul.f32 0.5, %v6722_v24  ;;  %6167 = vtanh.f32 %v1583_v7  ;;  %v1461_v2 = vmul.f32 0.044715, %v6800_v8  ;;  %v6816_v16 = vadd.f32 %v6607_v49, %v1301_v31  ;;  %v1837_v31 = vld [vmem:[#allocation2 + $0x61] sm:$0xff] }
 0x1e3   : > { %v6810_v5 = vpop.f32.mrb[31].mxu0  ;;  %v1645_v21 = vadd.f32 1.0, %v6158_v14  ;;  %v1554_v56 = vadd.f32 %v1522_v13, %v6775_v51  ;;  %v1488_v23 = vmul.f32 %v1456_v54, %v6795_v59  ;;  %v6820_v53 = vpack.c.bf16 %v1836_v9, %v1835_v17  ;;  %v1840_v13 = vld [vmem:[#allocation2 + $0x81] sm:$0xff] }
 0x1e4   : > { %v1422_v27 = vmul.f32 0.5, %v6726_v18  ;;  %v1493_v28 = vmul.f32 %v1461_v2, %v6800_v8  ;;  %v1459_v24 = vmul.f32 0.044715, %v6816_v16  ;;  %v6827_v29 = vadd.f32 %v6764_v34, %v6607_v49 }
 0x1e5   : > { %v6160_v32 = vpop.eup %6159  ;;  %v1677_v33 = vmul.f32 %v1645_v21, %v1421_v11  ;;  %v1586_v35 = vmul.f32 0.7978846, %v1554_v56  ;;  %v1520_v38 = vmul.f32 %v1488_v23, %v6795_v59  ;;  %5444 = vmatmul.mubr.msk.bf16.gmra.mrb[36].mxu0 %vm1691_vm2, %v6820_v53  ;;  %v6832_v40 = vpack.c.bf16 %v1838_v20, %v1837_v31  ;;  %v1839_v21 = vld [vmem:[#allocation2 + $0x79] sm:$0xff] }
 0x1e6   : > { %v1643_v18 = vadd.f32 1.0, %v6160_v32  ;;  %v1420_v41 = vmul.f32 0.5, %v6739_v62  ;;  %v1525_v46 = vmul.f32 %v1493_v28, %v6800_v8  ;;  %v1491_v50 = vmul.f32 %v1459_v24, %v6816_v16  ;;  %v1842_v56 = vld [vmem:[#allocation2 + $0x99] sm:$0xff] }
 0x1e7   : > { %1766 = vst.msk [vmem:[#allocation2 + $0xf1] sm:$0xff] %vm1691_vm2, %v1677_v33  ;;  %6169 = vtanh.f32 %v1586_v35  ;;  %v1552_v55 = vadd.f32 %v1520_v38, %v6795_v59  ;;  %v1462_v57 = vmul.f32 0.044715, %v6827_v29  ;;  %5447 = vmatprep.mubr.msk.bf16.mxu0 %vm1691_vm2, %v6832_v40  ;;  %v6844_v12 = vadd.f32 %v6607_v49, %v6771_v45  ;;  %v1841_v33 = vld [vmem:[#allocation2 + $0x91] sm:$0xff] }
 0x1e8   : > { %v6162_v34 = vpop.eup %6161  ;;  %v1675_v62 = vmul.f32 %v1643_v18, %v1419_v47  ;;  %v1557_v30 = vadd.f32 %v1525_v46, %v6800_v8  ;;  %v1523_v36 = vmul.f32 %v1491_v50, %v6816_v16  ;;  %v1425_v43 = vmul.f32 0.5, %v6743_v3  ;;  %v2321_v46 = vld [vmem:[#allocation2 + $0xca] sm:$0xff] }
 0x1e9   : > { %v1646_v25 = vadd.f32 1.0, %v6162_v34  ;;  %v1584_v22 = vmul.f32 0.7978846, %v1552_v55  ;;  %v1494_v19 = vmul.f32 %v1462_v57, %v6827_v29  ;;  %v1460_v10 = vmul.f32 0.044715, %v6844_v12  ;;  %v1844_v57 = vld [vmem:[#allocation2 + $0xb1] sm:$0xff] }
 0x1ea   : > { %v6164_v61 = vpop.eup %6163  ;;  %1764 = vst.msk [vmem:[#allocation2 + $0xd9] sm:$0xff] %vm1691_vm2, %v1675_v62  ;;  %v1589_v58 = vmul.f32 0.7978846, %v1557_v30  ;;  %v1555_v45 = vadd.f32 %v1523_v36, %v6816_v16  ;;  %v6855_v39 = vadd.f32 %v6788_v0, %v6607_v49  ;;  %v1423_v9 = vmul.f32 0.5, %v6746_v15 }
 0x1eb   : > { %v1678_v48 = vmul.f32 %v1646_v25, %v1422_v27  ;;  %v6166_v1 = vpop.eup %6165  ;;  %v1644_v37 = vadd.f32 1.0, %v6164_v61  ;;  %6171 = vtanh.f32 %v1584_v22  ;;  %v1526_v3 = vmul.f32 %v1494_v19, %v6827_v29  ;;  %v1846_v22 = vld [vmem:[#allocation2 + $0xc9] sm:$0xff] }
 0x1ec   : > { %v1492_v60 = vmul.f32 %v1460_v10, %v6844_v12  ;;  %v6168_v6 = vpop.eup %6167  ;;  %v1649_v7 = vadd.f32 1.0, %v6166_v1  ;;  %6173 = vtanh.f32 %v1589_v58  ;;  %v1587_v11 = vmul.f32 0.7978846, %v1555_v45 }
 0x1ed   : > { %1767 = vst.msk [vmem:[#allocation2 + $0xf9] sm:$0xff] %vm1691_vm2, %v1678_v48  ;;  %v1676_v54 = vmul.f32 %v1644_v37, %v1420_v41  ;;  %v1647_v14 = vadd.f32 1.0, %v6168_v6  ;;  %v1558_v0 = vadd.f32 %v1526_v3, %v6827_v29  ;;  %v1465_v17 = vmul.f32 0.044715, %v6855_v39  ;;  %v2320_v41 = vld [vmem:[#allocation2 + $0xc2] sm:$0xff] }
 0x1ee   : > { %v1524_v47 = vmul.f32 %v1492_v60, %v6844_v12  ;;  %v1681_v2 = vmul.f32 %v1649_v7, %v1425_v43  ;;  %6175 = vtanh.f32 %v1587_v11  ;;  %v6866_v20 = vadd.f32 %v6607_v49, %v6797_v4  ;;  %v1843_v43 = vld [vmem:[#allocation2 + $0xa9] sm:$0xff]  ;;  %v1845_v3 = vld [vmem:[#allocation2 + $0xc1] sm:$0xff] }
 0x1ef   : > { %1765 = vst.msk [vmem:[#allocation2 + $0xe1] sm:$0xff] %vm1691_vm2, %v1676_v54  ;;  %v1679_v15 = vmul.f32 %v1647_v14, %v1423_v9  ;;  %v1590_v23 = vmul.f32 0.7978846, %v1558_v0  ;;  %v6870_v28 = vpack.c.bf16 %v1840_v13, %v1839_v21  ;;  %v1426_v24 = vmul.f32 0.5, %v6775_v51 }
 0x1f0   : > { %v1556_v27 = vadd.f32 %v1524_v47, %v6844_v12  ;;  %1770 = vst.msk [vmem:[#allocation2 + $0x121] sm:$0xff] %vm1691_vm2, %v1681_v2  ;;  %v1497_v31 = vmul.f32 %v1465_v17, %v6855_v39  ;;  %v1463_v32 = vmul.f32 0.044715, %v6866_v20  ;;  %v6878_v4 = vadd.f32 %v6802_v44, %v6607_v49 }
 0x1f1   : > { %v6170_v35 = vpop.eup %6169  ;;  %1768 = vst.msk [vmem:[#allocation2 + $0x109] sm:$0xff] %vm1691_vm2, %v1679_v15  ;;  %6177 = vtanh.f32 %v1590_v23  ;;  %5448 = vmatmul.mubr.msk.bf16.gmra.mrb[40].mxu0 %vm1691_vm2, %v6870_v28  ;;  %v6883_v18 = vpack.c.bf16 %v1842_v56, %v1841_v33  ;;  %v6887_v51 = vadd.f32 %v6607_v49, %v6810_v5  ;;  %v1424_v44 = vmul.f32 0.5, %v6795_v59  ;;  %v6923_v23 = vld [vmem:[%s7723_s3 + $0x10] sm:$0xf] }
 0x1f2   : > { %v1588_v38 = vmul.f32 0.7978846, %v1556_v27  ;;  %v1650_v50 = vadd.f32 1.0, %v6170_v35  ;;  %v1529_v34 = vmul.f32 %v1497_v31, %v6855_v39  ;;  %v1495_v55 = vmul.f32 %v1463_v32, %v6866_v20 }
 0x1f3   : > { %v1429_v62 = vmul.f32 0.5, %v6800_v8  ;;  %v1466_v25 = vmul.f32 0.044715, %v6878_v4  ;;  %5451 = vmatprep.mubr.msk.bf16.mxu0 %vm1691_vm2, %v6883_v18  ;;  %v1464_v49 = vmul.f32 0.044715, %v6887_v51  ;;  %v6899_v36 = vpack.c.bf16 %v2321_v46, %v2320_v41  ;;  %v1847_v46 = vld [vmem:[#allocation2 + $0xd9] sm:$0xff] }
 0x1f4   : > { %6179 = vtanh.f32 %v1588_v38  ;;  %v1682_v5 = vmul.f32 %v1650_v50, %v1426_v24  ;;  %v1561_v30 = vadd.f32 %v1529_v34, %v6855_v39  ;;  %v1527_v59 = vmul.f32 %v1495_v55, %v6866_v20  ;;  %v2324_v13 = vld [vmem:[#allocation2 + $0xf2] sm:$0xff]  ;;  %v2325_v54 = vld [vmem:[#allocation2 + $0xfa] sm:$0xff] }
 0x1f5   : > { %v6172_v19 = vpop.eup %6171  ;;  %v1427_v8 = vmul.f32 0.5, %v6816_v16  ;;  %v1498_v10 = vmul.f32 %v1466_v25, %v6878_v4  ;;  %v1496_v61 = vmul.f32 %v1464_v49, %v6887_v51  ;;  %v6904_v48 = vpack.c.bf16 %v1844_v57, %v1843_v43  ;;  %5523 = vmatprep.mubr.msk.bf16.mxu1 %vm1691_vm2, %v6899_v36  ;;  %v1850_v34 = vld [vmem:[#allocation2 + $0xf9] sm:$0xff] }
 0x1f6   : > { %v6174_v58 = vpop.eup %6173  ;;  %1771 = vst.msk [vmem:[#allocation2 + $0x129] sm:$0xff] %vm1691_vm2, %v1682_v5  ;;  %v1648_v45 = vadd.f32 1.0, %v6172_v19  ;;  %v1593_v1 = vmul.f32 0.7978846, %v1561_v30  ;;  %v1559_v37 = vadd.f32 %v1527_v59, %v6866_v20  ;;  %v2322_v60 = vld [vmem:[#allocation2 + $0xda] sm:$0xff]  ;;  %v2323_v6 = vld [vmem:[#allocation2 + $0xe2] sm:$0xff]  ;;  %v6912_v11 = vpack.c.bf16 %v1846_v22, %v1845_v3 }
 0x1f7   : > { %v1653_v16 = vadd.f32 1.0, %v6174_v58  ;;  %v1530_v7 = vmul.f32 %v1498_v10, %v6878_v4  ;;  %v1528_v9 = vmul.f32 %v1496_v61, %v6887_v51  ;;  %v6914_v2 = vpack.c.bf16 %v2323_v6, %v2322_v60  ;;  %v1848_v27 = vld [vmem:[#allocation2 + $0xe1] sm:$0xff] }
 0x1f8   : > { %v6176_v14 = vpop.eup %6175  ;;  %v1680_v0 = vmul.f32 %v1648_v45, %v1424_v44  ;;  %6181 = vtanh.f32 %v1593_v1  ;;  %v1591_v47 = vmul.f32 0.7978846, %v1559_v37  ;;  %v6930_v24 = vpack.c.bf16 %v2325_v54, %v2324_v13  ;;  %v1851_v58 = vld [vmem:[#allocation2 + $0x109] sm:$0xff] }
 0x1f9   : > { %v1685_v17 = vmul.f32 %v1653_v16, %v1429_v62  ;;  %v1651_v21 = vadd.f32 1.0, %v6176_v14  ;;  %v1562_v56 = vadd.f32 %v1530_v7, %v6878_v4  ;;  %v1560_v15 = vadd.f32 %v1528_v9, %v6887_v51  ;;  %5452 = vmatmul.mubr.msk.bf16.gmra.mrb[44].mxu0 %vm1691_vm2, %v6904_v48  ;;  %5524 = vmatmul.mubr.msk.bf16.vlgmr.msra.gmra.mrb[0].mxu1 %vm1691_vm2, %v6914_v2  ;;  %v1853_v16 = vld [vmem:[#allocation2 + $0x121] sm:$0xff] }
 0x1fa   : > { %1769 = vst.msk [vmem:[#allocation2 + $0x111] sm:$0xff] %vm1691_vm2, %v1680_v0  ;;  %6183 = vtanh.f32 %v1591_v47  ;;  %5455 = vmatprep.mubr.msk.bf16.mxu0 %vm1691_vm2, %v6912_v11  ;;  %5540 = vmatpush3.bf16.msra.mxu1 %v6635_v52  ;;  %v1430_v38 = vmul.f32 0.5, %v6827_v29  ;;  %v6940_v44 = vpack.c.bf16 %v1848_v27, %v1847_v46  ;;  %v1428_v52 = vmul.f32 0.5, %v6844_v12  ;;  %v1849_v29 = vld [vmem:[#allocation2 + $0xf1] sm:$0xff] }
 0x1fb   : > { %v6178_v31 = vpop.eup %6177  ;;  %1774 = vst.msk [vmem:[#allocation2 + $0x151] sm:$0xff] %vm1691_vm2, %v1685_v17  ;;  %v1683_v32 = vmul.f32 %v1651_v21, %v1427_v8  ;;  %v1594_v33 = vmul.f32 0.7978846, %v1562_v56  ;;  %v1592_v35 = vmul.f32 0.7978846, %v1560_v15  ;;  %5527 = vmatprep.mubr.msk.bf16.mxu1 %vm1691_vm2, %v6930_v24  ;;  %6106 = vmatprep.subr.msk.bf16.mxu1 %vm1927_vm4, %v6923_v23  ;;  %v6944_v25 = vpack.c.bf16 %v1850_v34, %v1849_v29  ;;  %v1781_v34 = vld [vmem:[#allocation2 + $0x8] sm:$0xff] }
 0x1fc   : > { %v1654_v41 = vadd.f32 1.0, %v6178_v31  ;;  %v1433_v19 = vmul.f32 0.5, %v6855_v39  ;;  %v1431_v1 = vmul.f32 0.5, %v6866_v20  ;;  %v1434_v9 = vmul.f32 0.5, %v6878_v4 }
 0x1fd   : > { %1772 = vst.msk [vmem:[#allocation2 + $0x139] sm:$0xff] %vm1691_vm2, %v1683_v32  ;;  %6185 = vtanh.f32 %v1594_v33  ;;  %v2328_v49 = vld [vmem:[#allocation2 + $0x122] sm:$0xff]  ;;  %v2329_v5 = vld [vmem:[#allocation2 + $0x12a] sm:$0xff]  ;;  %v1432_v0 = vmul.f32 0.5, %v6887_v51 }
 0x1fe   : > { %v6180_v50 = vpop.eup %6179  ;;  %v1686_v55 = vmul.f32 %v1654_v41, %v1430_v38  ;;  %6187 = vtanh.f32 %v1592_v35  ;;  %v6954_v10 = vpack.c.bf16 %v2329_v5, %v2328_v49  ;;  %v1854_v60 = vld [vmem:[#allocation2 + $0x129] sm:$0xff]  ;;  %v1780_v41 = vld [vmem:[#allocation2] sm:$0xff]  ;;  %v2598_v49 = vld [vmem:[#allocation2 + $0x18] sm:$0xff] }
 0x1ff   : > { %v1652_v57 = vadd.f32 1.0, %v6180_v50  ;;  %v6965_v54 = vpack.c.bf16 %v1854_v60, %v1853_v16  ;;  %v2599_v50 = vld [vmem:[#allocation2 + $0x20] sm:$0xff]  ;;  %v2611_v16 = vld [vmem:[#allocation2 + $0xb0] sm:$0xff] }
 0x200   : > { %1775 = vst.msk [vmem:[#allocation2 + $0x159] sm:$0xff] %vm1691_vm2, %v1686_v55  ;;  %v2630_v5 = vpack.c.bf16 %v2599_v50, %v2598_v49 }
 0x201   : > { %v1684_v62 = vmul.f32 %v1652_v57, %v1428_v52  ;;  %5456 = vmatmul.mubr.msk.bf16.gmra.mrb[48].mxu0 %vm1691_vm2, %v6940_v44  ;;  %v2326_v30 = vld [vmem:[#allocation2 + $0x10a] sm:$0xff]  ;;  %v2327_v59 = vld [vmem:[#allocation2 + $0x112] sm:$0xff] }
 0x202   : > { %v6182_v43 = vpop.eup %6181  ;;  %5459 = vmatprep.mubr.msk.bf16.mxu0 %vm1691_vm2, %v6944_v25  ;;  %v1852_v12 = vld [vmem:[#allocation2 + $0x111] sm:$0xff]  ;;  %v6951_v22 = vpack.c.bf16 %v2327_v59, %v2326_v30  ;;  %v1812_v30 = vpack.c.bf16 %v1781_v34, %v1780_v41  ;;  %v2620_v34 = vld [vmem:[#allocation2 + $0x120] sm:$0xff] }
 0x203   : > { %1773 = vst.msk [vmem:[#allocation2 + $0x141] sm:$0xff] %vm1691_vm2, %v1684_v62  ;;  %v1657_v8 = vadd.f32 1.0, %v6182_v43  ;;  %v6959_v3 = vpack.c.bf16 %v1852_v12, %v1851_v58  ;;  %v1857_v35 = vld [vmem:[#allocation2 + $0x151] sm:$0xff] }
 0x204   : > { %v6184_v61 = vpop.eup %6183  ;;  %5528 = vmatmul.mubr.msk.bf16.gmra.mrb[4].mxu1 %vm1691_vm2, %v6951_v22  ;;  %v1855_v32 = vld [vmem:[#allocation2 + $0x139] sm:$0xff]  ;;  %v2603_v43 = vld [vmem:[#allocation2 + $0x50] sm:$0xff] }
 0x205   : > { %v1689_v45 = vmul.f32 %v1657_v8, %v1433_v19  ;;  %v1655_v37 = vadd.f32 1.0, %v6184_v61  ;;  %5531 = vmatprep.mubr.msk.bf16.mxu1 %vm1691_vm2, %v6954_v10  ;;  %v2601_v59 = vld [vmem:[#allocation2 + $0x38] sm:$0xff]  ;;  %v2600_v12 = vld [vmem:[#allocation2 + $0x30] sm:$0xff]  ;;  %v2991_v8 = vsel %vm1927_vm4, %v6923_v23, 0  ;;  %v2602_v61 = vld [vmem:[#allocation2 + $0x48] sm:$0xff] }
 0x206   : > { %v7001_v19 = vpack.c.bf16 %v2601_v59, %v2600_v12  ;;  %v7005_v58 = vpack.c.bf16 %v2603_v43, %v2602_v61  ;;  %v2605_v23 = vld [vmem:[#allocation2 + $0x68] sm:$0xff] }
 0x207   : > { %v6186_v6 = vpop.eup %6185  ;;  %1778 = vst.msk [vmem:[#allocation2 + $0x181] sm:$0xff] %vm1691_vm2, %v1689_v45  ;;  %v1687_v39 = vmul.f32 %v1655_v37, %v1431_v1  ;;  %v2332_v14 = vld [vmem:[#allocation2 + $0x152] sm:$0xff]  ;;  %v2333_v20 = vld [vmem:[#allocation2 + $0x15a] sm:$0xff]  ;;  %v2304_v61 = vld [vmem:[#allocation2 + $0x2] sm:$0xff] }
 0x208   : > { %v6188_v7 = vpop.eup %6187  ;;  %v1658_v13 = vadd.f32 1.0, %v6186_v6  ;;  %v6975_v31 = vpack.c.bf16 %v2333_v20, %v2332_v14  ;;  %v1858_v33 = vld [vmem:[#allocation2 + $0x159] sm:$0xff]  ;;  %v7010_v45 = vld [vmem:[%s7723_s3 + $0x14] sm:$0xf]  ;;  %v2613_v20 = vld [vmem:[#allocation2 + $0xc8] sm:$0xff] }
 0x209   : > { %1776 = vst.msk [vmem:[#allocation2 + $0x169] sm:$0xff] %vm1691_vm2, %v1687_v39  ;;  %v1656_v47 = vadd.f32 1.0, %v6188_v7  ;;  %5460 = vmatmul.mubr.msk.bf16.gmra.mrb[52].mxu0 %vm1691_vm2, %v6959_v3  ;;  %v6985_v38 = vpack.c.bf16 %v1858_v33, %v1857_v35  ;;  %v2607_v1 = vld [vmem:[#allocation2 + $0x80] sm:$0xff]  ;;  %v2606_v6 = vld [vmem:[#allocation2 + $0x78] sm:$0xff]  ;;  %v2608_v7 = vld [vmem:[#allocation2 + $0x90] sm:$0xff] }
 0x20a   : > { %v2330_v17 = vld [vmem:[#allocation2 + $0x13a] sm:$0xff]  ;;  %v2331_v21 = vld [vmem:[#allocation2 + $0x142] sm:$0xff]  ;;  %v1690_v56 = vmul.f32 %v1658_v13, %v1434_v9  ;;  %5463 = vmatprep.mubr.msk.bf16.mxu0 %vm1691_vm2, %v6965_v54  ;;  %v7024_v39 = vpack.c.bf16 %v2607_v1, %v2606_v6 }
 0x20b   : > { %v1856_v4 = vld [vmem:[#allocation2 + $0x141] sm:$0xff]  ;;  %v6973_v15 = vpack.c.bf16 %v2331_v21, %v2330_v17  ;;  %v1688_v27 = vmul.f32 %v1656_v47, %v1432_v0  ;;  %v2614_v21 = vld [vmem:[#allocation2 + $0xd8] sm:$0xff] }
 0x20c   : > { %1779 = vst.msk [vmem:[#allocation2 + $0x189] sm:$0xff] %vm1691_vm2, %v1690_v56  ;;  %v6981_v51 = vpack.c.bf16 %v1856_v4, %v1855_v32  ;;  %v2604_v37 = vld [vmem:[#allocation2 + $0x60] sm:$0xff]  ;;  %v2610_v13 = vld [vmem:[#allocation2 + $0xa8] sm:$0xff]  ;;  %v2617_v4 = vld [vmem:[#allocation2 + $0xf8] sm:$0xff] }
 0x20d   : > { %5532 = vmatmul.mubr.msk.bf16.gmra.mrb[8].mxu1 %vm1691_vm2, %v6973_v15  ;;  %1777 = vst.msk [vmem:[#allocation2 + $0x171] sm:$0xff] %vm1691_vm2, %v1688_v27  ;;  %v7022_v60 = vpack.c.bf16 %v2605_v23, %v2604_v37  ;;  %v7036_v14 = vpack.c.bf16 %v2611_v16, %v2610_v13  ;;  %v2615_v0 = vld [vmem:[#allocation2 + $0xe0] sm:$0xff]  ;;  %v2619_v27 = vld [vmem:[#allocation2 + $0x110] sm:$0xff]  ;;  %v2618_v35 = vld [vmem:[#allocation2 + $0x108] sm:$0xff] }
 0x20e   : > { %5535 = vmatprep.mubr.msk.bf16.mxu1 %vm1691_vm2, %v6975_v31  ;;  %v2612_v47 = vld [vmem:[#allocation2 + $0xc0] sm:$0xff]  ;;  %v7048_v56 = vpack.c.bf16 %v2615_v0, %v2614_v21  ;;  %v2616_v32 = vld [vmem:[#allocation2 + $0xf0] sm:$0xff]  ;;  %v7060_v41 = vpack.c.bf16 %v2619_v27, %v2618_v35  ;;  %v2625_v49 = vld [vmem:[#allocation2 + $0x158] sm:$0xff] }
 0x20f   : > { %v7046_v17 = vpack.c.bf16 %v2613_v20, %v2612_v47  ;;  %v7058_v33 = vpack.c.bf16 %v2617_v4, %v2616_v32  ;;  %v2623_v50 = vld [vmem:[#allocation2 + $0x140] sm:$0xff]  ;;  %v2305_v23 = vld [vmem:[#allocation2 + $0xa] sm:$0xff]  ;;  %v2308_v13 = vld [vmem:[#allocation2 + $0x32] sm:$0xff] }
 0x210   : > { %v1859_v46 = vld [vmem:[#allocation2 + $0x169] sm:$0xff]  ;;  %v2628_v1 = vld [vmem:[#allocation2 + $0x180] sm:$0xff]  ;;  %v2336_v6 = vpack.c.bf16 %v2305_v23, %v2304_v61  ;;  %v5025_v0 = vld [vmem:[%s7723_s3 + $0x18] sm:$0xf] }
 0x211   : > { %5464 = vmatmul.mubr.msk.bf16.gmra.mrb[56].mxu0 %vm1691_vm2, %v6981_v51  ;;  %v2626_v43 = vld [vmem:[#allocation2 + $0x168] sm:$0xff]  ;;  %v2309_v20 = vld [vmem:[#allocation2 + $0x3a] sm:$0xff]  ;;  %v2311_v21 = vld [vmem:[#allocation2 + $0x52] sm:$0xff]  ;;  %v3580_v61 = vsel %vm1927_vm4, %v5025_v0, 0 }
 0x212   : > { %5467 = vmatprep.mubr.msk.bf16.mxu0 %vm1691_vm2, %v6985_v38  ;;  %v2307_v16 = vld [vmem:[#allocation2 + $0x22] sm:$0xff]  ;;  %v2313_v27 = vld [vmem:[#allocation2 + $0x6a] sm:$0xff]  ;;  %v5042_v23 = vld [vmem:[%s7723_s3 + $0x1c] sm:$0xf] }
 0x213   : > { %v2312_v4 = vld [vmem:[#allocation2 + $0x62] sm:$0xff] }
 0x214   : > { %v1860_v55 = vld [vmem:[#allocation2 + $0x171] sm:$0xff]  ;;  %v2315_v35 = vld [vmem:[#allocation2 + $0x82] sm:$0xff] }
 0x215   : > { %v2334_v52 = vld [vmem:[#allocation2 + $0x16a] sm:$0xff]  ;;  %v2335_v57 = vld [vmem:[#allocation2 + $0x172] sm:$0xff]  ;;  %v6991_v29 = vpack.c.bf16 %v1860_v55, %v1859_v46 }
 0x216   : > { %v6993_v62 = vpack.c.bf16 %v2335_v57, %v2334_v52  ;;  %v2621_v46 = vld [vmem:[#allocation2 + $0x128] sm:$0xff]  ;;  %v2622_v52 = vld [vmem:[#allocation2 + $0x138] sm:$0xff] }
 0x217   : > { %v7070_v55 = vpack.c.bf16 %v2621_v46, %v2620_v34  ;;  %v7072_v57 = vpack.c.bf16 %v2623_v50, %v2622_v52  ;;  %v2316_v46 = vld [vmem:[#allocation2 + $0x92] sm:$0xff]  ;;  %v2317_v50 = vld [vmem:[#allocation2 + $0x9a] sm:$0xff]  ;;  %v2318_v52 = vld [vmem:[#allocation2 + $0xaa] sm:$0xff] }
 0x218   : > { %5536 = vmatmul.mubr.msk.bf16.gmra.mrb[12].mxu1 %vm1691_vm2, %v6993_v62 }
 0x219   : > { %5541 = vmatprep.mubr.msk.bf16.mxu1 %vm1691_vm2, %v2630_v5  ;;  %5468 = vmatmul.mubr.msk.bf16.gmra.mrb[60].mxu0 %vm1691_vm2, %v6991_v29 }
 0x21a   : > { %5473 = vmatprep.mubr.msk.bf16.mxu0 %vm1691_vm2, %v1812_v30  ;;  %v2624_v30 = vld [vmem:[#allocation2 + $0x150] sm:$0xff] }
 0x21b   : > { %v7082_v59 = vpack.c.bf16 %v2625_v49, %v2624_v30  ;;  %v2319_v49 = vld [vmem:[#allocation2 + $0xb2] sm:$0xff]  ;;  %v2923_v30 = vld [vmem:[#allocation2 + $0x189] sm:$0xff] }
 0x220   : > { %5542 = vmatmul.mubr.msk.bf16.vlgmr.msra.gmra.mrb[16].mxu1 %vm1691_vm2, %v7001_v19 }
 0x221   : > { %5574 = vmatpush3.bf16.msra.mxu1 %v2991_v8  ;;  %5545 = vmatprep.mubr.msk.bf16.mxu1 %vm1691_vm2, %v7005_v58  ;;  %v2629_v8 = vld [vmem:[#allocation2 + $0x188] sm:$0xff] }
 0x222   : > { %5474 = vmatmul.mubr.msk.bf16.vlgmr.msra.gmra.mrb[32].mxu0 %vm1691_vm2, %v2630_v5  ;;  %6107 = vmatprep.subr.msk.bf16.mxu1 %vm1927_vm4, %v7010_v45  ;;  %v2627_v5 = vld [vmem:[#allocation2 + $0x170] sm:$0xff]  ;;  %v7094_v37 = vpack.c.bf16 %v2629_v8, %v2628_v1 }
 0x223   : > { %5477 = vmatprep.mubr.msk.bf16.mxu0 %vm1691_vm2, %v7001_v19  ;;  %5506 = vmatpush3.bf16.msra.mxu0 %v6593_v42  ;;  %v2609_v42 = vld [vmem:[#allocation2 + $0x98] sm:$0xff]  ;;  %v7084_v12 = vpack.c.bf16 %v2627_v5, %v2626_v43  ;;  %v7142_v5 = vpack.c.bf16 %v2319_v49, %v2318_v52  ;;  %v2922_v43 = vld [vmem:[#allocation2 + $0x181] sm:$0xff] }
 0x224   : > { %v7034_v9 = vpack.c.bf16 %v2609_v42, %v2608_v7  ;;  %v2306_v42 = vld [vmem:[#allocation2 + $0x1a] sm:$0xff]  ;;  %v3285_v7 = vsel %vm1927_vm4, %v7010_v45, 0  ;;  %v2310_v45 = vld [vmem:[#allocation2 + $0x4a] sm:$0xff]  ;;  %v7162_v8 = vpack.c.bf16 %v2923_v30, %v2922_v43 }
 0x225   : > { %v2337_v47 = vpack.c.bf16 %v2307_v16, %v2306_v42  ;;  %v7118_v32 = vpack.c.bf16 %v2311_v21, %v2310_v45  ;;  %v3805_v30 = vld [vmem:[#allocation2 + $0x199] sm:$0xff]  ;;  %v3806_v43 = vld [vmem:[#allocation2 + $0x1a1] sm:$0xff] }
 0x228   : > { %5546 = vmatmul.mubr.msk.bf16.gmra.mrb[20].mxu1 %vm1691_vm2, %v7022_v60 }
 0x229   : > { %5549 = vmatprep.mubr.msk.bf16.mxu1 %vm1691_vm2, %v7024_v39 }
 0x22a   : > { %5478 = vmatmul.mubr.msk.bf16.gmra.mrb[36].mxu0 %vm1691_vm2, %v7005_v58 }
 0x22b   : > { %5481 = vmatprep.mubr.msk.bf16.mxu0 %vm1691_vm2, %v7022_v60 }
 0x230   : > { %5550 = vmatmul.mubr.msk.bf16.gmra.mrb[24].mxu1 %vm1691_vm2, %v7034_v9 }
 0x231   : > { %5553 = vmatprep.mubr.msk.bf16.mxu1 %vm1691_vm2, %v7036_v14 }
 0x232   : > { %5482 = vmatmul.mubr.msk.bf16.gmra.mrb[40].mxu0 %vm1691_vm2, %v7024_v39 }
 0x233   : > { %5485 = vmatprep.mubr.msk.bf16.mxu0 %vm1691_vm2, %v7034_v9 }
 0x238   : > { %5554 = vmatmul.mubr.msk.bf16.gmra.mrb[28].mxu1 %vm1691_vm2, %v7046_v17 }
 0x239   : > { %5557 = vmatprep.mubr.msk.bf16.mxu1 %vm1691_vm2, %v7048_v56 }
 0x23a   : > { %5486 = vmatmul.mubr.msk.bf16.gmra.mrb[44].mxu0 %vm1691_vm2, %v7036_v14 }
 0x23b   : > { %5489 = vmatprep.mubr.msk.bf16.mxu0 %vm1691_vm2, %v7046_v17 }
 0x240   : > { %5558 = vmatmul.mubr.msk.bf16.gmra.mrb[0].mxu1 %vm1691_vm2, %v7058_v33 }
 0x241   : > { %5561 = vmatprep.mubr.msk.bf16.mxu1 %vm1691_vm2, %v7060_v41 }
 0x242   : > { %5490 = vmatmul.mubr.msk.bf16.gmra.mrb[48].mxu0 %vm1691_vm2, %v7048_v56 }
 0x243   : > { %5493 = vmatprep.mubr.msk.bf16.mxu0 %vm1691_vm2, %v7058_v33 }
 0x248   : > { %5562 = vmatmul.mubr.msk.bf16.gmra.mrb[4].mxu1 %vm1691_vm2, %v7070_v55 }
 0x249   : > { %5565 = vmatprep.mubr.msk.bf16.mxu1 %vm1691_vm2, %v7072_v57 }
 0x24a   : > { %5494 = vmatmul.mubr.msk.bf16.gmra.mrb[52].mxu0 %vm1691_vm2, %v7060_v41 }
 0x24b   : > { %5497 = vmatprep.mubr.msk.bf16.mxu0 %vm1691_vm2, %v7070_v55 }
 0x250   : > { %5566 = vmatmul.mubr.msk.bf16.gmra.mrb[8].mxu1 %vm1691_vm2, %v7082_v59 }
 0x251   : > { %5569 = vmatprep.mubr.msk.bf16.mxu1 %vm1691_vm2, %v7084_v12 }
 0x252   : > { %5498 = vmatmul.mubr.msk.bf16.gmra.mrb[56].mxu0 %vm1691_vm2, %v7072_v57 }
 0x253   : > { %5501 = vmatprep.mubr.msk.bf16.mxu0 %vm1691_vm2, %v7082_v59 }
 0x258   : > { %5570 = vmatmul.mubr.msk.bf16.gmra.mrb[12].mxu1 %vm1691_vm2, %v7094_v37 }
 0x259   : > { %5575 = vmatprep.mubr.msk.bf16.mxu1 %vm1691_vm2, %v6761_v26  ;;  %v7110_v26 = vpack.c.bf16 %v2309_v20, %v2308_v13 }
 0x25a   : > { %5502 = vmatmul.mubr.msk.bf16.gmra.mrb[60].mxu0 %vm1691_vm2, %v7084_v12 }
 0x25b   : > { %5507 = vmatprep.mubr.msk.bf16.mxu0 %vm1691_vm2, %v2336_v6 }
 0x260   : > { %5576 = vmatmul.mubr.msk.bf16.vlgmr.msra.gmra.mrb[16].mxu1 %vm1691_vm2, %v6791_v63  ;;  %v7122_v63 = vpack.c.bf16 %v2313_v27, %v2312_v4 }
 0x261   : > { %5608 = vmatpush3.bf16.msra.mxu1 %v3285_v7  ;;  %5579 = vmatprep.mubr.msk.bf16.mxu1 %vm1691_vm2, %v6820_v53  ;;  %v2314_v53 = vld [vmem:[#allocation2 + $0x7a] sm:$0xff] }
 0x262   : > { %5508 = vmatmul.mubr.msk.bf16.vlgmr.msra.gmra.mrb[32].mxu0 %vm1691_vm2, %v2337_v47  ;;  %6108 = vmatprep.subr.msk.bf16.mxu1 %vm1927_vm4, %v5025_v0  ;;  %v7130_v34 = vpack.c.bf16 %v2315_v35, %v2314_v53 }
 0x263   : > { %5511 = vmatprep.mubr.msk.bf16.mxu0 %vm1691_vm2, %v7110_v26 }
 0x268   : > { %5580 = vmatmul.mubr.msk.bf16.gmra.mrb[20].mxu1 %vm1691_vm2, %v6832_v40  ;;  %v7134_v40 = vpack.c.bf16 %v2317_v50, %v2316_v46 }
 0x269   : > { %5583 = vmatprep.mubr.msk.bf16.mxu1 %vm1691_vm2, %v6870_v28 }
 0x26a   : > { %5512 = vmatmul.mubr.msk.bf16.gmra.mrb[36].mxu0 %vm1691_vm2, %v7118_v32 }
 0x26b   : > { %5515 = vmatprep.mubr.msk.bf16.mxu0 %vm1691_vm2, %v7122_v63 }
 0x270   : > { %5584 = vmatmul.mubr.msk.bf16.gmra.mrb[24].mxu1 %vm1691_vm2, %v6883_v18 }
 0x271   : > { %5587 = vmatprep.mubr.msk.bf16.mxu1 %vm1691_vm2, %v6904_v48 }
 0x272   : > { %5516 = vmatmul.mubr.msk.bf16.gmra.mrb[40].mxu0 %vm1691_vm2, %v7130_v34 }
 0x273   : > { %5519 = vmatprep.mubr.msk.bf16.mxu0 %vm1691_vm2, %v7134_v40 }
 0x278   : > { %5588 = vmatmul.mubr.msk.bf16.gmra.mrb[28].mxu1 %vm1691_vm2, %v6912_v11 }
 0x279   : > { %5591 = vmatprep.mubr.msk.bf16.mxu1 %vm1691_vm2, %v6940_v44 }
 0x27a   : > { %5520 = vmatmul.mubr.msk.bf16.gmra.mrb[44].mxu0 %vm1691_vm2, %v7142_v5 }
 0x280   : > { %5592 = vmatmul.mubr.msk.bf16.gmra.mrb[0].mxu1 %vm1691_vm2, %v6944_v25 }
 0x281   : > { %5595 = vmatprep.mubr.msk.bf16.mxu1 %vm1691_vm2, %v6959_v3 }
 0x288   : > { %5596 = vmatmul.mubr.msk.bf16.gmra.mrb[4].mxu1 %vm1691_vm2, %v6965_v54 }
 0x289   : > { %5599 = vmatprep.mubr.msk.bf16.mxu1 %vm1691_vm2, %v6981_v51 }
 0x290   : > { %5600 = vmatmul.mubr.msk.bf16.gmra.mrb[8].mxu1 %vm1691_vm2, %v6985_v38 }
 0x291   : > { %5603 = vmatprep.mubr.msk.bf16.mxu1 %vm1691_vm2, %v6991_v29 }
 0x298   : > { %5604 = vmatmul.mubr.msk.bf16.gmra.mrb[12].mxu1 %vm1691_vm2, %v7162_v8 }
 0x299   : > { %5609 = vmatprep.mubr.msk.bf16.mxu1 %vm1691_vm2, %v2337_v47 }
 0x2a0   : > { %5610 = vmatmul.mubr.msk.bf16.vlgmr.msra.gmra.mrb[16].mxu1 %vm1691_vm2, %v7110_v26 }
 0x2a1   : > { %5642 = vmatpush3.bf16.msra.mxu1 %v3580_v61  ;;  %5613 = vmatprep.mubr.msk.bf16.mxu1 %vm1691_vm2, %v7118_v32  ;;  %v4084_v61 = vld [vmem:[#allocation2 + $0xe2] sm:$0xff] }
 0x2a2   : > { %6109 = vmatprep.subr.msk.bf16.mxu1 %vm1927_vm4, %v5042_v23 }
 0x2a8   : > { %5614 = vmatmul.mubr.msk.bf16.gmra.mrb[20].mxu1 %vm1691_vm2, %v7122_v63 }
 0x2a9   : > { %5617 = vmatprep.mubr.msk.bf16.mxu1 %vm1691_vm2, %v7130_v34 }
 0x2b0   : > { %5618 = vmatmul.mubr.msk.bf16.gmra.mrb[24].mxu1 %vm1691_vm2, %v7134_v40 }
 0x2b1   : > { %5621 = vmatprep.mubr.msk.bf16.mxu1 %vm1691_vm2, %v7142_v5 }
 0x2b8   : > { %5622 = vmatmul.mubr.msk.bf16.gmra.mrb[28].mxu1 %vm1691_vm2, %v6899_v36  ;;  %v3216_v36 = vld [vmem:[#allocation2 + $0x182] sm:$0xff] }
 0x2b9   : > { %5625 = vmatprep.mubr.msk.bf16.mxu1 %vm1691_vm2, %v6914_v2  ;;  %v3217_v2 = vld [vmem:[#allocation2 + $0x18a] sm:$0xff] }
 0x2ba   : > { %v7200_v1 = vpack.c.bf16 %v3217_v2, %v3216_v36  ;;  %v4089_v2 = vld [vmem:[#allocation2 + $0x122] sm:$0xff] }
 0x2c0   : > { %5626 = vmatmul.mubr.msk.bf16.gmra.mrb[0].mxu1 %vm1691_vm2, %v6930_v24  ;;  %v3874_v24 = vsel %vm1927_vm4, %v5042_v23, 0  ;;  %v4086_v23 = vld [vmem:[#allocation2 + $0xfa] sm:$0xff] }
 0x2c1   : > { %5629 = vmatprep.mubr.msk.bf16.mxu1 %vm1691_vm2, %v6951_v22  ;;  %v5059_v22 = vld [vmem:[%s7723_s3 + $0x20] sm:$0xf] }
 0x2c8   : > { %5630 = vmatmul.mubr.msk.bf16.gmra.mrb[4].mxu1 %vm1691_vm2, %v6954_v10  ;;  %v3511_v10 = vld [vmem:[#allocation2 + $0x198] sm:$0xff] }
 0x2c9   : > { %5633 = vmatprep.mubr.msk.bf16.mxu1 %vm1691_vm2, %v6973_v15  ;;  %v3512_v15 = vld [vmem:[#allocation2 + $0x1a0] sm:$0xff] }
 0x2d0   : > { %5634 = vmatmul.mubr.msk.bf16.gmra.mrb[8].mxu1 %vm1691_vm2, %v6975_v31  ;;  %v3528_v31 = vpack.c.bf16 %v3512_v15, %v3511_v10  ;;  %v4092_v15 = vld [vmem:[#allocation2 + $0x142] sm:$0xff] }
 0x2d1   : > { %5637 = vmatprep.mubr.msk.bf16.mxu1 %vm1691_vm2, %v6993_v62  ;;  %v3776_v62 = vld [vmem:[#allocation2 + $0x39] sm:$0xff] }
 0x2d8   : > { %5638 = vmatmul.mubr.msk.bf16.gmra.mrb[12].mxu1 %vm1691_vm2, %v7200_v1 }
 0x2d9   : > { %5643 = vmatprep.mubr.msk.bf16.mxu1 %vm1691_vm2, %v7001_v19 }
 0x2e0   : > { %5644 = vmatmul.mubr.msk.bf16.vlgmr.msra.gmra.mrb[16].mxu1 %vm1691_vm2, %v7005_v58 }
 0x2e1   : > { %5676 = vmatpush3.bf16.msra.mxu1 %v3874_v24  ;;  %5647 = vmatprep.mubr.msk.bf16.mxu1 %vm1691_vm2, %v7022_v60  ;;  %v3775_v60 = vld [vmem:[#allocation2 + $0x31] sm:$0xff] }
 0x2e2   : > { %6110 = vmatprep.subr.msk.bf16.mxu1 %vm1927_vm4, %v5059_v22  ;;  %v4090_v24 = vld [vmem:[#allocation2 + $0x12a] sm:$0xff] }
 0x2e3   : > { %v4111_v10 = vpack.c.bf16 %v4090_v24, %v4089_v2 }
 0x2e8   : > { %5648 = vmatmul.mubr.msk.bf16.gmra.mrb[20].mxu1 %vm1691_vm2, %v7024_v39 }
 0x2e9   : > { %5651 = vmatprep.mubr.msk.bf16.mxu1 %vm1691_vm2, %v7034_v9  ;;  %v3807_v9 = vpack.c.bf16 %v3776_v62, %v3775_v60  ;;  %v4094_v62 = vld [vmem:[#allocation2 + $0x15a] sm:$0xff] }
 0x2f0   : > { %5652 = vmatmul.mubr.msk.bf16.gmra.mrb[24].mxu1 %vm1691_vm2, %v7036_v14 }
 0x2f1   : > { %5655 = vmatprep.mubr.msk.bf16.mxu1 %vm1691_vm2, %v7046_v17  ;;  %v3778_v17 = vld [vmem:[#allocation2 + $0x51] sm:$0xff] }
 0x2f8   : > { %5656 = vmatmul.mubr.msk.bf16.gmra.mrb[28].mxu1 %vm1691_vm2, %v7048_v56  ;;  %v3780_v56 = vld [vmem:[#allocation2 + $0x69] sm:$0xff] }
 0x2f9   : > { %5659 = vmatprep.mubr.msk.bf16.mxu1 %vm1691_vm2, %v7058_v33 }
 0x300   : > { %5660 = vmatmul.mubr.msk.bf16.gmra.mrb[0].mxu1 %vm1691_vm2, %v7060_v41  ;;  %v3777_v41 = vld [vmem:[#allocation2 + $0x49] sm:$0xff] }
 0x301   : > { %5663 = vmatprep.mubr.msk.bf16.mxu1 %vm1691_vm2, %v7070_v55 }
 0x308   : > { %5664 = vmatmul.mubr.msk.bf16.gmra.mrb[4].mxu1 %vm1691_vm2, %v7072_v57  ;;  %v3808_v57 = vpack.c.bf16 %v3778_v17, %v3777_v41  ;;  %v4095_v17 = vld [vmem:[#allocation2 + $0x16a] sm:$0xff] }
 0x309   : > { %5667 = vmatprep.mubr.msk.bf16.mxu1 %vm1691_vm2, %v7082_v59  ;;  %v4168_v59 = vsel %vm1927_vm4, %v5059_v22, 0 }
 0x310   : > { %5668 = vmatmul.mubr.msk.bf16.gmra.mrb[8].mxu1 %vm1691_vm2, %v7084_v12  ;;  %v3779_v12 = vld [vmem:[#allocation2 + $0x61] sm:$0xff] }
 0x311   : > { %5671 = vmatprep.mubr.msk.bf16.mxu1 %vm1691_vm2, %v7094_v37  ;;  %v3809_v6 = vpack.c.bf16 %v3780_v56, %v3779_v12  ;;  %v4096_v56 = vld [vmem:[#allocation2 + $0x172] sm:$0xff] }
 0x312   : > { %v4114_v41 = vpack.c.bf16 %v4096_v56, %v4095_v17 }
 0x315   : > { %v7239_v19 = vpop.f32.mrb[48].mxu0 }
 0x316   : > { %v7241_v58 = vpop.f32.mrb[49].mxu0 }
 0x317   : > { %v7243_v39 = vpop.f32.mrb[50].mxu0 }
 0x318   : > { %v7245_v14 = vpop.f32.mrb[51].mxu0  ;;  %5672 = vmatmul.mubr.msk.bf16.gmra.mrb[12].mxu1 %vm1691_vm2, %v3528_v31  ;;  %v4093_v31 = vld [vmem:[#allocation2 + $0x152] sm:$0xff] }
 0x319   : > { %5677 = vmatprep.mubr.msk.bf16.mxu1 %vm1691_vm2, %v3807_v9  ;;  %v4113_v9 = vpack.c.bf16 %v4094_v62, %v4093_v31 }
 0x31d   : > { %v7249_v33 = vpop.f32.mrb[52].mxu0 }
 0x31e   : > { %v7251_v55 = vpop.f32.mrb[53].mxu0 }
 0x31f   : > { %v7254_v37 = vpop.f32.mrb[54].mxu0 }
 0x320   : > { %v7256_v42 = vpop.f32.mrb[55].mxu0  ;;  %5678 = vmatmul.mubr.msk.bf16.vlgmr.msra.gmra.mrb[16].mxu1 %vm1691_vm2, %v3808_v57  ;;  %v4099_v57 = vld [vmem:[#allocation2 + $0x19a] sm:$0xff] }
 0x321   : > { %5710 = vmatpush3.bf16.msra.mxu1 %v4168_v59  ;;  %5681 = vmatprep.mubr.msk.bf16.mxu1 %vm1691_vm2, %v3809_v6  ;;  %v4100_v59 = vld [vmem:[#allocation2 + $0x1a2] sm:$0xff] }
 0x322   : > { %v4116_v12 = vpack.c.bf16 %v4100_v59, %v4099_v57 }
 0x325   : > { %v7260_v16 = vpop.f32.mrb[56].mxu0 }
 0x326   : > { %v7262_v7 = vpop.f32.mrb[57].mxu0 }
 0x327   : > { %v7264_v13 = vpop.f32.mrb[58].mxu0 }
 0x328   : > { %v7266_v20 = vpop.f32.mrb[59].mxu0  ;;  %5682 = vmatmul.mubr.msk.bf16.gmra.mrb[20].mxu1 %vm1691_vm2, %v6870_v28 }
 0x329   : > { %5685 = vmatprep.mubr.msk.bf16.mxu1 %vm1691_vm2, %v6883_v18 }
 0x32d   : > { %v7272_v0 = vpop.f32.mrb[60].mxu0 }
 0x32e   : > { %v7274_v47 = vpop.f32.mrb[61].mxu0 }
 0x32f   : > { %v7276_v45 = vpop.f32.mrb[62].mxu0 }
 0x330   : > { %v7278_v21 = vpop.f32.mrb[63].mxu0  ;;  %5686 = vmatmul.mubr.msk.bf16.gmra.mrb[24].mxu1 %vm1691_vm2, %v6904_v48 }
 0x331   : > { %5689 = vmatprep.mubr.msk.bf16.mxu1 %vm1691_vm2, %v6912_v11 }
 0x335   : > { %v7284_v4 = vpop.f32.mrb[32].mxu0 }
 0x336   : > { %v7286_v28 = vpop.f32.mrb[33].mxu0 }
 0x337   : > { %v7288_v27 = vpop.f32.mrb[34].mxu0 }
 0x338   : > { %v7290_v18 = vpop.f32.mrb[35].mxu0  ;;  %5690 = vmatmul.mubr.msk.bf16.gmra.mrb[28].mxu1 %vm1691_vm2, %v6940_v44 }
 0x339   : > { %5693 = vmatprep.mubr.msk.bf16.mxu1 %vm1691_vm2, %v6944_v25 }
 0x33d   : > { %v7296_v53 = vpop.f32.mrb[36].mxu0 }
 0x33e   : > { %v7298_v48 = vpop.f32.mrb[37].mxu0 }
 0x33f   : > { %v7300_v35 = vpop.f32.mrb[38].mxu0 }
 0x340   : > { %v7302_v11 = vpop.f32.mrb[39].mxu0  ;;  %5694 = vmatmul.mubr.msk.bf16.gmra.mrb[0].mxu1 %vm1691_vm2, %v6959_v3 }
 0x341   : > { %5697 = vmatprep.mubr.msk.bf16.mxu1 %vm1691_vm2, %v6965_v54 }
 0x345   : > { %v7308_v46 = vpop.f32.mrb[40].mxu0 }
 0x346   : > { %v7310_v44 = vpop.f32.mrb[41].mxu0 }
 0x347   : > { %v7312_v50 = vpop.f32.mrb[42].mxu0 }
 0x348   : > { %v7314_v25 = vpop.f32.mrb[43].mxu0  ;;  %5698 = vmatmul.mubr.msk.bf16.gmra.mrb[4].mxu1 %vm1691_vm2, %v6981_v51  ;;  %v3822_v51 = vpack.c.bf16 %v3806_v43, %v3805_v30  ;;  %v7359_v30 = vld [vmem:[%s7724_s4] ss:$0 sm:$0xff] }
 0x349   : > { %5701 = vmatprep.mubr.msk.bf16.mxu1 %vm1691_vm2, %v6985_v38  ;;  %v4081_v38 = vld [vmem:[#allocation2 + $0xc2] sm:$0xff] }
 0x34d   : > { %v7320_v52 = vpop.f32.mrb[44].mxu0 }
 0x34e   : > { %v7322_v3 = vpop.f32.mrb[45].mxu0 }
 0x34f   : > { %v7324_v49 = vpop.f32.mrb[46].mxu0 }
 0x350   : > { %v7326_v54 = vpop.f32.mrb[47].mxu0  ;;  %5702 = vmatmul.mubr.msk.bf16.gmra.mrb[8].mxu1 %vm1691_vm2, %v6991_v29  ;;  %v4082_v29 = vld [vmem:[#allocation2 + $0xca] sm:$0xff] }
 0x351   : > { %5705 = vmatprep.mubr.msk.bf16.mxu1 %vm1691_vm2, %v7162_v8  ;;  %v4107_v8 = vpack.c.bf16 %v4082_v29, %v4081_v38 }
 0x358   : > { %5706 = vmatmul.mubr.msk.bf16.gmra.mrb[12].mxu1 %vm1691_vm2, %v3822_v51 }
 0x359   : > { %5711 = vmatprep.mubr.msk.bf16.mxu1 %vm1691_vm2, %v7110_v26  ;;  %v4083_v26 = vld [vmem:[#allocation2 + $0xda] sm:$0xff] }
 0x35a   : > { %v4108_v36 = vpack.c.bf16 %v4084_v61, %v4083_v26 }
 0x360   : > { %5712 = vmatmul.mubr.msk.bf16.vlgmr.msra.gmra.mrb[16].mxu1 %vm1691_vm2, %v7118_v32  ;;  %v4085_v32 = vld [vmem:[#allocation2 + $0xf2] sm:$0xff] }
 0x361   : > { %5715 = vmatprep.mubr.msk.bf16.mxu1 %vm1691_vm2, %v7122_v63  ;;  %v4109_v63 = vpack.c.bf16 %v4086_v23, %v4085_v32 }
 0x368   : > { %5716 = vmatmul.mubr.msk.bf16.gmra.mrb[20].mxu1 %vm1691_vm2, %v7130_v34  ;;  %v4087_v34 = vld [vmem:[#allocation2 + $0x10a] sm:$0xff] }
 0x369   : > { %5719 = vmatprep.mubr.msk.bf16.mxu1 %vm1691_vm2, %v7134_v40  ;;  %v4088_v40 = vld [vmem:[#allocation2 + $0x112] sm:$0xff] }
 0x36a   : > { %v4110_v22 = vpack.c.bf16 %v4088_v40, %v4087_v34 }
 0x370   : > { %5720 = vmatmul.mubr.msk.bf16.gmra.mrb[24].mxu1 %vm1691_vm2, %v7142_v5  ;;  %v4091_v5 = vld [vmem:[#allocation2 + $0x13a] sm:$0xff] }
 0x371   : > { %5723 = vmatprep.mubr.msk.bf16.mxu1 %vm1691_vm2, %v4107_v8  ;;  %v4112_v60 = vpack.c.bf16 %v4092_v15, %v4091_v5 }
 0x378   : > { %5724 = vmatmul.mubr.msk.bf16.gmra.mrb[28].mxu1 %vm1691_vm2, %v4108_v36 }
 0x379   : > { %5727 = vmatprep.mubr.msk.bf16.mxu1 %vm1691_vm2, %v4109_v63 }
 0x380   : > { %5728 = vmatmul.mubr.msk.bf16.gmra.mrb[0].mxu1 %vm1691_vm2, %v4110_v22 }
 0x381   : > { %5731 = vmatprep.mubr.msk.bf16.mxu1 %vm1691_vm2, %v4111_v10 }
 0x388   : > { %5732 = vmatmul.mubr.msk.bf16.gmra.mrb[4].mxu1 %vm1691_vm2, %v4112_v60 }
 0x389   : > { %5735 = vmatprep.mubr.msk.bf16.mxu1 %vm1691_vm2, %v4113_v9 }
 0x390   : > { %5736 = vmatmul.mubr.msk.bf16.gmra.mrb[8].mxu1 %vm1691_vm2, %v4114_v41 }
 0x391   : > { %5739 = vmatprep.mubr.msk.bf16.mxu1 %vm1691_vm2, %v7200_v1 }
 0x398   : > { %5740 = vmatmul.mubr.msk.bf16.gmra.mrb[12].mxu1 %vm1691_vm2, %v4116_v12 }
 0x433   : > { %v5713_v6 = vpop.f32.mrb[16].mxu1 }
 0x434   : > { %v5745_v43 = vadd.f32 %v5713_v6, %v7284_v4  ;;  %v4204_v51 = vpop.f32.mrb[17].mxu1 }
 0x435   : > { %v5746_v38 = vadd.f32 %v4204_v51, %v7286_v28  ;;  %v5714_v29 = vpop.f32.mrb[18].mxu1 }
 0x436   : > { %v4372_v8 = vadd.f32 %v5745_v43, %v7359_v30  ;;  %v5747_v1 = vadd.f32 %v5714_v29, %v7288_v27  ;;  %v4207_v26 = vpop.f32.mrb[19].mxu1 }
 0x437   : > { %v4370_v61 = vadd.f32 %v5746_v38, %v7359_v30  ;;  %v5748_v32 = vadd.f32 %v4207_v26, %v7290_v18 }
 0x438   : > { %v4436_v23 = vmul.f32 0.044715, %v4372_v8  ;;  %v7368_v36 = vadd.f32 %v5747_v1, %v7359_v30 }
 0x439   : > { %v4434_v63 = vmul.f32 0.044715, %v4370_v61  ;;  %v7371_v4 = vadd.f32 %v5748_v32, %v7359_v30 }
 0x43a   : > { %v4468_v34 = vmul.f32 %v4436_v23, %v4372_v8  ;;  %v4437_v28 = vmul.f32 0.044715, %v7368_v36 }
 0x43b   : > { %v4466_v40 = vmul.f32 %v4434_v63, %v4370_v61  ;;  %v4435_v2 = vmul.f32 0.044715, %v7371_v4  ;;  %v5717_v27 = vpop.f32.mrb[20].mxu1 }
 0x43c   : > { %v4500_v24 = vmul.f32 %v4468_v34, %v4372_v8  ;;  %v4469_v22 = vmul.f32 %v4437_v28, %v7368_v36  ;;  %v5749_v18 = vadd.f32 %v5717_v27, %v7296_v53  ;;  %v4220_v10 = vpop.f32.mrb[21].mxu1  ;;  %v4404_v34 = vmul.f32 0.5, %v4372_v8 }
 0x43d   : > { %v4498_v5 = vmul.f32 %v4466_v40, %v4370_v61  ;;  %v4467_v15 = vmul.f32 %v4435_v2, %v7371_v4  ;;  %v5750_v31 = vadd.f32 %v4220_v10, %v7298_v48  ;;  %v5718_v62 = vpop.f32.mrb[22].mxu1  ;;  %v4402_v27 = vmul.f32 0.5, %v4370_v61 }
 0x43e   : > { %v4532_v60 = vadd.f32 %v4500_v24, %v4372_v8  ;;  %v4501_v9 = vmul.f32 %v4469_v22, %v7368_v36  ;;  %v4376_v17 = vadd.f32 %v5749_v18, %v7359_v30  ;;  %v5751_v56 = vadd.f32 %v5718_v62, %v7300_v35  ;;  %v4223_v41 = vpop.f32.mrb[23].mxu1 }
 0x43f   : > { %v4530_v57 = vadd.f32 %v4498_v5, %v4370_v61  ;;  %v4499_v59 = vmul.f32 %v4467_v15, %v7371_v4  ;;  %v4374_v53 = vadd.f32 %v5750_v31, %v7359_v30  ;;  %v5752_v12 = vadd.f32 %v4223_v41, %v7302_v11 }
 0x440   : > { %v4564_v6 = vmul.f32 0.7978846, %v4532_v60  ;;  %v4533_v43 = vadd.f32 %v4501_v9, %v7368_v36  ;;  %v4440_v48 = vmul.f32 0.044715, %v4376_v17  ;;  %v7388_v35 = vadd.f32 %v5751_v56, %v7359_v30 }
 0x441   : > { %v4562_v51 = vmul.f32 0.7978846, %v4530_v57  ;;  %v4531_v38 = vadd.f32 %v4499_v59, %v7371_v4  ;;  %v4438_v29 = vmul.f32 0.044715, %v4374_v53  ;;  %v7391_v63 = vadd.f32 %v5752_v12, %v7359_v30 }
 0x442   : > { %6189 = vtanh.f32 %v4564_v6  ;;  %v4565_v1 = vmul.f32 0.7978846, %v4533_v43  ;;  %v4472_v26 = vmul.f32 %v4440_v48, %v4376_v17  ;;  %v4441_v40 = vmul.f32 0.044715, %v7388_v35 }
 0x443   : > { %6191 = vtanh.f32 %v4562_v51  ;;  %v4563_v32 = vmul.f32 0.7978846, %v4531_v38  ;;  %v4470_v23 = vmul.f32 %v4438_v29, %v4374_v53  ;;  %v5721_v11 = vpop.f32.mrb[24].mxu1  ;;  %v4439_v22 = vmul.f32 0.044715, %v7391_v63 }
 0x444   : > { %6193 = vtanh.f32 %v4565_v1  ;;  %v4504_v28 = vmul.f32 %v4472_v26, %v4376_v17  ;;  %v4236_v2 = vpop.f32.mrb[25].mxu1  ;;  %v4473_v5 = vmul.f32 %v4441_v40, %v7388_v35  ;;  %v5753_v15 = vadd.f32 %v5721_v11, %v7308_v46 }
 0x445   : > { %6195 = vtanh.f32 %v4563_v32  ;;  %v4502_v24 = vmul.f32 %v4470_v23, %v4374_v53  ;;  %v5722_v18 = vpop.f32.mrb[26].mxu1  ;;  %v5754_v31 = vadd.f32 %v4236_v2, %v7310_v44  ;;  %v4471_v60 = vmul.f32 %v4439_v22, %v7391_v63 }
 0x446   : > { %v4536_v10 = vadd.f32 %v4504_v28, %v4376_v17  ;;  %v4239_v62 = vpop.f32.mrb[27].mxu1  ;;  %v5755_v9 = vadd.f32 %v5722_v18, %v7312_v50  ;;  %v4505_v41 = vmul.f32 %v4473_v5, %v7388_v35  ;;  %v7403_v57 = vadd.f32 %v5753_v15, %v7359_v30 }
 0x447   : > { %v4534_v8 = vadd.f32 %v4502_v24, %v4374_v53  ;;  %v5756_v61 = vadd.f32 %v4239_v62, %v7314_v25  ;;  %v7406_v59 = vadd.f32 %v5754_v31, %v7359_v30  ;;  %v4405_v46 = vmul.f32 0.5, %v7368_v36 }
 0x448   : > { %v4568_v56 = vmul.f32 0.7978846, %v4536_v10  ;;  %v4503_v12 = vmul.f32 %v4471_v60, %v7391_v63  ;;  %v7411_v6 = vadd.f32 %v5755_v9, %v7359_v30  ;;  %v4403_v50 = vmul.f32 0.5, %v7371_v4 }
 0x449   : > { %v4566_v44 = vmul.f32 0.7978846, %v4534_v8  ;;  %v4537_v25 = vadd.f32 %v4505_v41, %v7388_v35  ;;  %v4444_v43 = vmul.f32 0.044715, %v7403_v57  ;;  %v7417_v48 = vmul.f32 0.5, %v4376_v17 }
 0x44a   : > { %6197 = vtanh.f32 %v4568_v56  ;;  %v4535_v51 = vadd.f32 %v4503_v12, %v7391_v63  ;;  %v4442_v36 = vmul.f32 0.044715, %v7406_v59  ;;  %v7421_v1 = vmul.f32 0.5, %v4374_v53 }
 0x44b   : > { %6199 = vtanh.f32 %v4566_v44  ;;  %v5725_v38 = vpop.f32.mrb[28].mxu1  ;;  %v4569_v26 = vmul.f32 0.7978846, %v4537_v25  ;;  %v4476_v4 = vmul.f32 %v4444_v43, %v7403_v57  ;;  %v4445_v32 = vmul.f32 0.044715, %v7411_v6 }
 0x44c   : > { %v6190_v29 = vpop.eup %6189  ;;  %v4252_v23 = vpop.f32.mrb[29].mxu1  ;;  %v4567_v40 = vmul.f32 0.7978846, %v4535_v51  ;;  %v4474_v17 = vmul.f32 %v4442_v36, %v7406_v59  ;;  %v7427_v2 = vadd.f32 %v5756_v61, %v7359_v30 }
 0x44d   : > { %v6192_v11 = vpop.eup %6191  ;;  %v4628_v28 = vadd.f32 1.0, %v6190_v29  ;;  %v5726_v24 = vpop.f32.mrb[30].mxu1  ;;  %6201 = vtanh.f32 %v4569_v26  ;;  %v4508_v18 = vmul.f32 %v4476_v4, %v7403_v57  ;;  %v4477_v10 = vmul.f32 %v4445_v32, %v7411_v6 }
 0x44e   : > { %v6194_v22 = vpop.eup %6193  ;;  %v4626_v53 = vadd.f32 1.0, %v6192_v11  ;;  %v4255_v5 = vpop.f32.mrb[31].mxu1  ;;  %6203 = vtanh.f32 %v4567_v40  ;;  %v4506_v8 = vmul.f32 %v4474_v17, %v7406_v59  ;;  %v4443_v12 = vmul.f32 0.044715, %v7427_v2 }
 0x44f   : > { %v6196_v15 = vpop.eup %6195  ;;  %v4660_v31 = vmul.f32 %v4628_v28, %v4404_v34  ;;  %v4629_v62 = vadd.f32 1.0, %v6194_v22  ;;  %v4540_v61 = vadd.f32 %v4508_v18, %v7403_v57  ;;  %v4509_v56 = vmul.f32 %v4477_v10, %v7411_v6 }
 0x450   : > { %v4658_v60 = vmul.f32 %v4626_v53, %v4402_v27  ;;  %v4627_v9 = vadd.f32 1.0, %v6196_v15  ;;  %v4538_v44 = vadd.f32 %v4506_v8, %v7406_v59  ;;  %v5757_v34 = vadd.f32 %v5725_v38, %v7320_v52 }
 0x451   : > { %4692 = vst.msk [vmem:[%s7432_s8 + $0x10] sm:$0xff] %vm1691_vm2, %v4660_v31  ;;  %v4661_v41 = vmul.f32 %v4629_v62, %v4405_v46  ;;  %v4572_v43 = vmul.f32 0.7978846, %v4540_v61  ;;  %v4541_v27 = vadd.f32 %v4509_v56, %v7411_v6  ;;  %v5758_v51 = vadd.f32 %v4252_v23, %v7322_v3 }
 0x452   : > { %4690 = vst.msk [vmem:[%s7432_s8] sm:$0xff] %vm1691_vm2, %v4658_v60  ;;  %v4659_v25 = vmul.f32 %v4627_v9, %v4403_v50  ;;  %v4570_v36 = vmul.f32 0.7978846, %v4538_v44  ;;  %v4475_v46 = vmul.f32 %v4443_v12, %v7427_v2  ;;  %v7452_v29 = vadd.f32 %v5757_v34, %v7359_v30 }
 0x453   : > { %4693 = vst.msk [vmem:[%s7432_s8 + $0x18] sm:$0xff] %vm1691_vm2, %v4661_v41  ;;  %v5759_v26 = vadd.f32 %v5726_v24, %v7324_v49  ;;  %v5729_v4 = vpop.f32.mrb[0].mxu1  ;;  %6205 = vtanh.f32 %v4572_v43  ;;  %v4573_v50 = vmul.f32 0.7978846, %v4541_v27  ;;  %v7458_v38 = vadd.f32 %v5758_v51, %v7359_v30 }
 0x454   : > { %v6198_v52 = vpop.eup %6197  ;;  %4691 = vst.msk [vmem:[%s7432_s8 + $0x8] sm:$0xff] %vm1691_vm2, %v4659_v25  ;;  %v5760_v3 = vadd.f32 %v4255_v5, %v7326_v54  ;;  %v4268_v32 = vpop.f32.mrb[1].mxu1  ;;  %v4409_v28 = vmul.f32 0.5, %v7388_v35  ;;  %6207 = vtanh.f32 %v4570_v36  ;;  %v4507_v40 = vmul.f32 %v4475_v46, %v7427_v2 }
 0x455   : > { %v6200_v23 = vpop.eup %6199  ;;  %v4632_v11 = vadd.f32 1.0, %v6198_v52  ;;  %v5730_v49 = vpop.f32.mrb[2].mxu1  ;;  %v4407_v24 = vmul.f32 0.5, %v7391_v63  ;;  %6209 = vtanh.f32 %v4573_v50  ;;  %v4448_v22 = vmul.f32 0.044715, %v7452_v29 }
 0x456   : > { %v4630_v17 = vadd.f32 1.0, %v6200_v23  ;;  %v7465_v53 = vpop.f32.mrb[3].mxu1  ;;  %v4539_v18 = vadd.f32 %v4507_v40, %v7427_v2  ;;  %v4446_v35 = vmul.f32 0.044715, %v7458_v38  ;;  %v7471_v10 = vadd.f32 %v5759_v26, %v7359_v30 }
 0x457   : > { %v4664_v54 = vmul.f32 %v4632_v11, %v7417_v48  ;;  %v6202_v5 = vpop.eup %6201  ;;  %v4480_v63 = vmul.f32 %v4448_v22, %v7452_v29  ;;  %v7476_v31 = vadd.f32 %v5760_v3, %v7359_v30  ;;  %v5761_v62 = vadd.f32 %v5729_v4, %v7239_v19 }
 0x458   : > { %v4662_v15 = vmul.f32 %v4630_v17, %v7421_v1  ;;  %v6204_v8 = vpop.eup %6203  ;;  %v4633_v48 = vadd.f32 1.0, %v6202_v5  ;;  %v4412_v60 = vmul.f32 0.5, %v7403_v57  ;;  %v4571_v9 = vmul.f32 0.7978846, %v4539_v18 }
 0x459   : > { %4696 = vst.msk [vmem:[%s7432_s8 + $0x30] sm:$0xff] %vm1691_vm2, %v4664_v54  ;;  %v4478_v61 = vmul.f32 %v4446_v35, %v7458_v38  ;;  %v4631_v1 = vadd.f32 1.0, %v6204_v8  ;;  %v4410_v56 = vmul.f32 0.5, %v7406_v59  ;;  %v4512_v41 = vmul.f32 %v4480_v63, %v7452_v29 }
 0x45a   : > { %4694 = vst.msk [vmem:[%s7432_s8 + $0x20] sm:$0xff] %vm1691_vm2, %v4662_v15  ;;  %v4449_v44 = vmul.f32 0.044715, %v7471_v10  ;;  %v4665_v19 = vmul.f32 %v4633_v48, %v4409_v28  ;;  %6211 = vtanh.f32 %v4571_v9  ;;  %v4447_v57 = vmul.f32 0.044715, %v7476_v31 }
 0x45b   : > { %v4510_v12 = vmul.f32 %v4478_v61, %v7458_v38  ;;  %v5733_v34 = vpop.f32.mrb[4].mxu1  ;;  %v4663_v25 = vmul.f32 %v4631_v1, %v4407_v24  ;;  %v4544_v43 = vadd.f32 %v4512_v41, %v7452_v29  ;;  %v7493_v51 = vadd.f32 %v5761_v62, %v7359_v30 }
 0x45c   : > { %v4481_v27 = vmul.f32 %v4449_v44, %v7471_v10  ;;  %v4284_v59 = vpop.f32.mrb[5].mxu1  ;;  %4697 = vst.msk [vmem:[%s7432_s8 + $0x38] sm:$0xff] %vm1691_vm2, %v4665_v19  ;;  %v4479_v46 = vmul.f32 %v4447_v57, %v7476_v31  ;;  %v5762_v26 = vadd.f32 %v4268_v32, %v7241_v58  ;;  %v5763_v4 = vadd.f32 %v5730_v49, %v7243_v39 }
 0x45d   : > { %v4542_v36 = vadd.f32 %v4510_v12, %v7458_v38  ;;  %v5734_v52 = vpop.f32.mrb[6].mxu1  ;;  %v6206_v50 = vpop.eup %6205  ;;  %4695 = vst.msk [vmem:[%s7432_s8 + $0x28] sm:$0xff] %vm1691_vm2, %v4663_v25  ;;  %v4413_v3 = vmul.f32 0.5, %v7411_v6  ;;  %v4576_v23 = vmul.f32 0.7978846, %v4544_v43  ;;  %v5765_v41 = vadd.f32 %v5733_v34, %v7249_v33 }
 0x45e   : > { %v4513_v11 = vmul.f32 %v4481_v27, %v7471_v10  ;;  %v4452_v28 = vmul.f32 0.044715, %v7493_v51  ;;  %v4287_v40 = vpop.f32.mrb[7].mxu1  ;;  %v6208_v17 = vpop.eup %6207  ;;  %v4636_v24 = vadd.f32 1.0, %v6206_v50  ;;  %v4511_v58 = vmul.f32 %v4479_v46, %v7476_v31 }
 0x45f   : > { %v4574_v22 = vmul.f32 0.7978846, %v4542_v36  ;;  %v7508_v39 = vadd.f32 %v5762_v26, %v7359_v30  ;;  %v6210_v32 = vpop.eup %6209  ;;  %v4634_v49 = vadd.f32 1.0, %v6208_v17  ;;  %6213 = vtanh.f32 %v4576_v23 }
 0x460   : > { %v4545_v6 = vadd.f32 %v4513_v11, %v7471_v10  ;;  %v4484_v54 = vmul.f32 %v4452_v28, %v7493_v51  ;;  %v4668_v18 = vmul.f32 %v4636_v24, %v4412_v60  ;;  %v4637_v35 = vadd.f32 1.0, %v6210_v32 }
 0x461   : > { %6215 = vtanh.f32 %v4574_v22  ;;  %v4543_v5 = vadd.f32 %v4511_v58, %v7476_v31  ;;  %v4666_v15 = vmul.f32 %v4634_v49, %v4410_v56  ;;  %v4450_v9 = vmul.f32 0.044715, %v7508_v39 }
 0x462   : > { %v4577_v63 = vmul.f32 0.7978846, %v4545_v6  ;;  %v4516_v62 = vmul.f32 %v4484_v54, %v7493_v51  ;;  %4700 = vst.msk [vmem:[%s7432_s8 + $0x50] sm:$0xff] %vm1691_vm2, %v4668_v18  ;;  %v4669_v8 = vmul.f32 %v4637_v35, %v4413_v3  ;;  %v7518_v61 = vadd.f32 %v5763_v4, %v7359_v30 }
 0x463   : > { %v4575_v48 = vmul.f32 0.7978846, %v4543_v5  ;;  %v7520_v1 = vpop.f32.mrb[8].mxu1  ;;  %4698 = vst.msk [vmem:[%s7432_s8 + $0x40] sm:$0xff] %vm1691_vm2, %v4666_v15  ;;  %v5764_v56 = vadd.f32 %v7465_v53, %v7245_v14  ;;  %v4411_v12 = vmul.f32 0.5, %v7427_v2  ;;  %v4482_v57 = vmul.f32 %v4450_v9, %v7508_v39 }
 0x464   : > { %6217 = vtanh.f32 %v4577_v63  ;;  %v4548_v60 = vadd.f32 %v4516_v62, %v7493_v51  ;;  %v7528_v44 = vpop.f32.mrb[9].mxu1  ;;  %v6212_v19 = vpop.eup %6211  ;;  %4701 = vst.msk [vmem:[%s7432_s8 + $0x58] sm:$0xff] %vm1691_vm2, %v4669_v8  ;;  %v4453_v25 = vmul.f32 0.044715, %v7518_v61  ;;  %v7541_v33 = vadd.f32 %v5765_v41, %v7359_v30 }
 0x465   : > { %6219 = vtanh.f32 %v4575_v48  ;;  %v7535_v43 = vpop.f32.mrb[10].mxu1  ;;  %v4635_v27 = vadd.f32 1.0, %v6212_v19  ;;  %v7538_v14 = vadd.f32 %v5764_v56, %v7359_v30  ;;  %v4514_v2 = vmul.f32 %v4482_v57, %v7508_v39 }
 0x466   : > { %v4580_v36 = vmul.f32 0.7978846, %v4548_v60  ;;  %v7543_v53 = vpop.f32.mrb[11].mxu1  ;;  %v4485_v34 = vmul.f32 %v4453_v25, %v7518_v61  ;;  %v5766_v46 = vadd.f32 %v4284_v59, %v7251_v55  ;;  %v5767_v26 = vadd.f32 %v5734_v52, %v7254_v37 }
 0x467   : > { %v4667_v4 = vmul.f32 %v4635_v27, %v4411_v12  ;;  %v4416_v50 = vmul.f32 0.5, %v7452_v29  ;;  %v4451_v3 = vmul.f32 0.044715, %v7538_v14  ;;  %v4414_v23 = vmul.f32 0.5, %v7458_v38 }
 0x468   : > { %6221 = vtanh.f32 %v4580_v36  ;;  %v4546_v11 = vadd.f32 %v4514_v2, %v7508_v39  ;;  %v4517_v28 = vmul.f32 %v4485_v34, %v7518_v61  ;;  %v4456_v17 = vmul.f32 0.044715, %v7541_v33 }
 0x469   : > { %v6214_v24 = vpop.eup %6213  ;;  %4699 = vst.msk [vmem:[%s7432_s8 + $0x48] sm:$0xff] %vm1691_vm2, %v4667_v4  ;;  %v4483_v55 = vmul.f32 %v4451_v3, %v7538_v14  ;;  %v7559_v37 = vadd.f32 %v5766_v46, %v7359_v30  ;;  %v7562_v29 = vadd.f32 %v5767_v26, %v7359_v30  ;;  %v5768_v59 = vadd.f32 %v4287_v40, %v7256_v42 }
 0x46a   : > { %v4640_v52 = vadd.f32 1.0, %v6214_v24  ;;  %v4578_v22 = vmul.f32 0.7978846, %v4546_v11  ;;  %v4549_v58 = vadd.f32 %v4517_v28, %v7518_v61  ;;  %v4488_v32 = vmul.f32 %v4456_v17, %v7541_v33 }
 0x46b   : > { %v6216_v38 = vpop.eup %6215  ;;  %v7567_v49 = vpop.f32.mrb[12].mxu1  ;;  %v4417_v54 = vmul.f32 0.5, %v7471_v10  ;;  %v4515_v18 = vmul.f32 %v4483_v55, %v7538_v14  ;;  %v4454_v35 = vmul.f32 0.044715, %v7559_v37  ;;  %v4415_v48 = vmul.f32 0.5, %v7476_v31 }
 0x46c   : > { %v4638_v6 = vadd.f32 1.0, %v6216_v38  ;;  %v7572_v5 = vpop.f32.mrb[13].mxu1  ;;  %v4672_v42 = vmul.f32 %v4640_v52, %v4416_v50  ;;  %6223 = vtanh.f32 %v4578_v22  ;;  %v4581_v40 = vmul.f32 0.7978846, %v4549_v58 }
 0x46d   : > { %v4520_v15 = vmul.f32 %v4488_v32, %v7541_v33  ;;  %v7575_v63 = vpop.f32.mrb[14].mxu1  ;;  %v4547_v10 = vadd.f32 %v4515_v18, %v7538_v14  ;;  %v4486_v9 = vmul.f32 %v4454_v35, %v7559_v37  ;;  %v4457_v12 = vmul.f32 0.044715, %v7562_v29 }
 0x46e   : > { %v6218_v62 = vpop.eup %6217  ;;  %v4670_v8 = vmul.f32 %v4638_v6, %v4414_v23  ;;  %v7580_v60 = vpop.f32.mrb[15].mxu1  ;;  %4704 = vst.msk [vmem:[%s7432_s8 + $0x70] sm:$0xff] %vm1691_vm2, %v4672_v42  ;;  %6225 = vtanh.f32 %v4581_v40  ;;  %v7590_v27 = vadd.f32 %v5768_v59, %v7359_v30  ;;  %v5769_v46 = vadd.f32 %v7520_v1, %v7260_v16 }
 0x46f   : > { %v6220_v56 = vpop.eup %6219  ;;  %v4641_v41 = vadd.f32 1.0, %v6218_v62  ;;  %v4552_v19 = vadd.f32 %v4520_v15, %v7541_v33  ;;  %v4579_v31 = vmul.f32 0.7978846, %v4547_v10  ;;  %v4518_v25 = vmul.f32 %v4486_v9, %v7559_v37 }
 0x470   : > { %4702 = vst.msk [vmem:[%s7432_s8 + $0x60] sm:$0xff] %vm1691_vm2, %v4670_v8  ;;  %v4639_v57 = vadd.f32 1.0, %v6220_v56  ;;  %v4489_v34 = vmul.f32 %v4457_v12, %v7562_v29  ;;  %v4420_v50 = vmul.f32 0.5, %v7493_v51  ;;  %v4455_v28 = vmul.f32 0.044715, %v7590_v27 }
 0x471   : > { %v4673_v36 = vmul.f32 %v4641_v41, %v4417_v54  ;;  %v4584_v2 = vmul.f32 0.7978846, %v4552_v19  ;;  %6227 = vtanh.f32 %v4579_v31  ;;  %v4550_v3 = vadd.f32 %v4518_v25, %v7559_v37 }
 0x472   : > { %v6222_v26 = vpop.eup %6221  ;;  %v4671_v4 = vmul.f32 %v4639_v57, %v4415_v48  ;;  %v4521_v11 = vmul.f32 %v4489_v34, %v7562_v29  ;;  %v7604_v16 = vadd.f32 %v5769_v46, %v7359_v30  ;;  %v5770_v51 = vadd.f32 %v7528_v44, %v7262_v7 }
 0x473   : > { %4705 = vst.msk [vmem:[%s7432_s8 + $0x78] sm:$0xff] %vm1691_vm2, %v4673_v36  ;;  %v4644_v23 = vadd.f32 1.0, %v6222_v26  ;;  %6229 = vtanh.f32 %v4584_v2  ;;  %v4582_v17 = vmul.f32 0.7978846, %v4550_v3  ;;  %v5771_v1 = vadd.f32 %v7535_v43, %v7264_v13 }
 0x474   : > { %4703 = vst.msk [vmem:[%s7432_s8 + $0x68] sm:$0xff] %vm1691_vm2, %v4671_v4  ;;  %v4553_v55 = vadd.f32 %v4521_v11, %v7562_v29  ;;  %v4487_v59 = vmul.f32 %v4455_v28, %v7590_v27  ;;  %v5772_v38 = vadd.f32 %v7543_v53, %v7266_v20  ;;  %v4418_v52 = vmul.f32 0.5, %v7508_v39 }
 0x475   : > { %v4676_v24 = vmul.f32 %v4644_v23, %v4420_v50  ;;  %6231 = vtanh.f32 %v4582_v17  ;;  %v4460_v22 = vmul.f32 0.044715, %v7604_v16  ;;  %v7617_v58 = vadd.f32 %v5770_v51, %v7359_v30 }
 0x476   : > { %v6224_v7 = vpop.eup %6223  ;;  %v4585_v13 = vmul.f32 0.7978846, %v4553_v55  ;;  %v4519_v44 = vmul.f32 %v4487_v59, %v7590_v27  ;;  %v7623_v43 = vadd.f32 %v5771_v1, %v7359_v30  ;;  %v7626_v32 = vadd.f32 %v5772_v38, %v7359_v30 }
 0x477   : > { %4708 = vst.msk [vmem:[%s7432_s8 + $0x90] sm:$0xff] %vm1691_vm2, %v4676_v24  ;;  %v4642_v20 = vadd.f32 1.0, %v6224_v7  ;;  %v4421_v39 = vmul.f32 0.5, %v7518_v61  ;;  %v4492_v53 = vmul.f32 %v4460_v22, %v7604_v16  ;;  %v4458_v6 = vmul.f32 0.044715, %v7617_v58 }
 0x478   : > { %v6226_v54 = vpop.eup %6225  ;;  %v4419_v18 = vmul.f32 0.5, %v7538_v14  ;;  %6233 = vtanh.f32 %v4585_v13  ;;  %v4551_v35 = vadd.f32 %v4519_v44, %v7590_v27  ;;  %v4461_v42 = vmul.f32 0.044715, %v7623_v43 }
 0x479   : > { %v4674_v40 = vmul.f32 %v4642_v20, %v4418_v52  ;;  %v4645_v15 = vadd.f32 1.0, %v6226_v54  ;;  %v4524_v62 = vmul.f32 %v4492_v53, %v7604_v16  ;;  %v4490_v8 = vmul.f32 %v4458_v6, %v7617_v58 }
 0x47a   : > { %v4424_v61 = vmul.f32 0.5, %v7541_v33  ;;  %v4583_v48 = vmul.f32 0.7978846, %v4551_v35  ;;  %v4493_v10 = vmul.f32 %v4461_v42, %v7623_v43  ;;  %v4459_v9 = vmul.f32 0.044715, %v7626_v32 }
 0x47b   : > { %v6228_v14 = vpop.eup %6227  ;;  %4706 = vst.msk [vmem:[%s7432_s8 + $0x80] sm:$0xff] %vm1691_vm2, %v4674_v40  ;;  %v4677_v56 = vmul.f32 %v4645_v15, %v4421_v39  ;;  %v4556_v41 = vadd.f32 %v4524_v62, %v7604_v16  ;;  %v4522_v19 = vmul.f32 %v4490_v8, %v7617_v58  ;;  %v5773_v12 = vadd.f32 %v7567_v49, %v7272_v0 }
 0x47c   : > { %v4643_v31 = vadd.f32 1.0, %v6228_v14  ;;  %6235 = vtanh.f32 %v4583_v48  ;;  %v4525_v33 = vmul.f32 %v4493_v10, %v7623_v43  ;;  %v4491_v25 = vmul.f32 %v4459_v9, %v7626_v32 }
 0x47d   : > { %v6230_v57 = vpop.eup %6229  ;;  %4709 = vst.msk [vmem:[%s7432_s8 + $0x98] sm:$0xff] %vm1691_vm2, %v4677_v56  ;;  %v4588_v2 = vmul.f32 0.7978846, %v4556_v41  ;;  %v4554_v34 = vadd.f32 %v4522_v19, %v7617_v58  ;;  %v7651_v46 = vadd.f32 %v5773_v12, %v7359_v30  ;;  %v5774_v4 = vadd.f32 %v7572_v5, %v7274_v47 }
 0x47e   : > { %v4648_v36 = vadd.f32 1.0, %v6230_v57  ;;  %v4675_v26 = vmul.f32 %v4643_v31, %v4419_v18  ;;  %v4557_v0 = vadd.f32 %v4525_v33, %v7623_v43  ;;  %v4523_v49 = vmul.f32 %v4491_v25, %v7626_v32 }
 0x47f   : > { %v6232_v50 = vpop.eup %6231  ;;  %v4422_v23 = vmul.f32 0.5, %v7559_v37  ;;  %6237 = vtanh.f32 %v4588_v2  ;;  %v4586_v11 = vmul.f32 0.7978846, %v4554_v34  ;;  %v4464_v1 = vmul.f32 0.044715, %v7651_v46 }
 0x480   : > { %v4680_v3 = vmul.f32 %v4648_v36, %v4424_v61  ;;  %4707 = vst.msk [vmem:[%s7432_s8 + $0x88] sm:$0xff] %vm1691_vm2, %v4675_v26  ;;  %v4646_v28 = vadd.f32 1.0, %v6232_v50  ;;  %v4589_v17 = vmul.f32 0.7978846, %v4557_v0  ;;  %v4555_v51 = vadd.f32 %v4523_v49, %v7626_v32 }
 0x481   : > { %6239 = vtanh.f32 %v4586_v11  ;;  %v7665_v47 = vadd.f32 %v5774_v4, %v7359_v30  ;;  %v5775_v37 = vadd.f32 %v7575_v63, %v7276_v45  ;;  %v5776_v5 = vadd.f32 %v7580_v60, %v7278_v21 }
 0x482   : > { %4712 = vst.msk [vmem:[%s7432_s8 + $0xb0] sm:$0xff] %vm1691_vm2, %v4680_v3  ;;  %v6234_v24 = vpop.eup %6233  ;;  %v4678_v55 = vmul.f32 %v4646_v28, %v4422_v23  ;;  %6241 = vtanh.f32 %v4589_v17  ;;  %v4587_v59 = vmul.f32 0.7978846, %v4555_v51  ;;  %v4496_v38 = vmul.f32 %v4464_v1, %v7651_v46 }
 0x483   : > { %v4425_v52 = vmul.f32 0.5, %v7562_v29  ;;  %v4649_v22 = vadd.f32 1.0, %v6234_v24  ;;  %v4462_v7 = vmul.f32 0.044715, %v7665_v47  ;;  %v7675_v13 = vadd.f32 %v5775_v37, %v7359_v30 }
 0x484   : > { %4710 = vst.msk [vmem:[%s7432_s8 + $0xa0] sm:$0xff] %vm1691_vm2, %v4678_v55  ;;  %6243 = vtanh.f32 %v4587_v59  ;;  %v4528_v45 = vmul.f32 %v4496_v38, %v7651_v46  ;;  %v4399_v21 = vadd.f32 %v5776_v5, %v7359_v30  ;;  %v4423_v53 = vmul.f32 0.5, %v7590_v27 }
 0x485   : > { %v4681_v63 = vmul.f32 %v4649_v22, %v4425_v52  ;;  %v4494_v60 = vmul.f32 %v4462_v7, %v7665_v47  ;;  %v4465_v44 = vmul.f32 0.044715, %v7675_v13  ;;  %v4428_v8 = vmul.f32 0.5, %v7604_v16 }
 0x486   : > { %v6236_v20 = vpop.eup %6235  ;;  %v4560_v29 = vadd.f32 %v4528_v45, %v7651_v46  ;;  %v4463_v39 = vmul.f32 0.044715, %v4399_v21  ;;  %v4426_v41 = vmul.f32 0.5, %v7617_v58  ;;  %v4429_v16 = vmul.f32 0.5, %v7623_v43 }
 0x487   : > { %4713 = vst.msk [vmem:[%s7432_s8 + $0xb8] sm:$0xff] %vm1691_vm2, %v4681_v63  ;;  %v4647_v6 = vadd.f32 1.0, %v6236_v20  ;;  %v4526_v54 = vmul.f32 %v4494_v60, %v7665_v47  ;;  %v4497_v18 = vmul.f32 %v4465_v44, %v7675_v13  ;;  %v4427_v34 = vmul.f32 0.5, %v7626_v32 }
 0x488   : > { %v4592_v30 = vmul.f32 0.7978846, %v4560_v29  ;;  %v4495_v35 = vmul.f32 %v4463_v39, %v4399_v21  ;;  %v4432_v0 = vmul.f32 0.5, %v7651_v46  ;;  %v4430_v50 = vmul.f32 0.5, %v7665_v47 }
 0x489   : > { %v6238_v42 = vpop.eup %6237  ;;  %v4679_v40 = vmul.f32 %v4647_v6, %v4423_v53  ;;  %v4558_v15 = vadd.f32 %v4526_v54, %v7665_v47  ;;  %v4529_v62 = vmul.f32 %v4497_v18, %v7675_v13  ;;  %v4433_v17 = vmul.f32 0.5, %v7675_v13 }
 0x48a   : > { %v4652_v61 = vadd.f32 1.0, %v6238_v42  ;;  %6245 = vtanh.f32 %v4592_v30  ;;  %v4527_v48 = vmul.f32 %v4495_v35, %v4399_v21  ;;  %v4431_v1 = vmul.f32 0.5, %v4399_v21 }
 0x48b   : > { %v6240_v27 = vpop.eup %6239  ;;  %4711 = vst.msk [vmem:[%s7432_s8 + $0xa8] sm:$0xff] %vm1691_vm2, %v4679_v40  ;;  %v4590_v10 = vmul.f32 0.7978846, %v4558_v15  ;;  %v4561_v9 = vadd.f32 %v4529_v62, %v7675_v13 }
 0x48c   : > { %v6242_v14 = vpop.eup %6241  ;;  %v4684_v56 = vmul.f32 %v4652_v61, %v4428_v8  ;;  %v4650_v19 = vadd.f32 1.0, %v6240_v27  ;;  %v4559_v12 = vadd.f32 %v4527_v48, %v4399_v21 }
 0x48d   : > { %v4653_v57 = vadd.f32 1.0, %v6242_v14  ;;  %6247 = vtanh.f32 %v4590_v10  ;;  %v4593_v31 = vmul.f32 0.7978846, %v4561_v9 }
 0x48e   : > { %v6244_v33 = vpop.eup %6243  ;;  %4716 = vst.msk [vmem:[%s7432_s8 + $0xd0] sm:$0xff] %vm1691_vm2, %v4684_v56  ;;  %v4682_v25 = vmul.f32 %v4650_v19, %v4426_v41  ;;  %v4591_v36 = vmul.f32 0.7978846, %v4559_v12 }
 0x48f   : > { %v4685_v2 = vmul.f32 %v4653_v57, %v4429_v16  ;;  %v4651_v26 = vadd.f32 1.0, %v6244_v33  ;;  %6249 = vtanh.f32 %v4593_v31 }
 0x490   : > { %4714 = vst.msk [vmem:[%s7432_s8 + $0xc0] sm:$0xff] %vm1691_vm2, %v4682_v25  ;;  %6251 = vtanh.f32 %v4591_v36 }
 0x491   : > { %4717 = vst.msk [vmem:[%s7432_s8 + $0xd8] sm:$0xff] %vm1691_vm2, %v4685_v2  ;;  %v4683_v58 = vmul.f32 %v4651_v26, %v4427_v34 }
 0x493   : > { %4715 = vst.msk [vmem:[%s7432_s8 + $0xc8] sm:$0xff] %vm1691_vm2, %v4683_v58 }
 0x494   : > { %v6246_v43 = vpop.eup %6245 }
 0x495   : > { %v4656_v49 = vadd.f32 1.0, %v6246_v43 }
 0x497   : > { %v6248_v4 = vpop.eup %6247  ;;  %v4688_v32 = vmul.f32 %v4656_v49, %v4432_v0 }
 0x498   : > { %v4654_v3 = vadd.f32 1.0, %v6248_v4 }
 0x499   : > { %v6250_v23 = vpop.eup %6249  ;;  %4720 = vst.msk [vmem:[%s7432_s8 + $0xf0] sm:$0xff] %vm1691_vm2, %v4688_v32 }
 0x49a   : > { %v6252_v11 = vpop.eup %6251  ;;  %v4686_v28 = vmul.f32 %v4654_v3, %v4430_v50  ;;  %v4657_v51 = vadd.f32 1.0, %v6250_v23 }
 0x49b   : > { %v4655_v37 = vadd.f32 1.0, %v6252_v11 }
 0x49c   : > { %4718 = vst.msk [vmem:[%s7432_s8 + $0xe0] sm:$0xff] %vm1691_vm2, %v4686_v28  ;;  %v4689_v46 = vmul.f32 %v4657_v51, %v4433_v17 }
 0x49d   : > { %v4687_v5 = vmul.f32 %v4655_v37, %v4431_v1 }
 0x49e   : > { %4721 = vst.msk [vmem:[%s7432_s8 + $0xf8] sm:$0xff] %vm1691_vm2, %v4689_v46 }
 0x49f   : > { %4719 = vst.msk [vmem:[%s7432_s8 + $0xe8] sm:$0xff] %vm1691_vm2, %v4687_v5 }
 0x4a0 PF: > { %s15_s18 = sadd.s32 1, %s6259_s18  }
 0x4a1   : > { %p12_p4 = scmp.ge.s32.totalorder %s15_s18, 4  }
 0x4a3   :  { %14 = sbr.rel (!%p12_p4) target bundleno = 1 (0x1), region = 84 }

// kernel: encoder_forward.5
= control target key start
LH: loop header
LB: loop body
LE: loop exit
PB: predicated region body
PF: predicated region fallthrough
CT: control target
= control target key end

     0   :  { %10 = vsyncpa [#allocation3], 0  ;;  %s3237_s0 = inlined_call_operand.vmem [shape: f32[2,5,5,64], index: 0, kind: input, shape index: {}]   ;;  %s3238_s1 = inlined_call_operand.vmem [shape: bf16[4,64,16], index: 1, kind: input, shape index: {}]   ;;  %s3239_s2 = inlined_call_operand.vmem [shape: f32[1,16], index: 2, kind: input, shape index: {}]   ;;  %s3240_s3 = inlined_call_operand.vmem [shape: bf16[256,64], index: 3, kind: input, shape index: {}]   ;;  %s3241_s4 = inlined_call_operand.vmem [shape: f32[1,64], index: 4, kind: input, shape index: {}]   ;;  %s3242_s5 = inlined_call_operand.hbm [shape: f32[2,1,64], index: 5, kind: output, shape index: {}]  }
   0x1   :  { %12 = vsyncpa [#allocation3 + $0x1], 0  ;;  %s2715_s18 = smov 0   ;;  %s2717_s19 = smov 0  }
   0x2   :  { %s2719_s20 = smov 0   ;;  %s2721_s21 = smov 0  }
   0x3 LB: > { %s2736_s22 = sadd.s32 4294967295, %s2680_s21   ;;  %s2031_s23 = sadd.s32 4294967294, %s2680_s21   ;;  %s2680_s21 = sphi %s2721_s21, %s3248_s21   ;;  %s2676_s20 = sphi %s2719_s20, %s3247_s20   ;;  %s2672_s19 = sphi %s2717_s19, %s3246_s19   ;;  %s2668_s18 = sphi %s2715_s18, %s3245_s18  }
   0x4   : > { %s2740_s24 = sadd.s32 1, %s2680_s21   ;;  %s135_s25 = sadd.s32 1, %s2676_s20 }
   0x5   : > { %s132_s26 = ssub.s32 %s2680_s21, %s2740_s24  ;;  %p145_p0 = scmp.ne.s32.totalorder %s2676_s20, %s2672_s19 }
   0x6   : > { %p133_p1 = scmp.eq.s32.totalorder %s132_s26, 0  ;;  %p146_p2 = scmp.eq.s32.totalorder %s2736_s22, 1 }
   0x7   : > { %p151_p3 = scmp.ne.s32.totalorder %s2672_s19, %s2668_s18  ;;  %p152_p4 = scmp.eq.s32.totalorder %s2031_s23, 1 }
   0x8   : > { %s2751_s27 = scalar_select %p133_p1, %s2676_s20, %s135_s25  }
   0x9   : > { %p2753_p5 = por %p146_p2, %p145_p0  ;;  %p2757_p6 = por %p152_p4, %p151_p3 }
   0xa   : > { %p2034_p7 = scmp.ge.s32.totalorder %s2680_s21, 1  ;;  %p190_p8 = scmp.lt.s32.totalorder %s2680_s21, 3 }
   0xc   : > { %p191_p9 = pnand %p2034_p7, %p190_p8 }
   0xd   : > { %v2766_v0 = vld [vmem:[%s3238_s1 + $0x20] sm:$0xff] (!%p191_p9)   ;;  %v2682_v1 = vmov (!%p191_p9), 0.0   ;;  %v2779_v3 = vld [vmem:[%s3238_s1 + $0x28] sm:$0xff] (!%p191_p9)   ;;  %vm2683_vm0 = vmmov (!%p191_p9), 0   ;;  %p217_p10 = scmp.lt.s32.totalorder (!%p191_p9), %s2736_s22, 1  ;;  %v2799_v5 = vld [vmem:[%s3238_s1 + $0x30] sm:$0xff] (!%p191_p9)  }
   0xe   : > { %194 = sbr.rel (%p191_p9) target bundleno = 1388 (0x56c), region = 40  ;;  %2248 = vmatprep.subr.bf16.mxu0 (!%p191_p9), %v2682_v1  ;;  %2260 = vmatprep.subr.bf16.mxu1 (!%p191_p9), %v2682_v1  ;;  %v2773_v2 = vld [vmem:[%s3238_s1] sm:$0xff] (!%p191_p9)   ;;  %v2789_v4 = vld [vmem:[%s3238_s1 + $0x8] sm:$0xff] (!%p191_p9)   ;;  %v2806_v6 = vld [vmem:[%s3238_s1 + $0x10] sm:$0xff] (!%p191_p9)   ;;  %vm268_vm1 = vcmask (!%p191_p9), 523264   ;;  %vm569_vm2 = vcmask (!%p191_p9), 130048  }
   0xf   : > { %2249 = vmatpush3.bf16.msra.mxu0 (!%p191_p9), %v2766_v0  ;;  %2256 = vmatprep.mubr.msk.bf16.mxu0 (!%p191_p9), %vm2683_vm0, %v2682_v1  ;;  %v2817_v7 = vld [vmem:[%s3238_s1 + $0x38] sm:$0xff] (!%p191_p9)   ;;  %v2834_v13 = vld [vmem:[%s3238_s1 + $0x40] sm:$0xff] (!%p191_p9)   ;;  %v2847_v15 = vld [vmem:[%s3238_s1 + $0x48] sm:$0xff] (!%p191_p9)   ;;  %s215_s14 = sand.u32 (!%p191_p9), 1, %s2672_s19   ;;  %s2133_s17 = sshll.u32 (!%p191_p9), %s2736_s22, 4  ;;  %vm1961_vm3 = vcmask (!%p191_p9), 516096  }
  0x10   : > { %2261 = vmatpush3.bf16.msra.mxu1 (!%p191_p9), %v2773_v2  ;;  %2250 = vmatprep.subr.bf16.mxu0 (!%p191_p9), %v2682_v1  ;;  %v2822_v8 = vld [vmem:[%s3238_s1 + $0x18] sm:$0xff] (!%p191_p9)   ;;  %v2841_v14 = vld [vmem:[%s3238_s1 + $0x60] sm:$0xff] (!%p191_p9)   ;;  %v2853_v16 = vld [vmem:[%s3238_s1 + $0x68] sm:$0xff] (!%p191_p9)   ;;  %s216_s23 = scalar_lea.vmem (!%p191_p9), [#allocation2], %s215_s14  ;;  %s2684_s8 = smov (!%p191_p9), [#allocation2]  }
  0x11   : > { %2262 = vmatprep.subr.bf16.mxu1 (!%p191_p9), %v2682_v1  ;;  %2268 = vmatprep.mubr.msk.bf16.mxu1 (!%p191_p9), %vm2683_vm0, %v2682_v1  ;;  %v2863_v17 = vld [vmem:[%s3238_s1 + $0x50] sm:$0xff] (!%p191_p9)   ;;  %v2881_v19 = vld [vmem:[%s3238_s1 + $0x58] sm:$0xff] (!%p191_p9)   ;;  %v2594_v25 = vld [vmem:[%s3240_s3 + $0x8] sm:$0xff] (!%p191_p9)   ;;  %s1976_s25 = sshll.u32 (!%p191_p9), %s216_s23, 4  ;;  %s2622_s9 = sshll.u32 (!%p191_p9), %s2684_s8, 4  ;;  %s3197_s25 = int_to_ptr.vmem [resolvable:$true] %s1976_s25  ;;  %s2623_s9 = int_to_ptr.vmem [resolvable:$false] %s2622_s9 }
  0x12   : > { %v2870_v18 = vld [vmem:[%s3238_s1 + $0x70] sm:$0xff] (!%p191_p9)   ;;  %v2887_v21 = vld [vmem:[%s3238_s1 + $0x78] sm:$0xff] (!%p191_p9)   ;;  %v2595_v26 = vld [vmem:[%s3240_s3] sm:$0xff] (!%p191_p9)   ;;  %s2618_s7 = scalar_lea.vmem (!%p191_p9), %s3197_s25, 16  ;;  %s2624_s10 = scalar_lea.vmem (!%p191_p9), %s2623_s9, 32 }
  0x13   : > { %2251 = vmatpush3.bf16.msra.mxu0 (!%p191_p9), %v2779_v3  ;;  %v2921_v40 = vld [vmem:[%s3239_s2] ss:$0 sm:$0xff] (!%p191_p9)  ;;  %v2597_v57 = vld [vmem:[%s3240_s3 + $0x18] sm:$0xff] (!%p191_p9)   ;;  %v2596_v59 = vld [vmem:[%s3240_s3 + $0x10] sm:$0xff] (!%p191_p9)   ;;  %p2619_p11 = scmp.ne.s32.totalorder (!%p191_p9), %s3197_s25, %s2618_s7  ;;  %p2625_p0 = scmp.lt.s32.totalorder (!%p191_p9), %s3197_s25, %s2623_s9 }
  0x14   : > { %2263 = vmatpush3.bf16.msra.mxu1 (!%p191_p9), %v2789_v4  ;;  %2252 = vmatprep.subr.bf16.mxu0 (!%p191_p9), %v2682_v1  ;;  %p2626_p1 = scmp.lt.s32.totalorder (!%p191_p9), %s2624_s10, %s2618_s7 }
  0x15   : > { %s218_s13 = scalar_select %p217_p10, %s2736_s22, 1  ;;  %2264 = vmatprep.subr.bf16.mxu1 %v2682_v1 }
  0x16   : > { %s1964_s22 = scalar_lea.sflag [#allocation3], %s215_s14  ;;  %p2620_p12 = pnand %p2619_p11, %p2753_p5 }
  0x17   : > { %s2536_s16 = smul.u32 40, %s218_s13  ;;  %2253 = vmatpush3.bf16.msra.mxu0 %v2799_v5  ;;  %p2627_p2 = por %p2626_p1, %p2625_p0 }
  0x18   : > { %2265 = vmatpush3.bf16.msra.mxu1 %v2806_v6  ;;  %2254 = vmatprep.subr.bf16.mxu0 %v2682_v1  ;;  %p2621_p13 = pneg %p2620_p12 }
  0x19   : > { %s2812_s30 = scalar_lea.vmem %s3237_s0, %s2536_s16  ;;  %2266 = vmatprep.subr.bf16.mxu1 %v2682_v1 }
  0x1a   : > { %v233_v9 = vld [vmem:[%s2812_s30 + $0x1] sm:$0xf]  ;;  %v2054_v20 = vld [vmem:[%s2812_s30 + $0x8] sm:$0xf]  ;;  %v2095_v63 = vld [vmem:[%s2812_s30 + $0x11] sm:$0xf]  ;;  %p2628_p3 = pnand %p2627_p2, %p2621_p13 }
  0x1b   : > { %v223_v10 = vld [vmem:[%s2812_s30] sm:$0xf]  ;;  %v234_v11 = vpack.c.bf16 %v233_v9, %v233_v9  ;;  %2255 = vmatpush3.bf16.msra.mxu0 %v2817_v7  ;;  %v2068_v22 = vld [vmem:[%s2812_s30 + $0x9] sm:$0xf]  ;;  %v2894_v23 = vpack.c.bf16 %v2054_v20, %v2054_v20  ;;  %v2093_v9 = vld [vmem:[%s2812_s30 + $0x10] sm:$0xf] }
  0x1c   : > { %v224_v12 = vpack.c.bf16 %v223_v10, %v223_v10  ;;  %2267 = vmatpush3.bf16.msra.mxu1 %v2822_v8  ;;  %2272 = vmatprep.subr.bf16.mxu0 %v2682_v1  ;;  %v2897_v24 = vpack.c.bf16 %v2068_v22, %v2068_v22  ;;  %v2982_v10 = vpack.c.bf16 %v2095_v63, %v2095_v63  ;;  %v2599_v20 = vld [vmem:[%s3240_s3 + $0x28] sm:$0xff]  }
  0x1d   : > { %2284 = vmatprep.subr.bf16.mxu1 %v2682_v1 }
  0x1e   : > { %2257 = vmatmul.mubr.msk.bf16.vlgmr.msra.gmra.mrb[0].mxu0 %vm268_vm1, %v234_v11  ;;  %v2985_v11 = vpack.c.bf16 %v2093_v9, %v2093_v9 }
  0x1f   : > { %2269 = vmatmul.mubr.msk.bf16.vlgmr.msra.gmra.mrb[0].mxu1 %vm268_vm1, %v224_v12  ;;  %2273 = vmatpush3.bf16.msra.mxu0 %v2834_v13  ;;  %v2598_v12 = vld [vmem:[%s3240_s3 + $0x20] sm:$0xff]  }
  0x20   : > { %2285 = vmatpush3.bf16.msra.mxu1 %v2841_v14  ;;  %2274 = vmatprep.subr.bf16.mxu0 %v2682_v1 }
  0x21   : > { %2286 = vmatprep.subr.bf16.mxu1 %v2682_v1  ;;  %2280 = vmatprep.mubr.msk.bf16.mxu0 %vm2683_vm0, %v2682_v1 }
  0x22   : > { %2292 = vmatprep.mubr.msk.bf16.mxu1 %vm2683_vm0, %v2682_v1 }
  0x23   : > { %2275 = vmatpush3.bf16.msra.mxu0 %v2847_v15 }
  0x24   : > { %2287 = vmatpush3.bf16.msra.mxu1 %v2853_v16  ;;  %2276 = vmatprep.subr.bf16.mxu0 %v2682_v1 }
  0x25   : > { %2288 = vmatprep.subr.bf16.mxu1 %v2682_v1 }
  0x27   : > { %2277 = vmatpush3.bf16.msra.mxu0 %v2863_v17 }
  0x28   : > { %2289 = vmatpush3.bf16.msra.mxu1 %v2870_v18  ;;  %2278 = vmatprep.subr.bf16.mxu0 %v2682_v1 }
  0x29   : > { %2290 = vmatprep.subr.bf16.mxu1 %v2682_v1 }
  0x2b   : > { %2279 = vmatpush3.bf16.msra.mxu0 %v2881_v19 }
  0x2c   : > { %2291 = vmatpush3.bf16.msra.mxu1 %v2887_v21  ;;  %2296 = vmatprep.subr.bf16.mxu0 %v2682_v1 }
  0x2d   : > { %2302 = vmatprep.subr.bf16.mxu1 %v2682_v1 }
  0x2e   : > { %2281 = vmatmul.mubr.msk.bf16.vlgmr.msra.gmra.mrb[4].mxu0 %vm268_vm1, %v2894_v23 }
  0x2f   : > { %2293 = vmatmul.mubr.msk.bf16.vlgmr.msra.gmra.mrb[4].mxu1 %vm268_vm1, %v2897_v24  ;;  %2298 = vmatprep.mubr.msk.bf16.mxu0 %vm2683_vm0, %v2682_v1 }
  0x30   : > { %2304 = vmatprep.mubr.msk.bf16.mxu1 %vm2683_vm0, %v2682_v1  ;;  %2297 = vmatpush3.bf16.msra.mxu0 %v2594_v25 }
  0x31   : > { %2303 = vmatpush3.bf16.msra.mxu1 %v2595_v26  ;;  %2308 = vmatprep.subr.bf16.mxu0 %v2682_v1 }
  0x32   : > { %2314 = vmatprep.subr.bf16.mxu1 %v2682_v1 }
  0xf1   : > { %v306_v27 = vpop.f32.mrb[0].mxu0 }
  0xf2   : > { %v373_v28 = vpop.f32.mrb[0].mxu1  ;;  %v2258_v29 = vpop.f32.mrb[1].mxu0 }
  0xf3   : > { %v374_v30 = vadd.f32 %v373_v28, %v306_v27  ;;  %v2270_v31 = vpop.f32.mrb[1].mxu1  ;;  %v309_v32 = vpop.f32.mrb[2].mxu0 }
  0xf4   : > { %v376_v33 = vpop.f32.mrb[2].mxu1  ;;  %v2259_v34 = vpop.f32.mrb[3].mxu0 }
  0xf5   : > { %v2271_v35 = vpop.f32.mrb[3].mxu1 }
 0x101   : > { %v452_v36 = vpop.f32.mrb[4].mxu0 }
 0x102   : > { %v458_v37 = vadd.f32 %v452_v36, %v374_v30  ;;  %v531_v38 = vpop.f32.mrb[4].mxu1  ;;  %v2282_v39 = vpop.f32.mrb[5].mxu0 }
 0x103   : > { %v2294_v41 = vpop.f32.mrb[5].mxu1  ;;  %v455_v42 = vpop.f32.mrb[6].mxu0 }
 0x104   : > { %v537_v43 = vadd.f32 %v531_v38, %v458_v37  ;;  %v534_v44 = vpop.f32.mrb[6].mxu1  ;;  %v2283_v45 = vpop.f32.mrb[7].mxu0 }
 0x105   : > { %v2295_v46 = vpop.f32.mrb[7].mxu1 }
 0x106   : > { %v545_v47 = vadd.f32 %v2921_v40, %v537_v43 }
 0x108   : > { %v547_v48 = vmul.f32 0.044715, %v545_v47  ;;  %v546_v54 = vmul.f32 0.5, %v545_v47 }
 0x10a   : > { %v548_v49 = vmul.f32 %v547_v48, %v545_v47 }
 0x10c   : > { %v549_v50 = vmul.f32 %v548_v49, %v545_v47 }
 0x10e   : > { %v550_v51 = vadd.f32 %v549_v50, %v545_v47 }
 0x110   : > { %v551_v52 = vmul.f32 0.7978846, %v550_v51 }
 0x112   : > { %2610 = vtanh.f32 %v551_v52 }
 0x11c   : > { %v2611_v53 = vpop.eup %2610 }
 0x11d   : > { %v553_v55 = vadd.f32 1.0, %v2611_v53 }
 0x11f   : > { %v554_v56 = vmul.f32 %v553_v55, %v546_v54 }
 0x121   : > { %v555_v58 = vpack.c.bf16 %v554_v56, %v554_v56 }
 0x123   : > { %2305 = vmatmul.mubr.msk.bf16.vlgmr.msra.gmra.mrb[8].mxu1 %vm569_vm2, %v555_v58  ;;  %v561_v60 = vshrl.u32 %v555_v58, 16  ;;  %v664_v62 = vrot.slane %v555_v58, 1 }
 0x124   : > { %2315 = vmatpush3.bf16.msra.mxu1 %v2597_v57  ;;  %2316 = vmatprep.mubr.msk.bf16.mxu1 %vm2683_vm0, %v2682_v1 }
 0x125   : > { %2299 = vmatmul.mubr.msk.bf16.vlgmr.msra.gmra.mrb[8].mxu0 %vm569_vm2, %v561_v60  ;;  %2332 = vmatprep.subr.bf16.mxu1 %v2682_v1  ;;  %v717_v61 = vrot.slane %v561_v60, 1 }
 0x126   : > { %2309 = vmatpush3.bf16.msra.mxu0 %v2596_v59  ;;  %2310 = vmatprep.mubr.msk.bf16.mxu0 %vm2683_vm0, %v2682_v1 }
 0x127   : > { %2320 = vmatprep.subr.bf16.mxu0 %v2682_v1 }
 0x12b   : > { %2317 = vmatmul.mubr.msk.bf16.vlgmr.msra.gmra.mrb[12].mxu1 %vm569_vm2, %v717_v61 }
 0x12c   : > { %2333 = vmatpush3.bf16.msra.mxu1 %v2773_v2  ;;  %2340 = vmatprep.mubr.msk.bf16.mxu1 %vm2683_vm0, %v2682_v1 }
 0x12d   : > { %2311 = vmatmul.mubr.msk.bf16.vlgmr.msra.gmra.mrb[12].mxu0 %vm569_vm2, %v664_v62  ;;  %2334 = vmatprep.subr.bf16.mxu1 %v2682_v1 }
 0x12e   : > { %2321 = vmatpush3.bf16.msra.mxu0 %v2766_v0  ;;  %2328 = vmatprep.mubr.msk.bf16.mxu0 %vm2683_vm0, %v2682_v1 }
 0x12f   : > { %2322 = vmatprep.subr.bf16.mxu0 %v2682_v1 }
 0x130   : > { %2335 = vmatpush3.bf16.msra.mxu1 %v2789_v4 }
 0x131   : > { %2336 = vmatprep.subr.bf16.mxu1 %v2682_v1 }
 0x132   : > { %2323 = vmatpush3.bf16.msra.mxu0 %v2779_v3 }
 0x133   : > { %2324 = vmatprep.subr.bf16.mxu0 %v2682_v1 }
 0x134   : > { %2337 = vmatpush3.bf16.msra.mxu1 %v2806_v6 }
 0x135   : > { %2338 = vmatprep.subr.bf16.mxu1 %v2682_v1 }
 0x136   : > { %2325 = vmatpush3.bf16.msra.mxu0 %v2799_v5 }
 0x137   : > { %2326 = vmatprep.subr.bf16.mxu0 %v2682_v1 }
 0x138   : > { %2339 = vmatpush3.bf16.msra.mxu1 %v2822_v8 }
 0x139   : > { %2356 = vmatprep.subr.bf16.mxu1 %v2682_v1 }
 0x13a   : > { %2327 = vmatpush3.bf16.msra.mxu0 %v2817_v7 }
 0x13b   : > { %2341 = vmatmul.mubr.msk.bf16.vlgmr.msra.gmra.mrb[16].mxu1 %vm268_vm1, %v2894_v23  ;;  %2344 = vmatprep.subr.bf16.mxu0 %v2682_v1 }
 0x13c   : > { %2357 = vmatpush3.bf16.msra.mxu1 %v2841_v14  ;;  %2364 = vmatprep.mubr.msk.bf16.mxu1 %vm2683_vm0, %v2682_v1 }
 0x13d   : > { %2329 = vmatmul.mubr.msk.bf16.vlgmr.msra.gmra.mrb[16].mxu0 %vm268_vm1, %v2897_v24  ;;  %2358 = vmatprep.subr.bf16.mxu1 %v2682_v1 }
 0x13e   : > { %2345 = vmatpush3.bf16.msra.mxu0 %v2834_v13  ;;  %2352 = vmatprep.mubr.msk.bf16.mxu0 %vm2683_vm0, %v2682_v1 }
 0x13f   : > { %2346 = vmatprep.subr.bf16.mxu0 %v2682_v1 }
 0x140   : > { %2359 = vmatpush3.bf16.msra.mxu1 %v2853_v16 }
 0x141   : > { %2360 = vmatprep.subr.bf16.mxu1 %v2682_v1 }
 0x142   : > { %2347 = vmatpush3.bf16.msra.mxu0 %v2847_v15 }
 0x143   : > { %2348 = vmatprep.subr.bf16.mxu0 %v2682_v1 }
 0x144   : > { %2361 = vmatpush3.bf16.msra.mxu1 %v2870_v18 }
 0x145   : > { %2362 = vmatprep.subr.bf16.mxu1 %v2682_v1 }
 0x146   : > { %2349 = vmatpush3.bf16.msra.mxu0 %v2863_v17 }
 0x147   : > { %2350 = vmatprep.subr.bf16.mxu0 %v2682_v1 }
 0x148   : > { %2363 = vmatpush3.bf16.msra.mxu1 %v2887_v21 }
 0x149   : > { %2374 = vmatprep.subr.bf16.mxu1 %v2682_v1 }
 0x14a   : > { %2351 = vmatpush3.bf16.msra.mxu0 %v2881_v19 }
 0x14b   : > { %2365 = vmatmul.mubr.msk.bf16.vlgmr.msra.gmra.mrb[20].mxu1 %vm268_vm1, %v2982_v10  ;;  %2368 = vmatprep.subr.bf16.mxu0 %v2682_v1 }
 0x14c   : > { %2376 = vmatprep.mubr.msk.bf16.mxu1 %vm2683_vm0, %v2682_v1  ;;  %2375 = vmatpush3.bf16.msra.mxu1 %v2599_v20 }
 0x14d   : > { %2353 = vmatmul.mubr.msk.bf16.vlgmr.msra.gmra.mrb[20].mxu0 %vm268_vm1, %v2985_v11  ;;  %2386 = vmatprep.subr.bf16.mxu1 %v2682_v1 }
 0x14e   : > { %2370 = vmatprep.mubr.msk.bf16.mxu0 %vm2683_vm0, %v2682_v1  ;;  %2369 = vmatpush3.bf16.msra.mxu0 %v2598_v12 }
 0x14f   : > { %2380 = vmatprep.subr.bf16.mxu0 %v2682_v1 }
 0x1f6   : > { %v655_v22 = vpop.f32.mrb[8].mxu1 }
 0x1f7   : > { %v2306_v23 = vpop.f32.mrb[9].mxu1 }
 0x1f8   : > { %v607_v24 = vpop.f32.mrb[8].mxu0  ;;  %v658_v25 = vpop.f32.mrb[10].mxu1 }
 0x1f9   : > { %v656_v26 = vadd.f32 %v655_v22, %v607_v24  ;;  %v2300_v27 = vpop.f32.mrb[9].mxu0  ;;  %v2307_v28 = vpop.f32.mrb[11].mxu1 }
 0x1fa   : > { %v610_v29 = vpop.f32.mrb[10].mxu0  ;;  %v2601_v28 = vld [vmem:[%s3240_s3 + $0x38] sm:$0xff]  }
 0x1fb   : > { %v2301_v30 = vpop.f32.mrb[11].mxu0 }
 0x1fe   : > { %v761_v31 = vpop.f32.mrb[12].mxu1 }
 0x1ff   : > { %v2318_v32 = vpop.f32.mrb[13].mxu1 }
 0x200   : > { %v708_v33 = vpop.f32.mrb[12].mxu0  ;;  %v764_v34 = vpop.f32.mrb[14].mxu1 }
 0x201   : > { %v714_v35 = vadd.f32 %v708_v33, %v656_v26  ;;  %v2312_v36 = vpop.f32.mrb[13].mxu0  ;;  %v2319_v37 = vpop.f32.mrb[15].mxu1  ;;  %v2600_v26 = vld [vmem:[%s3240_s3 + $0x30] sm:$0xff]   ;;  %v2602_v34 = vld [vmem:[%s3240_s3 + $0x40] sm:$0xff]  }
 0x202   : > { %v711_v38 = vpop.f32.mrb[14].mxu0 }
 0x203   : > { %v2313_v39 = vpop.f32.mrb[15].mxu0  ;;  %v3006_v41 = vadd.f32 %v761_v31, %v714_v35  ;;  %v2603_v35 = vld [vmem:[%s3240_s3 + $0x48] sm:$0xff]  }
 0x20e   : > { %v842_v42 = vpop.f32.mrb[16].mxu1 }
 0x20f   : > { %v2342_v43 = vpop.f32.mrb[17].mxu1 }
 0x210   : > { %v802_v44 = vpop.f32.mrb[16].mxu0  ;;  %v845_v45 = vpop.f32.mrb[18].mxu1 }
 0x211   : > { %v843_v46 = vadd.f32 %v842_v42, %v802_v44  ;;  %v2330_v47 = vpop.f32.mrb[17].mxu0  ;;  %v2343_v48 = vpop.f32.mrb[19].mxu1 }
 0x212   : > { %v805_v49 = vpop.f32.mrb[18].mxu0 }
 0x213   : > { %v2331_v50 = vpop.f32.mrb[19].mxu0 }
 0x21e   : > { %v934_v51 = vpop.f32.mrb[20].mxu1 }
 0x21f   : > { %v2366_v52 = vpop.f32.mrb[21].mxu1 }
 0x220   : > { %v888_v53 = vpop.f32.mrb[20].mxu0  ;;  %v937_v54 = vpop.f32.mrb[22].mxu1 }
 0x221   : > { %v894_v55 = vadd.f32 %v888_v53, %v843_v46  ;;  %v2354_v56 = vpop.f32.mrb[21].mxu0  ;;  %v2367_v57 = vpop.f32.mrb[23].mxu1 }
 0x222   : > { %v891_v58 = vpop.f32.mrb[22].mxu0 }
 0x223   : > { %v940_v59 = vadd.f32 %v934_v51, %v894_v55  ;;  %v2355_v60 = vpop.f32.mrb[23].mxu0 }
 0x225   : > { %v941_v61 = vadd.f32 %v2921_v40, %v940_v59 }
 0x227   : > { %v943_v62 = vmul.f32 0.044715, %v941_v61  ;;  %v942_v23 = vmul.f32 0.5, %v941_v61 }
 0x229   : > { %v944_v63 = vmul.f32 %v943_v62, %v941_v61 }
 0x22b   : > { %v945_v9 = vmul.f32 %v944_v63, %v941_v61 }
 0x22d   : > { %v946_v12 = vadd.f32 %v945_v9, %v941_v61 }
 0x22f   : > { %v947_v20 = vmul.f32 0.7978846, %v946_v12 }
 0x231   : > { %2612 = vtanh.f32 %v947_v20 }
 0x23b   : > { %v2613_v22 = vpop.eup %2612 }
 0x23c   : > { %v949_v24 = vadd.f32 1.0, %v2613_v22 }
 0x23e   : > { %v950_v25 = vmul.f32 %v949_v24, %v942_v23 }
 0x240   : > { %v951_v27 = vpack.c.bf16 %v950_v25, %v950_v25 }
 0x242   : > { %2371 = vmatmul.mubr.msk.bf16.vlgmr.msra.gmra.mrb[24].mxu0 %vm569_vm2, %v951_v27  ;;  %v1006_v29 = vshrl.u32 %v951_v27, 16  ;;  %v1061_v30 = vrot.slane %v951_v27, 1 }
 0x243   : > { %2381 = vmatpush3.bf16.msra.mxu0 %v2600_v26  ;;  %2382 = vmatprep.mubr.msk.bf16.mxu0 %vm2683_vm0, %v2682_v1 }
 0x244   : > { %2377 = vmatmul.mubr.msk.bf16.vlgmr.msra.gmra.mrb[24].mxu1 %vm569_vm2, %v1006_v29  ;;  %2392 = vmatprep.subr.bf16.mxu0 %v2682_v1  ;;  %v1114_v31 = vrot.slane %v1006_v29, 1 }
 0x245   : > { %2387 = vmatpush3.bf16.msra.mxu1 %v2601_v28  ;;  %2388 = vmatprep.mubr.msk.bf16.mxu1 %vm2683_vm0, %v2682_v1 }
 0x246   : > { %2404 = vmatprep.subr.bf16.mxu1 %v2682_v1 }
 0x24a   : > { %2383 = vmatmul.mubr.msk.bf16.vlgmr.msra.gmra.mrb[28].mxu0 %vm569_vm2, %v1061_v30 }
 0x24b   : > { %2393 = vmatpush3.bf16.msra.mxu0 %v2766_v0  ;;  %2400 = vmatprep.mubr.msk.bf16.mxu0 %vm2683_vm0, %v2682_v1 }
 0x24c   : > { %2389 = vmatmul.mubr.msk.bf16.vlgmr.msra.gmra.mrb[28].mxu1 %vm569_vm2, %v1114_v31  ;;  %2394 = vmatprep.subr.bf16.mxu0 %v2682_v1 }
 0x24d   : > { %2405 = vmatpush3.bf16.msra.mxu1 %v2773_v2  ;;  %2412 = vmatprep.mubr.msk.bf16.mxu1 %vm2683_vm0, %v2682_v1 }
 0x24e   : > { %2406 = vmatprep.subr.bf16.mxu1 %v2682_v1 }
 0x24f   : > { %2395 = vmatpush3.bf16.msra.mxu0 %v2779_v3 }
 0x250   : > { %2396 = vmatprep.subr.bf16.mxu0 %v2682_v1 }
 0x251   : > { %2407 = vmatpush3.bf16.msra.mxu1 %v2789_v4 }
 0x252   : > { %2408 = vmatprep.subr.bf16.mxu1 %v2682_v1 }
 0x253   : > { %2397 = vmatpush3.bf16.msra.mxu0 %v2799_v5 }
 0x254   : > { %2398 = vmatprep.subr.bf16.mxu0 %v2682_v1 }
 0x255   : > { %2409 = vmatpush3.bf16.msra.mxu1 %v2806_v6 }
 0x256   : > { %2410 = vmatprep.subr.bf16.mxu1 %v2682_v1 }
 0x257   : > { %2399 = vmatpush3.bf16.msra.mxu0 %v2817_v7 }
 0x258   : > { %2416 = vmatprep.subr.bf16.mxu0 %v2682_v1 }
 0x259   : > { %2411 = vmatpush3.bf16.msra.mxu1 %v2822_v8 }
 0x25a   : > { %2401 = vmatmul.mubr.msk.bf16.vlgmr.msra.gmra.mrb[32].mxu0 %vm268_vm1, %v2982_v10  ;;  %2428 = vmatprep.subr.bf16.mxu1 %v2682_v1  ;;  %v2107_v10 = vld [vmem:[%s2812_s30 + $0x18] sm:$0xf] }
 0x25b   : > { %2417 = vmatpush3.bf16.msra.mxu0 %v2834_v13  ;;  %2424 = vmatprep.mubr.msk.bf16.mxu0 %vm2683_vm0, %v2682_v1  ;;  %v3067_v32 = vpack.c.bf16 %v2107_v10, %v2107_v10 }
 0x25c   : > { %2413 = vmatmul.mubr.msk.bf16.vlgmr.msra.gmra.mrb[32].mxu1 %vm268_vm1, %v2985_v11  ;;  %2418 = vmatprep.subr.bf16.mxu0 %v2682_v1  ;;  %v2109_v11 = vld [vmem:[%s2812_s30 + $0x19] sm:$0xf] }
 0x25d   : > { %2429 = vmatpush3.bf16.msra.mxu1 %v2841_v14  ;;  %2436 = vmatprep.mubr.msk.bf16.mxu1 %vm2683_vm0, %v2682_v1  ;;  %v3070_v33 = vpack.c.bf16 %v2109_v11, %v2109_v11 }
 0x25e   : > { %2430 = vmatprep.subr.bf16.mxu1 %v2682_v1 }
 0x25f   : > { %2419 = vmatpush3.bf16.msra.mxu0 %v2847_v15 }
 0x260   : > { %2420 = vmatprep.subr.bf16.mxu0 %v2682_v1 }
 0x261   : > { %2431 = vmatpush3.bf16.msra.mxu1 %v2853_v16 }
 0x262   : > { %2432 = vmatprep.subr.bf16.mxu1 %v2682_v1 }
 0x263   : > { %2421 = vmatpush3.bf16.msra.mxu0 %v2863_v17 }
 0x264   : > { %2422 = vmatprep.subr.bf16.mxu0 %v2682_v1 }
 0x265   : > { %2433 = vmatpush3.bf16.msra.mxu1 %v2870_v18 }
 0x266   : > { %2434 = vmatprep.subr.bf16.mxu1 %v2682_v1 }
 0x267   : > { %2423 = vmatpush3.bf16.msra.mxu0 %v2881_v19 }
 0x268   : > { %2440 = vmatprep.subr.bf16.mxu0 %v2682_v1 }
 0x269   : > { %2435 = vmatpush3.bf16.msra.mxu1 %v2887_v21 }
 0x26a   : > { %2425 = vmatmul.mubr.msk.bf16.vlgmr.msra.gmra.mrb[36].mxu0 %vm268_vm1, %v3067_v32  ;;  %2446 = vmatprep.subr.bf16.mxu1 %v2682_v1 }
 0x26b   : > { %2442 = vmatprep.mubr.msk.bf16.mxu0 %vm2683_vm0, %v2682_v1  ;;  %2441 = vmatpush3.bf16.msra.mxu0 %v2602_v34 }
 0x26c   : > { %2437 = vmatmul.mubr.msk.bf16.vlgmr.msra.gmra.mrb[36].mxu1 %vm268_vm1, %v3070_v33  ;;  %2452 = vmatprep.subr.bf16.mxu0 %v2682_v1 }
 0x26d   : > { %2448 = vmatprep.mubr.msk.bf16.mxu1 %vm2683_vm0, %v2682_v1  ;;  %2447 = vmatpush3.bf16.msra.mxu1 %v2603_v35 }
 0x26e   : > { %2458 = vmatprep.subr.bf16.mxu1 %v2682_v1 }
 0x315   : > { %v997_v36 = vpop.f32.mrb[24].mxu0 }
 0x316   : > { %v1003_v37 = vadd.f32 %v997_v36, %v3006_v41  ;;  %v2372_v38 = vpop.f32.mrb[25].mxu0 }
 0x317   : > { %v1000_v39 = vpop.f32.mrb[26].mxu0  ;;  %v1051_v42 = vpop.f32.mrb[24].mxu1 }
 0x318   : > { %v1057_v43 = vadd.f32 %v1051_v42, %v1003_v37  ;;  %v2373_v44 = vpop.f32.mrb[27].mxu0  ;;  %v2378_v45 = vpop.f32.mrb[25].mxu1 }
 0x319   : > { %v1054_v46 = vpop.f32.mrb[26].mxu1  ;;  %v2605_v45 = vld [vmem:[%s3240_s3 + $0x58] sm:$0xff]  }
 0x31a   : > { %v2379_v47 = vpop.f32.mrb[27].mxu1 }
 0x31d   : > { %v1105_v48 = vpop.f32.mrb[28].mxu0 }
 0x31e   : > { %v1111_v49 = vadd.f32 %v1105_v48, %v1057_v43  ;;  %v2384_v50 = vpop.f32.mrb[29].mxu0  ;;  %v2604_v43 = vld [vmem:[%s3240_s3 + $0x50] sm:$0xff]  }
 0x31f   : > { %v1108_v51 = vpop.f32.mrb[30].mxu0  ;;  %v1158_v52 = vpop.f32.mrb[28].mxu1 }
 0x320   : > { %v3092_v53 = vadd.f32 %v1158_v52, %v1111_v49  ;;  %v2385_v54 = vpop.f32.mrb[31].mxu0  ;;  %v2390_v55 = vpop.f32.mrb[29].mxu1 }
 0x321   : > { %v1161_v56 = vpop.f32.mrb[30].mxu1 }
 0x322   : > { %v2391_v57 = vpop.f32.mrb[31].mxu1 }
 0x32d   : > { %v1199_v41 = vpop.f32.mrb[32].mxu0 }
 0x32e   : > { %v2402_v58 = vpop.f32.mrb[33].mxu0 }
 0x32f   : > { %v1202_v59 = vpop.f32.mrb[34].mxu0  ;;  %v1239_v60 = vpop.f32.mrb[32].mxu1 }
 0x330   : > { %v1240_v61 = vadd.f32 %v1239_v60, %v1199_v41  ;;  %v2403_v62 = vpop.f32.mrb[35].mxu0  ;;  %v2414_v63 = vpop.f32.mrb[33].mxu1 }
 0x331   : > { %v1242_v9 = vpop.f32.mrb[34].mxu1 }
 0x332   : > { %v2415_v12 = vpop.f32.mrb[35].mxu1 }
 0x33d   : > { %v1285_v20 = vpop.f32.mrb[36].mxu0 }
 0x33e   : > { %v1291_v22 = vadd.f32 %v1285_v20, %v1240_v61  ;;  %v2426_v23 = vpop.f32.mrb[37].mxu0 }
 0x33f   : > { %v1288_v24 = vpop.f32.mrb[38].mxu0  ;;  %v1331_v25 = vpop.f32.mrb[36].mxu1 }
 0x340   : > { %v1337_v26 = vadd.f32 %v1331_v25, %v1291_v22  ;;  %v2427_v27 = vpop.f32.mrb[39].mxu0  ;;  %v2438_v28 = vpop.f32.mrb[37].mxu1 }
 0x341   : > { %v1334_v29 = vpop.f32.mrb[38].mxu1 }
 0x342   : > { %v1338_v30 = vadd.f32 %v2921_v40, %v1337_v26  ;;  %v2439_v31 = vpop.f32.mrb[39].mxu1 }
 0x344   : > { %v1340_v10 = vmul.f32 0.044715, %v1338_v30  ;;  %v1339_v38 = vmul.f32 0.5, %v1338_v30 }
 0x346   : > { %v1341_v11 = vmul.f32 %v1340_v10, %v1338_v30 }
 0x348   : > { %v1342_v34 = vmul.f32 %v1341_v11, %v1338_v30 }
 0x34a   : > { %v1343_v35 = vadd.f32 %v1342_v34, %v1338_v30 }
 0x34c   : > { %v1344_v36 = vmul.f32 0.7978846, %v1343_v35 }
 0x34e   : > { %2614 = vtanh.f32 %v1344_v36 }
 0x358   : > { %v2615_v37 = vpop.eup %2614 }
 0x359   : > { %v1346_v39 = vadd.f32 1.0, %v2615_v37 }
 0x35b   : > { %v1347_v42 = vmul.f32 %v1346_v39, %v1339_v38 }
 0x35d   : > { %v1348_v44 = vpack.c.bf16 %v1347_v42, %v1347_v42  ;;  %v2608_v42 = vld [vmem:[%s3240_s3 + $0x70] sm:$0xff]  }
 0x35f   : > { %2443 = vmatmul.mubr.msk.bf16.vlgmr.msra.gmra.mrb[40].mxu0 %vm569_vm2, %v1348_v44  ;;  %v1403_v46 = vshrl.u32 %v1348_v44, 16  ;;  %v1458_v47 = vrot.slane %v1348_v44, 1 }
 0x360   : > { %2453 = vmatpush3.bf16.msra.mxu0 %v2604_v43  ;;  %2454 = vmatprep.mubr.msk.bf16.mxu0 %vm2683_vm0, %v2682_v1 }
 0x361   : > { %2449 = vmatmul.mubr.msk.bf16.vlgmr.msra.gmra.mrb[40].mxu1 %vm569_vm2, %v1403_v46  ;;  %2464 = vmatprep.subr.bf16.mxu0 %v2682_v1  ;;  %v1511_v48 = vrot.slane %v1403_v46, 1 }
 0x362   : > { %2459 = vmatpush3.bf16.msra.mxu1 %v2605_v45  ;;  %2460 = vmatprep.mubr.msk.bf16.mxu1 %vm2683_vm0, %v2682_v1 }
 0x363   : > { %2476 = vmatprep.subr.bf16.mxu1 %v2682_v1 }
 0x367   : > { %2455 = vmatmul.mubr.msk.bf16.vlgmr.msra.gmra.mrb[44].mxu0 %vm569_vm2, %v1458_v47 }
 0x368   : > { %2465 = vmatpush3.bf16.msra.mxu0 %v2766_v0  ;;  %2472 = vmatprep.mubr.msk.bf16.mxu0 %vm2683_vm0, %v2682_v1  ;;  %v2121_v0 = vld [vmem:[%s2812_s30 + $0x20] sm:$0xf] }
 0x369   : > { %2461 = vmatmul.mubr.msk.bf16.vlgmr.msra.gmra.mrb[44].mxu1 %vm569_vm2, %v1511_v48  ;;  %2466 = vmatprep.subr.bf16.mxu0 %v2682_v1 }
 0x36a   : > { %2477 = vmatpush3.bf16.msra.mxu1 %v2773_v2  ;;  %2484 = vmatprep.mubr.msk.bf16.mxu1 %vm2683_vm0, %v2682_v1  ;;  %v2123_v2 = vld [vmem:[%s2812_s30 + $0x21] sm:$0xf]  ;;  %s3195_s30 = scalar_lea.hbm %s3242_s5, %s2133_s17 }
 0x36b   : > { %2478 = vmatprep.subr.bf16.mxu1 %v2682_v1 }
 0x36c   : > { %2467 = vmatpush3.bf16.msra.mxu0 %v2779_v3  ;;  %v1644_v3 = vpack.c.bf16 %v2121_v0, %v2121_v0 }
 0x36d   : > { %2468 = vmatprep.subr.bf16.mxu0 %v2682_v1 }
 0x36e   : > { %2479 = vmatpush3.bf16.msra.mxu1 %v2789_v4  ;;  %v1690_v4 = vpack.c.bf16 %v2123_v2, %v2123_v2 }
 0x36f   : > { %2480 = vmatprep.subr.bf16.mxu1 %v2682_v1 }
 0x370   : > { %2469 = vmatpush3.bf16.msra.mxu0 %v2799_v5  ;;  %v2606_v5 = vld [vmem:[%s3240_s3 + $0x60] sm:$0xff]  }
 0x371   : > { %2470 = vmatprep.subr.bf16.mxu0 %v2682_v1 }
 0x372   : > { %2481 = vmatpush3.bf16.msra.mxu1 %v2806_v6  ;;  %v2607_v6 = vld [vmem:[%s3240_s3 + $0x68] sm:$0xff]  }
 0x373   : > { %2482 = vmatprep.subr.bf16.mxu1 %v2682_v1 }
 0x374   : > { %2471 = vmatpush3.bf16.msra.mxu0 %v2817_v7 }
 0x375   : > { %2488 = vmatprep.subr.bf16.mxu0 %v2682_v1 }
 0x376   : > { %2483 = vmatpush3.bf16.msra.mxu1 %v2822_v8 }
 0x377   : > { %2473 = vmatmul.mubr.msk.bf16.vlgmr.msra.gmra.mrb[48].mxu0 %vm268_vm1, %v3070_v33  ;;  %2500 = vmatprep.subr.bf16.mxu1 %v2682_v1 }
 0x378   : > { %2489 = vmatpush3.bf16.msra.mxu0 %v2834_v13  ;;  %2496 = vmatprep.mubr.msk.bf16.mxu0 %vm2683_vm0, %v2682_v1 }
 0x379   : > { %2485 = vmatmul.mubr.msk.bf16.vlgmr.msra.gmra.mrb[48].mxu1 %vm268_vm1, %v3067_v32  ;;  %2490 = vmatprep.subr.bf16.mxu0 %v2682_v1 }
 0x37a   : > { %2501 = vmatpush3.bf16.msra.mxu1 %v2841_v14  ;;  %2508 = vmatprep.mubr.msk.bf16.mxu1 %vm2683_vm0, %v2682_v1 }
 0x37b   : > { %2502 = vmatprep.subr.bf16.mxu1 %v2682_v1 }
 0x37c   : > { %2491 = vmatpush3.bf16.msra.mxu0 %v2847_v15 }
 0x37d   : > { %2492 = vmatprep.subr.bf16.mxu0 %v2682_v1 }
 0x37e   : > { %2503 = vmatpush3.bf16.msra.mxu1 %v2853_v16 }
 0x37f   : > { %2504 = vmatprep.subr.bf16.mxu1 %v2682_v1 }
 0x380   : > { %2493 = vmatpush3.bf16.msra.mxu0 %v2863_v17 }
 0x381   : > { %2494 = vmatprep.subr.bf16.mxu0 %v2682_v1 }
 0x382   : > { %2505 = vmatpush3.bf16.msra.mxu1 %v2870_v18 }
 0x383   : > { %2506 = vmatprep.subr.bf16.mxu1 %v2682_v1 }
 0x384   : > { %2495 = vmatpush3.bf16.msra.mxu0 %v2881_v19 }
 0x385   : > { %2512 = vmatprep.subr.bf16.mxu0 %v2682_v1 }
 0x386   : > { %2507 = vmatpush3.bf16.msra.mxu1 %v2887_v21 }
 0x387   : > { %2497 = vmatmul.mubr.msk.bf16.vlgmr.msra.gmra.mrb[52].mxu0 %vm268_vm1, %v1644_v3  ;;  %2518 = vmatprep.subr.bf16.mxu1 %v2682_v1 }
 0x388   : > { %2514 = vmatprep.mubr.msk.bf16.mxu0 %vm2683_vm0, %v2682_v1  ;;  %2513 = vmatpush3.bf16.msra.mxu0 %v2606_v5 }
 0x389   : > { %2509 = vmatmul.mubr.msk.bf16.vlgmr.msra.gmra.mrb[52].mxu1 %vm268_vm1, %v1690_v4  ;;  %2524 = vmatprep.subr.bf16.mxu0 %v2682_v1 }
 0x38a   : > { %2520 = vmatprep.mubr.msk.bf16.mxu1 %vm2683_vm0, %v2682_v1  ;;  %2519 = vmatpush3.bf16.msra.mxu1 %v2607_v6 }
 0x38b   : > { %2530 = vmatprep.subr.bf16.mxu1 %v2682_v1 }
 0x432   : > { %v1394_v7 = vpop.f32.mrb[40].mxu0 }
 0x433   : > { %v1400_v8 = vadd.f32 %v1394_v7, %v3092_v53  ;;  %v2444_v13 = vpop.f32.mrb[41].mxu0 }
 0x434   : > { %v1397_v14 = vpop.f32.mrb[42].mxu0  ;;  %v1448_v15 = vpop.f32.mrb[40].mxu1 }
 0x435   : > { %v1454_v16 = vadd.f32 %v1448_v15, %v1400_v8  ;;  %v2445_v17 = vpop.f32.mrb[43].mxu0  ;;  %v2450_v18 = vpop.f32.mrb[41].mxu1 }
 0x436   : > { %v1451_v19 = vpop.f32.mrb[42].mxu1  ;;  %v1959_v17 = vld [vmem:[%s3241_s4] sm:$0x1] }
 0x437   : > { %v2451_v21 = vpop.f32.mrb[43].mxu1 }
 0x43a   : > { %v1502_v32 = vpop.f32.mrb[44].mxu0 }
 0x43b   : > { %v1508_v33 = vadd.f32 %v1502_v32, %v1454_v16  ;;  %v2456_v49 = vpop.f32.mrb[45].mxu0 }
 0x43c   : > { %v1505_v50 = vpop.f32.mrb[46].mxu0  ;;  %v1555_v51 = vpop.f32.mrb[44].mxu1 }
 0x43d   : > { %v1561_v52 = vadd.f32 %v1555_v51, %v1508_v33  ;;  %v2457_v54 = vpop.f32.mrb[47].mxu0  ;;  %v2462_v55 = vpop.f32.mrb[45].mxu1 }
 0x43e   : > { %v1558_v56 = vpop.f32.mrb[46].mxu1 }
 0x43f   : > { %v2463_v57 = vpop.f32.mrb[47].mxu1 }
 0x44a   : > { %v1596_v41 = vpop.f32.mrb[48].mxu0 }
 0x44b   : > { %v2474_v53 = vpop.f32.mrb[49].mxu0 }
 0x44c   : > { %v1599_v58 = vpop.f32.mrb[50].mxu0  ;;  %v1636_v59 = vpop.f32.mrb[48].mxu1 }
 0x44d   : > { %v1637_v60 = vadd.f32 %v1636_v59, %v1596_v41  ;;  %v2475_v61 = vpop.f32.mrb[51].mxu0  ;;  %v2486_v62 = vpop.f32.mrb[49].mxu1 }
 0x44e   : > { %v1639_v63 = vpop.f32.mrb[50].mxu1 }
 0x44f   : > { %v2487_v9 = vpop.f32.mrb[51].mxu1 }
 0x45a   : > { %v1682_v12 = vpop.f32.mrb[52].mxu0 }
 0x45b   : > { %v1688_v20 = vadd.f32 %v1682_v12, %v1637_v60  ;;  %v2498_v22 = vpop.f32.mrb[53].mxu0 }
 0x45c   : > { %v1685_v23 = vpop.f32.mrb[54].mxu0  ;;  %v1728_v24 = vpop.f32.mrb[52].mxu1 }
 0x45d   : > { %v1734_v25 = vadd.f32 %v1728_v24, %v1688_v20  ;;  %v2499_v26 = vpop.f32.mrb[55].mxu0  ;;  %v2510_v27 = vpop.f32.mrb[53].mxu1 }
 0x45e   : > { %v1731_v28 = vpop.f32.mrb[54].mxu1 }
 0x45f   : > { %v1735_v29 = vadd.f32 %v2921_v40, %v1734_v25  ;;  %v2511_v30 = vpop.f32.mrb[55].mxu1  ;;  %v2609_v40 = vld [vmem:[%s3240_s3 + $0x78] sm:$0xff]  }
 0x461   : > { %v1737_v31 = vmul.f32 0.044715, %v1735_v29  ;;  %v1736_v37 = vmul.f32 0.5, %v1735_v29 }
 0x463   : > { %v1738_v10 = vmul.f32 %v1737_v31, %v1735_v29 }
 0x465   : > { %v1739_v11 = vmul.f32 %v1738_v10, %v1735_v29 }
 0x467   : > { %v1740_v34 = vadd.f32 %v1739_v11, %v1735_v29 }
 0x469   : > { %v1741_v35 = vmul.f32 0.7978846, %v1740_v34 }
 0x46b   : > { %2616 = vtanh.f32 %v1741_v35 }
 0x475   : > { %v2617_v36 = vpop.eup %2616 }
 0x476   : > { %v1743_v38 = vadd.f32 1.0, %v2617_v36 }
 0x478   : > { %v1744_v39 = vmul.f32 %v1743_v38, %v1736_v37 }
 0x47a   : > { %v1745_v43 = vpack.c.bf16 %v1744_v39, %v1744_v39 }
 0x47c   : > { %2515 = vmatmul.mubr.msk.bf16.vlgmr.msra.gmra.mrb[56].mxu0 %vm569_vm2, %v1745_v43  ;;  %v1800_v44 = vshrl.u32 %v1745_v43, 16  ;;  %v1855_v45 = vrot.slane %v1745_v43, 1 }
 0x47d   : > { %2525 = vmatpush3.bf16.msra.mxu0 %v2608_v42  ;;  %2526 = vmatprep.mubr.msk.bf16.mxu0 %vm2683_vm0, %v2682_v1 }
 0x47e   : > { %2521 = vmatmul.mubr.msk.bf16.vlgmr.msra.gmra.mrb[56].mxu1 %vm569_vm2, %v1800_v44  ;;  %v1908_v46 = vrot.slane %v1800_v44, 1 }
 0x47f   : > { %2531 = vmatpush3.bf16.msra.mxu1 %v2609_v40  ;;  %2532 = vmatprep.mubr.msk.bf16.mxu1 %vm2683_vm0, %v2682_v1 }
 0x484   : > { %2527 = vmatmul.mubr.msk.bf16.vlgmr.msra.gmra.mrb[60].mxu0 %vm569_vm2, %v1855_v45 }
 0x486   : > { %2533 = vmatmul.mubr.msk.bf16.vlgmr.msra.gmra.mrb[60].mxu1 %vm569_vm2, %v1908_v46 }
 0x54f   : > { %v1791_v47 = vpop.f32.mrb[56].mxu0 }
 0x550   : > { %v1797_v48 = vadd.f32 %v1791_v47, %v1561_v52  ;;  %v2516_v0 = vpop.f32.mrb[57].mxu0 }
 0x551   : > { %v1794_v2 = vpop.f32.mrb[58].mxu0  ;;  %v1845_v3 = vpop.f32.mrb[56].mxu1 }
 0x552   : > { %v1851_v4 = vadd.f32 %v1845_v3, %v1797_v48  ;;  %v2517_v5 = vpop.f32.mrb[59].mxu0  ;;  %v2522_v6 = vpop.f32.mrb[57].mxu1 }
 0x553   : > { %v1848_v7 = vpop.f32.mrb[58].mxu1 }
 0x554   : > { %v2523_v8 = vpop.f32.mrb[59].mxu1 }
 0x557   : > { %v1899_v13 = vpop.f32.mrb[60].mxu0 }
 0x558   : > { %v1905_v1 = vadd.f32 %v1899_v13, %v1851_v4  ;;  %v2528_v14 = vpop.f32.mrb[61].mxu0 }
 0x559   : > { %v1902_v15 = vpop.f32.mrb[62].mxu0  ;;  %v1952_v16 = vpop.f32.mrb[60].mxu1 }
 0x55a   : > { %v1958_v18 = vadd.f32 %v1952_v16, %v1905_v1  ;;  %v2529_v19 = vpop.f32.mrb[63].mxu0  ;;  %v2534_v21 = vpop.f32.mrb[61].mxu1 }
 0x55b   : > { %v1955_v32 = vpop.f32.mrb[62].mxu1 }
 0x55c   : > { %v1960_v33 = vadd.f32 %v1959_v17, %v1958_v18  ;;  %v2535_v49 = vpop.f32.mrb[63].mxu1 }
 0x55e   : > { %1962 = vst.msk [vmem:[%s216_s23] sm:$0x1] %vm1961_vm3, %v1960_v33 }
 0x55f   : > { %2631 = shalt.err (!%p2628_p3)
}
 0x560   : > { %s2632_s11 = scalar_lea.hbm %s3195_s30, 16  ;;  %s2636_s14 = scalar_lea.hbm %s3242_s5, 32 }
 0x561   : > { %p2633_p4 = scmp.ne.s32.totalorder %s3195_s30, %s2632_s11  ;;  %p2637_p9 = scmp.lt.u32.totalorder %s3195_s30, %s3242_s5 }
 0x562   : > { %p2638_p10 = scmp.lt.u32.totalorder %s2636_s14, %s2632_s11  ;;  %p2640_p12 = scmp.lt.u32.totalorder %s2632_s11, %s3195_s30 }
 0x563   : > { %p2634_p7 = pnand %p2633_p4, %p2753_p5 }
 0x564   : > { %p2639_p11 = por %p2638_p10, %p2637_p9 }
 0x565   : > { %p2635_p8 = pneg %p2634_p7 }
 0x566   : > { %p2641_p13 = por %p2640_p12, %p2639_p11 }
 0x568   : > { %p2642_p0 = pnand %p2641_p13, %p2635_p8 }
 0x56a   : > { %2645 = shalt.err (!%p2642_p0)
}
 0x56b   : > { %2537 = dma.vmem_to_hbm [thread:$0]  (%p2753_p5), %s3197_s25, 16, %s3195_s30, %s1964_s22  }
 0x56c PF: > { %p2543_p1 = scmp.ge.s32.totalorder %s2680_s21, 2  ;;  %s1988_s17 = sand.u32 1, %s2668_s18  }
 0x56d   : > { %s1989_s23 = scalar_lea.sflag [#allocation3], %s1988_s17 }
 0x56e   : > { %p2540_p2 = pnand %p2543_p1, %p2757_p6 }
 0x570   : > { %2663 = dma.done.wait (!%p2540_p2), %s1989_s23, 16  }
 0x571   : > { %2665 = vsyncadd (!%p2540_p2), %s1989_s23, 4294967280  ;;  %p15_p3 = scmp.ge.s32.totalorder %s2740_s24, 4   ;;  %s3245_s18 = smov %s2672_s19 }
 0x572   : > { %s3246_s19 = smov %s2676_s20  ;;  %s3247_s20 = smov %s2751_s27 }
 0x573   : > { %s3248_s21 = smov %s2740_s24  ;;  %17 = sbr.rel (!%p15_p3) target bundleno = 3 (0x3), region = 82 }
 0x57a   :  { %1993 = vsyncpa [#allocation3], 1 }
 0x57b   :  { %1995 = vsyncpa [#allocation3 + $0x1], 1 }

</bundles_post_ra>
